<compile_context>
chip_gen: v7x
topology: tpu7x:2x2x1
jax: 0.10.0
libtpu: 0.0.40
codegen_flags: <defaults>
</compile_context>

<pallas_src>
import functools
import math

import jax
import jax.numpy as jnp
from jax import lax
from jax.experimental import pallas as pl
from jax.experimental.pallas import tpu as pltpu


_GELU_C = math.sqrt(2.0 / math.pi)


def _gelu_tanh(x):
    # tanh-approx GELU (max |err| vs exact erf GELU ~1e-3, well inside the
    # block's accuracy budget); tanh runs on the EUP, freeing VALU slots.
    return 0.5 * x * (1.0 + jnp.tanh(_GELU_C * (x + 0.044715 * x * x * x)))


def _make_tap_masks(H, W, N, dtype=jnp.float32):
    """(9, 1, N*H*W) masks: mask[k, 0, n*HW + h*W + w] = 1 iff (h+dy, w+dx) lies
    inside the image for tap k = (dy+1)*3 + (dx+1).  Folds the conv's zero
    padding AND guards the lane-roll wrap across sample boundaries."""
    pos = jnp.arange(H * W, dtype=jnp.int32)
    row = pos // W
    col = pos % W
    masks = []
    for dy in (-1, 0, 1):
        for dx in (-1, 0, 1):
            valid = ((row + dy >= 0) & (row + dy < H)
                     & (col + dx >= 0) & (col + dx < W))
            masks.append(valid.astype(dtype))
    m = jnp.stack(masks, axis=0).reshape(9, 1, H * W)
    return jnp.tile(m, (1, 1, N))          # repeat per sample along the lanes


def _basic_block_kernel(H, W, N,
                        mask_ref, x_ref, w1_ref, b1_ref, g1_ref, be1_ref,
                        w2_ref, b2_ref, g2_ref, be2_ref, o_ref):
    HW = H * W
    L = N * HW
    x = x_ref[...]                          # (C, N*HW) f32, lanes = batch*spatial
    C = x.shape[0]
    inv_n = 1.0 / (C * HW)                  # GroupNorm(1, C): per-sample stats
    # Load the 9 boundary masks once; reused by both convolutions.
    masks = [mask_ref[k] for k in range(9)]          # each (1, L) f32

    def conv3x3(a, w_bf16, b):
        # im2col via 8 lane-rolls (XLU) + masks -> one K=9C MXU matmul (bf16).
        cols = []
        for dy in (-1, 0, 1):
            for dx in (-1, 0, 1):
                k = (dy + 1) * 3 + (dx + 1)
                s = dy * W + dx             # want shifted[:, p] = a[:, p + s]
                if s == 0:
                    col = a
                else:
                    col = pltpu.roll(a, shift=(-s) % L, axis=1) * masks[k]
                cols.append(col.astype(jnp.bfloat16))
        slab = jnp.concatenate(cols, axis=0)          # (9*C, L) bf16
        return jnp.dot(w_bf16, slab,
                       preferred_element_type=jnp.float32) + b

    def group_norm(a, gamma, beta, eps=1e-5):
        # nn.GroupNorm(1, C): stats per sample over all of (C, H, W).
        # Single pass: var = E[x^2] - mean^2.
        def full_sum(v):                    # (C, HW) -> (1, 1)
            return jnp.sum(jnp.sum(v, axis=1, keepdims=True),
                           axis=0, keepdims=True)
        parts = []
        for n in range(N):                  # static, 128-aligned lane slices
            s = a[:, n * HW:(n + 1) * HW]
            mean = full_sum(s) * inv_n
            ex2 = full_sum(s * s) * inv_n
            var = ex2 - mean * mean
            parts.append((s - mean) * lax.rsqrt(var + eps))
        normed = parts[0] if N == 1 else jnp.concatenate(parts, axis=1)
        return normed * gamma + beta        # per-channel affine, (C,1) broadcast

    out = conv3x3(x, w1_ref[...], b1_ref[...])                   # conv1
    out = group_norm(out, g1_ref[...], be1_ref[...])             # norm1
    out = _gelu_tanh(out)                                        # GELU
    out = conv3x3(out, w2_ref[...], b2_ref[...])                 # conv2
    out = group_norm(out, g2_ref[...], be2_ref[...])             # norm2
    out = out + x                                                # residual (Identity upsample)
    # TODO(synk): upsample=True branch (1x1 conv + bilinear 2x upsample) is not
    #             implemented; this kernel covers the default upsample=False path.
    out = _gelu_tanh(out)                                        # final GELU
    o_ref[...] = out.astype(o_ref.dtype)


def basic_block_forward(x_nchw, params):
    """Pallas forward pass of BasicBlock(planes, upsample=False).
    x_nchw: (N, C, H, W) float32; params in PyTorch layouts."""
    N, C, H, W = x_nchw.shape
    HW = H * W
    L = N * HW
    # Channels-first, batch folded into lanes: (N, C, H, W) -> (C, N*HW).
    x_cl = jnp.transpose(x_nchw.reshape(N, C, HW), (1, 0, 2)).reshape(C, L)

    def conv_w(w):   # (Co, Ci, 3, 3) -> (Co, 9*Ci), column = (ky*3+kx)*Ci + ci
        return jnp.transpose(w, (0, 2, 3, 1)).reshape(C, 9 * C).astype(jnp.bfloat16)

    w1 = conv_w(params["conv1_w"]); b1 = params["conv1_b"].reshape(C, 1)
    w2 = conv_w(params["conv2_w"]); b2 = params["conv2_b"].reshape(C, 1)
    g1 = params["norm1_w"].reshape(C, 1); be1 = params["norm1_b"].reshape(C, 1)
    g2 = params["norm2_w"].reshape(C, 1); be2 = params["norm2_b"].reshape(C, 1)
    masks = _make_tap_masks(H, W, N, jnp.float32)     # (9, 1, L), built once

    def fspec(shape):
        return pl.BlockSpec(shape, lambda i: (0,) * len(shape))

    out_flat = pl.pallas_call(
        functools.partial(_basic_block_kernel, H, W, N),
        out_shape=jax.ShapeDtypeStruct((C, L), x_cl.dtype),
        grid=(1,),   # whole batch in one step: no serial grid loop on 1-TC chips
        in_specs=[
            fspec((9, 1, L)),
            fspec((C, L)),
            fspec((C, 9 * C)), fspec((C, 1)), fspec((C, 1)), fspec((C, 1)),
            fspec((C, 9 * C)), fspec((C, 1)), fspec((C, 1)), fspec((C, 1)),
        ],
        out_specs=fspec((C, L)),
    )(masks, x_cl, w1, b1, g1, be1, w2, b2, g2, be2)

    # (C, N*HW) -> (N, C, H, W)
    return jnp.transpose(out_flat.reshape(C, N, HW), (1, 0, 2)).reshape(N, C, H, W)


def basic_block_reference(x, params):
    """Pure-JAX (XLA) reference mirroring the PyTorch module (exact-erf GELU)."""
    def conv(y, w, b):
        out = lax.conv_general_dilated(
            y, w, window_strides=(1, 1), padding="SAME",
            dimension_numbers=("NCHW", "OIHW", "NCHW"),
            precision=lax.Precision.HIGHEST)
        return out + b[None, :, None, None]

    def gn(y, g, bt, eps=1e-5):
        mean = jnp.mean(y, axis=(1, 2, 3), keepdims=True)
        var = jnp.mean((y - mean) ** 2, axis=(1, 2, 3), keepdims=True)
        return (y - mean) * lax.rsqrt(var + eps) * g[None, :, None, None] \
            + bt[None, :, None, None]

    gelu = lambda v: jax.nn.gelu(v, approximate=False)
    out = conv(x, params["conv1_w"], params["conv1_b"])
    out = gn(out, params["norm1_w"], params["norm1_b"])
    out = gelu(out)
    out = conv(out, params["conv2_w"], params["conv2_b"])
    out = gn(out, params["norm2_w"], params["norm2_b"])
    out = out + x
    return gelu(out)


if __name__ == "__main__":
    N, C, H, W = 2, 32, 16, 16          # planes = 32

    key = jax.random.PRNGKey(0)
    keys = jax.random.split(key, 9)
    params = {
        "conv1_w": 0.05 * jax.random.normal(keys[0], (C, C, 3, 3), jnp.float32),
        "conv1_b": 0.05 * jax.random.normal(keys[1], (C,), jnp.float32),
        "conv2_w": 0.05 * jax.random.normal(keys[2], (C, C, 3, 3), jnp.float32),
        "conv2_b": 0.05 * jax.random.normal(keys[3], (C,), jnp.float32),
        "norm1_w": 1.0 + 0.05 * jax.random.normal(keys[4], (C,), jnp.float32),
        "norm1_b": 0.05 * jax.random.normal(keys[5], (C,), jnp.float32),
        "norm2_w": 1.0 + 0.05 * jax.random.normal(keys[6], (C,), jnp.float32),
        "norm2_b": 0.05 * jax.random.normal(keys[7], (C,), jnp.float32),
    }
    x = jax.random.normal(keys[8], (N, C, H, W), jnp.float32)

    out = jax.block_until_ready(basic_block_forward(x, params))
    ref = jax.block_until_ready(basic_block_reference(x, params))

    assert out.shape == x.shape and out.dtype == x.dtype
    max_err = float(jnp.max(jnp.abs(out - ref)))
    # bf16 matmul inputs + tanh GELU vs f32/erf reference: expected max err ~1e-2.
    assert max_err < 3e-2, f"mismatch vs reference: max abs err = {max_err}"
    print("KERNEL_OK")
</pallas_src>

<mosaic_0001>
module attributes {stable_mosaic.version = 11 : i64} {
  func.func @_basic_block_kernel(%arg0: i32, %arg1: memref<9x1x512xf32, #tpu.memory_space<vmem>>, %arg2: memref<32x512xf32, #tpu.memory_space<vmem>>, %arg3: memref<32x288xbf16, #tpu.memory_space<vmem>>, %arg4: memref<32x1xf32, #tpu.memory_space<vmem>>, %arg5: memref<32x1xf32, #tpu.memory_space<vmem>>, %arg6: memref<32x1xf32, #tpu.memory_space<vmem>>, %arg7: memref<32x288xbf16, #tpu.memory_space<vmem>>, %arg8: memref<32x1xf32, #tpu.memory_space<vmem>>, %arg9: memref<32x1xf32, #tpu.memory_space<vmem>>, %arg10: memref<32x1xf32, #tpu.memory_space<vmem>>, %arg11: memref<32x512xf32, #tpu.memory_space<vmem>>) attributes {dimension_semantics = [#tpu.dimension_semantics<arbitrary>], iteration_bounds = array<i64: 1>, scalar_prefetch = 0 : i64, scratch_operands = 0 : i64, tpu.core_type = #tpu.core_type<tc>, window_params = [{pipeline_mode = #tpu.pipeline_mode<synchronous>, transform_indices = @transform_0, window_bounds = array<i64: 9, 1, 512>}, {pipeline_mode = #tpu.pipeline_mode<synchronous>, transform_indices = @transform_1, window_bounds = array<i64: 32, 512>}, {pipeline_mode = #tpu.pipeline_mode<synchronous>, transform_indices = @transform_2, window_bounds = array<i64: 32, 288>}, {pipeline_mode = #tpu.pipeline_mode<synchronous>, transform_indices = @transform_3, window_bounds = array<i64: 32, 1>}, {pipeline_mode = #tpu.pipeline_mode<synchronous>, transform_indices = @transform_4, window_bounds = array<i64: 32, 1>}, {pipeline_mode = #tpu.pipeline_mode<synchronous>, transform_indices = @transform_5, window_bounds = array<i64: 32, 1>}, {pipeline_mode = #tpu.pipeline_mode<synchronous>, transform_indices = @transform_6, window_bounds = array<i64: 32, 288>}, {pipeline_mode = #tpu.pipeline_mode<synchronous>, transform_indices = @transform_7, window_bounds = array<i64: 32, 1>}, {pipeline_mode = #tpu.pipeline_mode<synchronous>, transform_indices = @transform_8, window_bounds = array<i64: 32, 1>}, {pipeline_mode = #tpu.pipeline_mode<synchronous>, transform_indices = @transform_9, window_bounds = array<i64: 32, 1>}, {pipeline_mode = #tpu.pipeline_mode<synchronous>, transform_indices = @transform_10, window_bounds = array<i64: 32, 512>}]} {
    %c0 = arith.constant 0 : index
    %c0_0 = arith.constant 0 : index
    %0 = vector.load %arg2[%c0, %c0_0] : memref<32x512xf32, #tpu.memory_space<vmem>>, vector<32x512xf32>
    %c0_1 = arith.constant 0 : index
    %c0_2 = arith.constant 0 : index
    %c0_3 = arith.constant 0 : index
    %1 = vector.load %arg1[%c0_1, %c0_2, %c0_3] : memref<9x1x512xf32, #tpu.memory_space<vmem>>, vector<1x1x512xf32>
    %2 = vector.shape_cast %1 : vector<1x1x512xf32> to vector<1x512xf32>
    %c1 = arith.constant 1 : index
    %c0_4 = arith.constant 0 : index
    %c0_5 = arith.constant 0 : index
    %3 = vector.load %arg1[%c1, %c0_4, %c0_5] : memref<9x1x512xf32, #tpu.memory_space<vmem>>, vector<1x1x512xf32>
    %4 = vector.shape_cast %3 : vector<1x1x512xf32> to vector<1x512xf32>
    %c2 = arith.constant 2 : index
    %c0_6 = arith.constant 0 : index
    %c0_7 = arith.constant 0 : index
    %5 = vector.load %arg1[%c2, %c0_6, %c0_7] : memref<9x1x512xf32, #tpu.memory_space<vmem>>, vector<1x1x512xf32>
    %6 = vector.shape_cast %5 : vector<1x1x512xf32> to vector<1x512xf32>
    %c3 = arith.constant 3 : index
    %c0_8 = arith.constant 0 : index
    %c0_9 = arith.constant 0 : index
    %7 = vector.load %arg1[%c3, %c0_8, %c0_9] : memref<9x1x512xf32, #tpu.memory_space<vmem>>, vector<1x1x512xf32>
    %8 = vector.shape_cast %7 : vector<1x1x512xf32> to vector<1x512xf32>
    %c5 = arith.constant 5 : index
    %c0_10 = arith.constant 0 : index
    %c0_11 = arith.constant 0 : index
    %9 = vector.load %arg1[%c5, %c0_10, %c0_11] : memref<9x1x512xf32, #tpu.memory_space<vmem>>, vector<1x1x512xf32>
    %10 = vector.shape_cast %9 : vector<1x1x512xf32> to vector<1x512xf32>
    %c6 = arith.constant 6 : index
    %c0_12 = arith.constant 0 : index
    %c0_13 = arith.constant 0 : index
    %11 = vector.load %arg1[%c6, %c0_12, %c0_13] : memref<9x1x512xf32, #tpu.memory_space<vmem>>, vector<1x1x512xf32>
    %12 = vector.shape_cast %11 : vector<1x1x512xf32> to vector<1x512xf32>
    %c7 = arith.constant 7 : index
    %c0_14 = arith.constant 0 : index
    %c0_15 = arith.constant 0 : index
    %13 = vector.load %arg1[%c7, %c0_14, %c0_15] : memref<9x1x512xf32, #tpu.memory_space<vmem>>, vector<1x1x512xf32>
    %14 = vector.shape_cast %13 : vector<1x1x512xf32> to vector<1x512xf32>
    %c8 = arith.constant 8 : index
    %c0_16 = arith.constant 0 : index
    %c0_17 = arith.constant 0 : index
    %15 = vector.load %arg1[%c8, %c0_16, %c0_17] : memref<9x1x512xf32, #tpu.memory_space<vmem>>, vector<1x1x512xf32>
    %16 = vector.shape_cast %15 : vector<1x1x512xf32> to vector<1x512xf32>
    %c0_18 = arith.constant 0 : index
    %c0_19 = arith.constant 0 : index
    %17 = vector.load %arg3[%c0_18, %c0_19] : memref<32x288xbf16, #tpu.memory_space<vmem>>, vector<32x288xbf16>
    %c0_20 = arith.constant 0 : index
    %c0_21 = arith.constant 0 : index
    %18 = vector.load %arg4[%c0_20, %c0_21] : memref<32x1xf32, #tpu.memory_space<vmem>>, vector<32x1xf32>
    %c17_i32 = arith.constant 17 : i32
    %19 = tpu.dynamic_rotate %0 by %c17_i32 dim 1 : vector<32x512xf32>, i32 -> vector<32x512xf32>
    %20 = vector.broadcast %2 : vector<1x512xf32> to vector<32x512xf32>
    %21 = arith.mulf %19, %20 : vector<32x512xf32>
    %22 = arith.truncf %21 : vector<32x512xf32> to vector<32x512xbf16>
    %c16_i32 = arith.constant 16 : i32
    %23 = tpu.dynamic_rotate %0 by %c16_i32 dim 1 : vector<32x512xf32>, i32 -> vector<32x512xf32>
    %24 = vector.broadcast %4 : vector<1x512xf32> to vector<32x512xf32>
    %25 = arith.mulf %23, %24 : vector<32x512xf32>
    %26 = arith.truncf %25 : vector<32x512xf32> to vector<32x512xbf16>
    %c15_i32 = arith.constant 15 : i32
    %27 = tpu.dynamic_rotate %0 by %c15_i32 dim 1 : vector<32x512xf32>, i32 -> vector<32x512xf32>
    %28 = vector.broadcast %6 : vector<1x512xf32> to vector<32x512xf32>
    %29 = arith.mulf %27, %28 : vector<32x512xf32>
    %30 = arith.truncf %29 : vector<32x512xf32> to vector<32x512xbf16>
    %c1_i32 = arith.constant 1 : i32
    %31 = tpu.dynamic_rotate %0 by %c1_i32 dim 1 : vector<32x512xf32>, i32 -> vector<32x512xf32>
    %32 = vector.broadcast %8 : vector<1x512xf32> to vector<32x512xf32>
    %33 = arith.mulf %31, %32 : vector<32x512xf32>
    %34 = arith.truncf %33 : vector<32x512xf32> to vector<32x512xbf16>
    %35 = arith.truncf %0 : vector<32x512xf32> to vector<32x512xbf16>
    %c511_i32 = arith.constant 511 : i32
    %36 = tpu.dynamic_rotate %0 by %c511_i32 dim 1 : vector<32x512xf32>, i32 -> vector<32x512xf32>
    %37 = vector.broadcast %10 : vector<1x512xf32> to vector<32x512xf32>
    %38 = arith.mulf %36, %37 : vector<32x512xf32>
    %39 = arith.truncf %38 : vector<32x512xf32> to vector<32x512xbf16>
    %c497_i32 = arith.constant 497 : i32
    %40 = tpu.dynamic_rotate %0 by %c497_i32 dim 1 : vector<32x512xf32>, i32 -> vector<32x512xf32>
    %41 = vector.broadcast %12 : vector<1x512xf32> to vector<32x512xf32>
    %42 = arith.mulf %40, %41 : vector<32x512xf32>
    %43 = arith.truncf %42 : vector<32x512xf32> to vector<32x512xbf16>
    %c496_i32 = arith.constant 496 : i32
    %44 = tpu.dynamic_rotate %0 by %c496_i32 dim 1 : vector<32x512xf32>, i32 -> vector<32x512xf32>
    %45 = vector.broadcast %14 : vector<1x512xf32> to vector<32x512xf32>
    %46 = arith.mulf %44, %45 : vector<32x512xf32>
    %47 = arith.truncf %46 : vector<32x512xf32> to vector<32x512xbf16>
    %c495_i32 = arith.constant 495 : i32
    %48 = tpu.dynamic_rotate %0 by %c495_i32 dim 1 : vector<32x512xf32>, i32 -> vector<32x512xf32>
    %49 = vector.broadcast %16 : vector<1x512xf32> to vector<32x512xf32>
    %50 = arith.mulf %48, %49 : vector<32x512xf32>
    %51 = arith.truncf %50 : vector<32x512xf32> to vector<32x512xbf16>
    %52 = tpu.concatenate %22, %26, %30, %34, %35, %39, %43, %47, %51 in 0 : vector<32x512xbf16>, vector<32x512xbf16>, vector<32x512xbf16>, vector<32x512xbf16>, vector<32x512xbf16>, vector<32x512xbf16>, vector<32x512xbf16>, vector<32x512xbf16>, vector<32x512xbf16> -> vector<288x512xbf16>
    %cst = arith.constant dense<0.000000e+00> : vector<32x512xf32>
    %53 = tpu.matmul %17, %52, %cst {dimension_numbers = #tpu.dot_dimension_numbers<[1], [0], [0], [1], [0, 0, 1, 1], [], []>} : vector<32x288xbf16>, vector<288x512xbf16>, vector<32x512xf32> -> vector<32x512xf32>
    %54 = vector.broadcast %18 : vector<32x1xf32> to vector<32x512xf32>
    %55 = arith.addf %53, %54 : vector<32x512xf32>
    %c0_22 = arith.constant 0 : index
    %c0_23 = arith.constant 0 : index
    %56 = vector.load %arg5[%c0_22, %c0_23] : memref<32x1xf32, #tpu.memory_space<vmem>>, vector<32x1xf32>
    %c0_24 = arith.constant 0 : index
    %c0_25 = arith.constant 0 : index
    %57 = vector.load %arg6[%c0_24, %c0_25] : memref<32x1xf32, #tpu.memory_space<vmem>>, vector<32x1xf32>
    %58 = vector.extract_strided_slice %55 {offsets = [0, 0], sizes = [32, 256], strides = [1, 1]} : vector<32x512xf32> to vector<32x256xf32>
    %cst_26 = arith.constant dense<0.000000e+00> : vector<32xf32>
    %59 = vector.multi_reduction <add>, %58, %cst_26 [1] : vector<32x256xf32> to vector<32xf32>
    %60 = vector.shape_cast %59 : vector<32xf32> to vector<32x1xf32>
    %cst_27 = arith.constant dense<0.000000e+00> : vector<1xf32>
    %61 = vector.multi_reduction <add>, %60, %cst_27 [0] : vector<32x1xf32> to vector<1xf32>
    %62 = vector.shape_cast %61 : vector<1xf32> to vector<1x1xf32>
    %cst_28 = arith.constant 1.22070313E-4 : f32
    %63 = vector.broadcast %cst_28 : f32 to vector<1x1xf32>
    %64 = arith.mulf %62, %63 : vector<1x1xf32>
    %65 = arith.mulf %58, %58 : vector<32x256xf32>
    %cst_29 = arith.constant dense<0.000000e+00> : vector<32xf32>
    %66 = vector.multi_reduction <add>, %65, %cst_29 [1] : vector<32x256xf32> to vector<32xf32>
    %67 = vector.shape_cast %66 : vector<32xf32> to vector<32x1xf32>
    %cst_30 = arith.constant dense<0.000000e+00> : vector<1xf32>
    %68 = vector.multi_reduction <add>, %67, %cst_30 [0] : vector<32x1xf32> to vector<1xf32>
    %69 = vector.shape_cast %68 : vector<1xf32> to vector<1x1xf32>
    %cst_31 = arith.constant 1.22070313E-4 : f32
    %70 = vector.broadcast %cst_31 : f32 to vector<1x1xf32>
    %71 = arith.mulf %69, %70 : vector<1x1xf32>
    %72 = arith.mulf %64, %64 : vector<1x1xf32>
    %73 = arith.subf %71, %72 : vector<1x1xf32>
    %74 = vector.broadcast %64 : vector<1x1xf32> to vector<32x256xf32>
    %75 = arith.subf %58, %74 : vector<32x256xf32>
    %cst_32 = arith.constant 9.99999974E-6 : f32
    %76 = vector.broadcast %cst_32 : f32 to vector<1x1xf32>
    %77 = arith.addf %73, %76 : vector<1x1xf32>
    %78 = math.rsqrt %77 : vector<1x1xf32>
    %79 = vector.broadcast %78 : vector<1x1xf32> to vector<32x256xf32>
    %80 = arith.mulf %75, %79 : vector<32x256xf32>
    %81 = vector.extract_strided_slice %55 {offsets = [0, 256], sizes = [32, 256], strides = [1, 1]} : vector<32x512xf32> to vector<32x256xf32>
    %cst_33 = arith.constant dense<0.000000e+00> : vector<32xf32>
    %82 = vector.multi_reduction <add>, %81, %cst_33 [1] : vector<32x256xf32> to vector<32xf32>
    %83 = vector.shape_cast %82 : vector<32xf32> to vector<32x1xf32>
    %cst_34 = arith.constant dense<0.000000e+00> : vector<1xf32>
    %84 = vector.multi_reduction <add>, %83, %cst_34 [0] : vector<32x1xf32> to vector<1xf32>
    %85 = vector.shape_cast %84 : vector<1xf32> to vector<1x1xf32>
    %cst_35 = arith.constant 1.22070313E-4 : f32
    %86 = vector.broadcast %cst_35 : f32 to vector<1x1xf32>
    %87 = arith.mulf %85, %86 : vector<1x1xf32>
    %88 = arith.mulf %81, %81 : vector<32x256xf32>
    %cst_36 = arith.constant dense<0.000000e+00> : vector<32xf32>
    %89 = vector.multi_reduction <add>, %88, %cst_36 [1] : vector<32x256xf32> to vector<32xf32>
    %90 = vector.shape_cast %89 : vector<32xf32> to vector<32x1xf32>
    %cst_37 = arith.constant dense<0.000000e+00> : vector<1xf32>
    %91 = vector.multi_reduction <add>, %90, %cst_37 [0] : vector<32x1xf32> to vector<1xf32>
    %92 = vector.shape_cast %91 : vector<1xf32> to vector<1x1xf32>
    %cst_38 = arith.constant 1.22070313E-4 : f32
    %93 = vector.broadcast %cst_38 : f32 to vector<1x1xf32>
    %94 = arith.mulf %92, %93 : vector<1x1xf32>
    %95 = arith.mulf %87, %87 : vector<1x1xf32>
    %96 = arith.subf %94, %95 : vector<1x1xf32>
    %97 = vector.broadcast %87 : vector<1x1xf32> to vector<32x256xf32>
    %98 = arith.subf %81, %97 : vector<32x256xf32>
    %cst_39 = arith.constant 9.99999974E-6 : f32
    %99 = vector.broadcast %cst_39 : f32 to vector<1x1xf32>
    %100 = arith.addf %96, %99 : vector<1x1xf32>
    %101 = math.rsqrt %100 : vector<1x1xf32>
    %102 = vector.broadcast %101 : vector<1x1xf32> to vector<32x256xf32>
    %103 = arith.mulf %98, %102 : vector<32x256xf32>
    %104 = tpu.concatenate %80, %103 in 1 : vector<32x256xf32>, vector<32x256xf32> -> vector<32x512xf32>
    %105 = vector.broadcast %56 : vector<32x1xf32> to vector<32x512xf32>
    %106 = arith.mulf %104, %105 : vector<32x512xf32>
    %107 = vector.broadcast %57 : vector<32x1xf32> to vector<32x512xf32>
    %108 = arith.addf %106, %107 : vector<32x512xf32>
    %cst_40 = arith.constant 5.000000e-01 : f32
    %109 = vector.broadcast %cst_40 : f32 to vector<32x512xf32>
    %110 = arith.mulf %109, %108 : vector<32x512xf32>
    %cst_41 = arith.constant 4.471500e-02 : f32
    %111 = vector.broadcast %cst_41 : f32 to vector<32x512xf32>
    %112 = arith.mulf %111, %108 : vector<32x512xf32>
    %113 = arith.mulf %112, %108 : vector<32x512xf32>
    %114 = arith.mulf %113, %108 : vector<32x512xf32>
    %115 = arith.addf %108, %114 : vector<32x512xf32>
    %cst_42 = arith.constant 0.797884583 : f32
    %116 = vector.broadcast %cst_42 : f32 to vector<32x512xf32>
    %117 = arith.mulf %116, %115 : vector<32x512xf32>
    %118 = math.tanh %117 : vector<32x512xf32>
    %cst_43 = arith.constant 1.000000e+00 : f32
    %119 = vector.broadcast %cst_43 : f32 to vector<32x512xf32>
    %120 = arith.addf %119, %118 : vector<32x512xf32>
    %121 = arith.mulf %110, %120 : vector<32x512xf32>
    %c0_44 = arith.constant 0 : index
    %c0_45 = arith.constant 0 : index
    %122 = vector.load %arg7[%c0_44, %c0_45] : memref<32x288xbf16, #tpu.memory_space<vmem>>, vector<32x288xbf16>
    %c0_46 = arith.constant 0 : index
    %c0_47 = arith.constant 0 : index
    %123 = vector.load %arg8[%c0_46, %c0_47] : memref<32x1xf32, #tpu.memory_space<vmem>>, vector<32x1xf32>
    %c17_i32_48 = arith.constant 17 : i32
    %124 = tpu.dynamic_rotate %121 by %c17_i32_48 dim 1 : vector<32x512xf32>, i32 -> vector<32x512xf32>
    %125 = vector.broadcast %2 : vector<1x512xf32> to vector<32x512xf32>
    %126 = arith.mulf %124, %125 : vector<32x512xf32>
    %127 = arith.truncf %126 : vector<32x512xf32> to vector<32x512xbf16>
    %c16_i32_49 = arith.constant 16 : i32
    %128 = tpu.dynamic_rotate %121 by %c16_i32_49 dim 1 : vector<32x512xf32>, i32 -> vector<32x512xf32>
    %129 = vector.broadcast %4 : vector<1x512xf32> to vector<32x512xf32>
    %130 = arith.mulf %128, %129 : vector<32x512xf32>
    %131 = arith.truncf %130 : vector<32x512xf32> to vector<32x512xbf16>
    %c15_i32_50 = arith.constant 15 : i32
    %132 = tpu.dynamic_rotate %121 by %c15_i32_50 dim 1 : vector<32x512xf32>, i32 -> vector<32x512xf32>
    %133 = vector.broadcast %6 : vector<1x512xf32> to vector<32x512xf32>
    %134 = arith.mulf %132, %133 : vector<32x512xf32>
    %135 = arith.truncf %134 : vector<32x512xf32> to vector<32x512xbf16>
    %c1_i32_51 = arith.constant 1 : i32
    %136 = tpu.dynamic_rotate %121 by %c1_i32_51 dim 1 : vector<32x512xf32>, i32 -> vector<32x512xf32>
    %137 = vector.broadcast %8 : vector<1x512xf32> to vector<32x512xf32>
    %138 = arith.mulf %136, %137 : vector<32x512xf32>
    %139 = arith.truncf %138 : vector<32x512xf32> to vector<32x512xbf16>
    %140 = arith.truncf %121 : vector<32x512xf32> to vector<32x512xbf16>
    %c511_i32_52 = arith.constant 511 : i32
    %141 = tpu.dynamic_rotate %121 by %c511_i32_52 dim 1 : vector<32x512xf32>, i32 -> vector<32x512xf32>
    %142 = vector.broadcast %10 : vector<1x512xf32> to vector<32x512xf32>
    %143 = arith.mulf %141, %142 : vector<32x512xf32>
    %144 = arith.truncf %143 : vector<32x512xf32> to vector<32x512xbf16>
    %c497_i32_53 = arith.constant 497 : i32
    %145 = tpu.dynamic_rotate %121 by %c497_i32_53 dim 1 : vector<32x512xf32>, i32 -> vector<32x512xf32>
    %146 = vector.broadcast %12 : vector<1x512xf32> to vector<32x512xf32>
    %147 = arith.mulf %145, %146 : vector<32x512xf32>
    %148 = arith.truncf %147 : vector<32x512xf32> to vector<32x512xbf16>
    %c496_i32_54 = arith.constant 496 : i32
    %149 = tpu.dynamic_rotate %121 by %c496_i32_54 dim 1 : vector<32x512xf32>, i32 -> vector<32x512xf32>
    %150 = vector.broadcast %14 : vector<1x512xf32> to vector<32x512xf32>
    %151 = arith.mulf %149, %150 : vector<32x512xf32>
    %152 = arith.truncf %151 : vector<32x512xf32> to vector<32x512xbf16>
    %c495_i32_55 = arith.constant 495 : i32
    %153 = tpu.dynamic_rotate %121 by %c495_i32_55 dim 1 : vector<32x512xf32>, i32 -> vector<32x512xf32>
    %154 = vector.broadcast %16 : vector<1x512xf32> to vector<32x512xf32>
    %155 = arith.mulf %153, %154 : vector<32x512xf32>
    %156 = arith.truncf %155 : vector<32x512xf32> to vector<32x512xbf16>
    %157 = tpu.concatenate %127, %131, %135, %139, %140, %144, %148, %152, %156 in 0 : vector<32x512xbf16>, vector<32x512xbf16>, vector<32x512xbf16>, vector<32x512xbf16>, vector<32x512xbf16>, vector<32x512xbf16>, vector<32x512xbf16>, vector<32x512xbf16>, vector<32x512xbf16> -> vector<288x512xbf16>
    %cst_56 = arith.constant dense<0.000000e+00> : vector<32x512xf32>
    %158 = tpu.matmul %122, %157, %cst_56 {dimension_numbers = #tpu.dot_dimension_numbers<[1], [0], [0], [1], [0, 0, 1, 1], [], []>} : vector<32x288xbf16>, vector<288x512xbf16>, vector<32x512xf32> -> vector<32x512xf32>
    %159 = vector.broadcast %123 : vector<32x1xf32> to vector<32x512xf32>
    %160 = arith.addf %158, %159 : vector<32x512xf32>
    %c0_57 = arith.constant 0 : index
    %c0_58 = arith.constant 0 : index
    %161 = vector.load %arg9[%c0_57, %c0_58] : memref<32x1xf32, #tpu.memory_space<vmem>>, vector<32x1xf32>
    %c0_59 = arith.constant 0 : index
    %c0_60 = arith.constant 0 : index
    %162 = vector.load %arg10[%c0_59, %c0_60] : memref<32x1xf32, #tpu.memory_space<vmem>>, vector<32x1xf32>
    %163 = vector.extract_strided_slice %160 {offsets = [0, 0], sizes = [32, 256], strides = [1, 1]} : vector<32x512xf32> to vector<32x256xf32>
    %cst_61 = arith.constant dense<0.000000e+00> : vector<32xf32>
    %164 = vector.multi_reduction <add>, %163, %cst_61 [1] : vector<32x256xf32> to vector<32xf32>
    %165 = vector.shape_cast %164 : vector<32xf32> to vector<32x1xf32>
    %cst_62 = arith.constant dense<0.000000e+00> : vector<1xf32>
    %166 = vector.multi_reduction <add>, %165, %cst_62 [0] : vector<32x1xf32> to vector<1xf32>
    %167 = vector.shape_cast %166 : vector<1xf32> to vector<1x1xf32>
    %cst_63 = arith.constant 1.22070313E-4 : f32
    %168 = vector.broadcast %cst_63 : f32 to vector<1x1xf32>
    %169 = arith.mulf %167, %168 : vector<1x1xf32>
    %170 = arith.mulf %163, %163 : vector<32x256xf32>
    %cst_64 = arith.constant dense<0.000000e+00> : vector<32xf32>
    %171 = vector.multi_reduction <add>, %170, %cst_64 [1] : vector<32x256xf32> to vector<32xf32>
    %172 = vector.shape_cast %171 : vector<32xf32> to vector<32x1xf32>
    %cst_65 = arith.constant dense<0.000000e+00> : vector<1xf32>
    %173 = vector.multi_reduction <add>, %172, %cst_65 [0] : vector<32x1xf32> to vector<1xf32>
    %174 = vector.shape_cast %173 : vector<1xf32> to vector<1x1xf32>
    %cst_66 = arith.constant 1.22070313E-4 : f32
    %175 = vector.broadcast %cst_66 : f32 to vector<1x1xf32>
    %176 = arith.mulf %174, %175 : vector<1x1xf32>
    %177 = arith.mulf %169, %169 : vector<1x1xf32>
    %178 = arith.subf %176, %177 : vector<1x1xf32>
    %179 = vector.broadcast %169 : vector<1x1xf32> to vector<32x256xf32>
    %180 = arith.subf %163, %179 : vector<32x256xf32>
    %cst_67 = arith.constant 9.99999974E-6 : f32
    %181 = vector.broadcast %cst_67 : f32 to vector<1x1xf32>
    %182 = arith.addf %178, %181 : vector<1x1xf32>
    %183 = math.rsqrt %182 : vector<1x1xf32>
    %184 = vector.broadcast %183 : vector<1x1xf32> to vector<32x256xf32>
    %185 = arith.mulf %180, %184 : vector<32x256xf32>
    %186 = vector.extract_strided_slice %160 {offsets = [0, 256], sizes = [32, 256], strides = [1, 1]} : vector<32x512xf32> to vector<32x256xf32>
    %cst_68 = arith.constant dense<0.000000e+00> : vector<32xf32>
    %187 = vector.multi_reduction <add>, %186, %cst_68 [1] : vector<32x256xf32> to vector<32xf32>
    %188 = vector.shape_cast %187 : vector<32xf32> to vector<32x1xf32>
    %cst_69 = arith.constant dense<0.000000e+00> : vector<1xf32>
    %189 = vector.multi_reduction <add>, %188, %cst_69 [0] : vector<32x1xf32> to vector<1xf32>
    %190 = vector.shape_cast %189 : vector<1xf32> to vector<1x1xf32>
    %cst_70 = arith.constant 1.22070313E-4 : f32
    %191 = vector.broadcast %cst_70 : f32 to vector<1x1xf32>
    %192 = arith.mulf %190, %191 : vector<1x1xf32>
    %193 = arith.mulf %186, %186 : vector<32x256xf32>
    %cst_71 = arith.constant dense<0.000000e+00> : vector<32xf32>
    %194 = vector.multi_reduction <add>, %193, %cst_71 [1] : vector<32x256xf32> to vector<32xf32>
    %195 = vector.shape_cast %194 : vector<32xf32> to vector<32x1xf32>
    %cst_72 = arith.constant dense<0.000000e+00> : vector<1xf32>
    %196 = vector.multi_reduction <add>, %195, %cst_72 [0] : vector<32x1xf32> to vector<1xf32>
    %197 = vector.shape_cast %196 : vector<1xf32> to vector<1x1xf32>
    %cst_73 = arith.constant 1.22070313E-4 : f32
    %198 = vector.broadcast %cst_73 : f32 to vector<1x1xf32>
    %199 = arith.mulf %197, %198 : vector<1x1xf32>
    %200 = arith.mulf %192, %192 : vector<1x1xf32>
    %201 = arith.subf %199, %200 : vector<1x1xf32>
    %202 = vector.broadcast %192 : vector<1x1xf32> to vector<32x256xf32>
    %203 = arith.subf %186, %202 : vector<32x256xf32>
    %cst_74 = arith.constant 9.99999974E-6 : f32
    %204 = vector.broadcast %cst_74 : f32 to vector<1x1xf32>
    %205 = arith.addf %201, %204 : vector<1x1xf32>
    %206 = math.rsqrt %205 : vector<1x1xf32>
    %207 = vector.broadcast %206 : vector<1x1xf32> to vector<32x256xf32>
    %208 = arith.mulf %203, %207 : vector<32x256xf32>
    %209 = tpu.concatenate %185, %208 in 1 : vector<32x256xf32>, vector<32x256xf32> -> vector<32x512xf32>
    %210 = vector.broadcast %161 : vector<32x1xf32> to vector<32x512xf32>
    %211 = arith.mulf %209, %210 : vector<32x512xf32>
    %212 = vector.broadcast %162 : vector<32x1xf32> to vector<32x512xf32>
    %213 = arith.addf %211, %212 : vector<32x512xf32>
    %214 = arith.addf %213, %0 : vector<32x512xf32>
    %cst_75 = arith.constant 5.000000e-01 : f32
    %215 = vector.broadcast %cst_75 : f32 to vector<32x512xf32>
    %216 = arith.mulf %215, %214 : vector<32x512xf32>
    %cst_76 = arith.constant 4.471500e-02 : f32
    %217 = vector.broadcast %cst_76 : f32 to vector<32x512xf32>
    %218 = arith.mulf %217, %214 : vector<32x512xf32>
    %219 = arith.mulf %218, %214 : vector<32x512xf32>
    %220 = arith.mulf %219, %214 : vector<32x512xf32>
    %221 = arith.addf %214, %220 : vector<32x512xf32>
    %cst_77 = arith.constant 0.797884583 : f32
    %222 = vector.broadcast %cst_77 : f32 to vector<32x512xf32>
    %223 = arith.mulf %222, %221 : vector<32x512xf32>
    %224 = math.tanh %223 : vector<32x512xf32>
    %cst_78 = arith.constant 1.000000e+00 : f32
    %225 = vector.broadcast %cst_78 : f32 to vector<32x512xf32>
    %226 = arith.addf %225, %224 : vector<32x512xf32>
    %227 = arith.mulf %216, %226 : vector<32x512xf32>
    %c0_79 = arith.constant 0 : index
    %c0_80 = arith.constant 0 : index
    %228 = vector.load %arg11[%c0_79, %c0_80] : memref<32x512xf32, #tpu.memory_space<vmem>>, vector<32x512xf32>
    tpu.vector_store %arg11[%c0_79, %c0_80], %227 {strides = array<i32>} : memref<32x512xf32, #tpu.memory_space<vmem>>, vector<32x512xf32>,
    return
  }
  func.func @transform_0(%arg0: i32) -> (i32, i32, i32) {
    %c0_i32 = arith.constant 0 : i32
    %c0_i32_0 = arith.constant 0 : i32
    %c0_i32_1 = arith.constant 0 : i32
    %c0_i32_2 = arith.constant 0 : i32
    return %c0_i32, %c0_i32_0, %c0_i32_1 : i32, i32, i32
  }
  func.func @transform_1(%arg0: i32) -> (i32, i32) {
    %c0_i32 = arith.constant 0 : i32
    %c0_i32_0 = arith.constant 0 : i32
    %c0_i32_1 = arith.constant 0 : i32
    return %c0_i32, %c0_i32_0 : i32, i32
  }
  func.func @transform_2(%arg0: i32) -> (i32, i32) {
    %c0_i32 = arith.constant 0 : i32
    %c0_i32_0 = arith.constant 0 : i32
    %c0_i32_1 = arith.constant 0 : i32
    return %c0_i32, %c0_i32_0 : i32, i32
  }
  func.func @transform_3(%arg0: i32) -> (i32, i32) {
    %c0_i32 = arith.constant 0 : i32
    %c0_i32_0 = arith.constant 0 : i32
    %c0_i32_1 = arith.constant 0 : i32
    return %c0_i32, %c0_i32_0 : i32, i32
  }
  func.func @transform_4(%arg0: i32) -> (i32, i32) {
    %c0_i32 = arith.constant 0 : i32
    %c0_i32_0 = arith.constant 0 : i32
    %c0_i32_1 = arith.constant 0 : i32
    return %c0_i32, %c0_i32_0 : i32, i32
  }
  func.func @transform_5(%arg0: i32) -> (i32, i32) {
    %c0_i32 = arith.constant 0 : i32
    %c0_i32_0 = arith.constant 0 : i32
    %c0_i32_1 = arith.constant 0 : i32
    return %c0_i32, %c0_i32_0 : i32, i32
  }
  func.func @transform_6(%arg0: i32) -> (i32, i32) {
    %c0_i32 = arith.constant 0 : i32
    %c0_i32_0 = arith.constant 0 : i32
    %c0_i32_1 = arith.constant 0 : i32
    return %c0_i32, %c0_i32_0 : i32, i32
  }
  func.func @transform_7(%arg0: i32) -> (i32, i32) {
    %c0_i32 = arith.constant 0 : i32
    %c0_i32_0 = arith.constant 0 : i32
    %c0_i32_1 = arith.constant 0 : i32
    return %c0_i32, %c0_i32_0 : i32, i32
  }
  func.func @transform_8(%arg0: i32) -> (i32, i32) {
    %c0_i32 = arith.constant 0 : i32
    %c0_i32_0 = arith.constant 0 : i32
    %c0_i32_1 = arith.constant 0 : i32
    return %c0_i32, %c0_i32_0 : i32, i32
  }
  func.func @transform_9(%arg0: i32) -> (i32, i32) {
    %c0_i32 = arith.constant 0 : i32
    %c0_i32_0 = arith.constant 0 : i32
    %c0_i32_1 = arith.constant 0 : i32
    return %c0_i32, %c0_i32_0 : i32, i32
  }
  func.func @transform_10(%arg0: i32) -> (i32, i32) {
    %c0_i32 = arith.constant 0 : i32
    %c0_i32_0 = arith.constant 0 : i32
    %c0_i32_1 = arith.constant 0 : i32
    return %c0_i32, %c0_i32_0 : i32, i32
  }
}

</mosaic_0001>

<bundles_post_ra>
// kernel: tpu_custom_call.1
= control target key start
LH: loop header
LB: loop body
LE: loop exit
PB: predicated region body
PF: predicated region fallthrough
CT: control target
= control target key end

     0   :  { %15 = vsyncpa [#allocation3], 0  ;;  %s5464_s0 = inlined_call_operand.hbm [shape: f32[9,1,512], index: 0, kind: input, shape index: {}]   ;;  %s5465_s1 = inlined_call_operand.vmem [shape: f32[32,512], index: 1, kind: input, shape index: {}]   ;;  %s5466_s2 = inlined_call_operand.vmem [shape: bf16[32,288], index: 2, kind: input, shape index: {}]   ;;  %s5467_s3 = inlined_call_operand.vmem [shape: f32[32,1], index: 3, kind: input, shape index: {}]   ;;  %s5468_s4 = inlined_call_operand.vmem [shape: f32[32,1], index: 4, kind: input, shape index: {}]   ;;  %s5469_s5 = inlined_call_operand.vmem [shape: f32[32,1], index: 5, kind: input, shape index: {}]   ;;  %s5470_s6 = inlined_call_operand.hbm [shape: bf16[32,288], index: 6, kind: input, shape index: {}]   ;;  %s5471_s7 = inlined_call_operand.vmem [shape: f32[32,1], index: 7, kind: input, shape index: {}]   ;;  %s5472_s8 = inlined_call_operand.vmem [shape: f32[32,1], index: 8, kind: input, shape index: {}]   ;;  %s5473_s9 = inlined_call_operand.vmem [shape: f32[32,1], index: 9, kind: input, shape index: {}]   ;;  %s5474_s10 = inlined_call_operand.hbm [shape: f32[32,512], index: 10, kind: output, shape index: {}]  }
   0x1   :  { %16 = vsyncpa [#allocation6], 0 }
   0x2   :  { %17 = vsyncpa [#allocation4], 0  ;;  %s3069_s13 = smov [#allocation2]   ;;  %s2997_s17 = scalar_lea.hbm %s5464_s0, 576 }
   0x3   :  { %s23_s14 = sshll.u32 %s3069_s13, 4  ;;  %p2998_p0 = scmp.ne.s32.totalorder %s5464_s0, %s2997_s17  ;;  %s24_s14 = int_to_ptr.vmem [resolvable:$true] %s23_s14 }
   0x4   :  { %p3001_p1 = scmp.lt.u32.totalorder %s2997_s17, %s5464_s0 }
   0x6   :  { %p3003_p2 = pnand %p3001_p1, %p2998_p0 }
   0x8   :  { %3006 = shalt.err (!%p3003_p2)
}
   0x9   :  { %s3007_s22 = scalar_lea.vmem %s24_s14, 576  ;;  %p3012_p4 = scmp.lt.s32.totalorder %s24_s14, %s24_s14 }
   0xa   :  { %p3008_p3 = scmp.ne.s32.totalorder %s24_s14, %s3007_s22  ;;  %p3013_p5 = scmp.lt.s32.totalorder %s3007_s22, %s3007_s22 }
   0xc   :  { %p3014_p6 = por %p3013_p5, %p3012_p4 }
   0xe   :  { %p3015_p7 = pnand %p3014_p6, %p3008_p3 }
  0x10   :  { %3018 = shalt.err (!%p3015_p7)
}
  0x11   :  { %s3070_s23 = smov 64   ;;  %s3071_s24 = smov 4  }
  0x12   :  { %29 = dma.hbm_to_vmem [thread:$0]  %s5464_s0, 576, %s24_s14, [#allocation3], %s3070_s23, %s3070_s23, %s3071_s24  }
  0x13   :  { %s3072_s27 = smov [#allocation5]   ;;  %s3019_s11 = scalar_lea.hbm %s5470_s6, 768 }
  0x14   :  { %s45_s28 = sshll.u32 %s3072_s27, 4  ;;  %p3020_p8 = scmp.ne.s32.totalorder %s5470_s6, %s3019_s11  ;;  %s46_s28 = int_to_ptr.vmem [resolvable:$true] %s45_s28 }
  0x15   :  { %p3023_p9 = scmp.lt.u32.totalorder %s3019_s11, %s5470_s6 }
  0x17   :  { %p3025_p10 = pnand %p3023_p9, %p3020_p8 }
  0x19   :  { %3028 = shalt.err (!%p3025_p10)
}
  0x1a   :  { %s3029_s17 = scalar_lea.vmem %s46_s28, 768  ;;  %p3034_p12 = scmp.lt.s32.totalorder %s46_s28, %s46_s28 }
  0x1b   :  { %p3030_p11 = scmp.ne.s32.totalorder %s46_s28, %s3029_s17  ;;  %p3035_p13 = scmp.lt.s32.totalorder %s3029_s17, %s3029_s17 }
  0x1d   :  { %p3036_p0 = por %p3035_p13, %p3034_p12 }
  0x1f   :  { %p3037_p1 = pnand %p3036_p0, %p3030_p11 }
  0x21   :  { %3040 = shalt.err (!%p3037_p1)
}
  0x22   :  { %s3073_s0 = smov 192   ;;  %s3074_s14 = smov 12  }
  0x23   :  { %51 = dma.hbm_to_vmem [thread:$0]  %s5470_s6, 768, %s46_s28, [#allocation6], %s3073_s0, %s3073_s0, %s3074_s14  }
  0x24   :  { %3063 = dma.done.wait [#allocation3], 576  }
  0x25   :  { %3064 = vsyncadd [#allocation3], 4294966720 }
  0x26   :  { %3065 = dma.done.wait [#allocation6], 768  }
  0x27   :  { %3066 = vsyncadd [#allocation6], 4294966528  ;;  %v3169_v0 = vld [vmem:[%s5465_s1 + $0x8] sm:$0xff]  ;;  %v3174_v1 = vld [vmem:[%s5465_s1] sm:$0xff]  ;;  %s3075_s24 = smov 17   ;;  %s3076_s11 = smov 16   ;;  %v140_v16 = vlaneseq }
  0x28   :  { %116 = vrot.lane.b32.xlu1 %v3169_v0, %s3075_s24  ;;  %108 = vrot.lane.b32.xlu0 %v3174_v1, %s3075_s24  ;;  %v3183_v2 = vld [vmem:[%s5465_s1 + $0x28] sm:$0xff]  ;;  %v3188_v3 = vld [vmem:[%s5465_s1 + $0x20] sm:$0xff]  ;;  %s3077_s12 = smov 15   ;;  %s3078_s13 = smov 1   ;;  %vm920_vm8 = vcmask 261120  }
  0x29   :  { %v3197_v4 = vld [vmem:[%s5465_s1 + $0x30] sm:$0xff]  ;;  %v3207_v6 = vld [vmem:[%s5465_s1 + $0x38] sm:$0xff]  ;;  %v3225_v8 = vld [vmem:[%s5465_s1 + $0x60] sm:$0xff]  ;;  %v161_v17 = vshrl.u32 %v140_v16, 7  ;;  %v3358_v18 = vand.u32 127, %v140_v16  ;;  %s3079_s15 = smov 127  }
  0x2a   :  { %v3202_v5 = vld [vmem:[%s5465_s1 + $0x10] sm:$0xff]  ;;  %v3212_v7 = vld [vmem:[%s5465_s1 + $0x18] sm:$0xff]  ;;  %v3230_v9 = vld [vmem:[%s5465_s1 + $0x40] sm:$0xff]  ;;  %s3080_s16 = smov 113   ;;  %s3081_s17 = smov 112  }
  0x2b   :  { %v3239_v10 = vld [vmem:[%s5465_s1 + $0x68] sm:$0xff]  ;;  %v3253_v12 = vld [vmem:[%s5465_s1 + $0x70] sm:$0xff]  ;;  %v3267_v14 = vld [vmem:[%s5465_s1 + $0x78] sm:$0xff]  ;;  %v3364_v19 = vsub.s32 1, %v161_v17  ;;  %vm142_vm0 = vcmp.lt.s32.totalorder %v3358_v18, 17  ;;  %v3376_v27 = vsub.s32 2, %v161_v17 }
  0x2c   :  { %118 = vrot.lane.b32.xlu1 %v3183_v2, %s3075_s24  ;;  %110 = vrot.lane.b32.xlu0 %v3188_v3, %s3075_s24  ;;  %v3244_v11 = vld [vmem:[%s5465_s1 + $0x48] sm:$0xff]  ;;  %v3258_v13 = vld [vmem:[%s5465_s1 + $0x50] sm:$0xff]  ;;  %v81_v20 = vld [vmem:[#allocation2] sm:$0xf]  ;;  %v3386_v31 = vsub.s32 0, %v161_v17  ;;  %v3388_v32 = vsub.s32 3, %v161_v17 }
  0x2d   :  { %v3272_v15 = vld [vmem:[%s5465_s1 + $0x58] sm:$0xff]  ;;  %v3372_v23 = vrot.slane %v81_v20, %v3364_v19  ;;  %v3391_v36 = vrot.slane %v81_v20, %v3376_v27  ;;  %vm236_vm1 = vcmp.lt.s32.totalorder %v3358_v18, 16  ;;  %vm330_vm2 = vcmp.lt.s32.totalorder %v3358_v18, 15  ;;  %s3082_s18 = smov 111  }
  0x2e   :  { %v3402_v39 = vrot.slane %v81_v20, %v3386_v31  ;;  %v3405_v40 = vrot.slane %v81_v20, %v3388_v32  ;;  %vm424_vm3 = vcmp.lt.s32.totalorder %v3358_v18, 1  ;;  %vm526_vm4 = vcmp.lt.s32.totalorder %v3358_v18, 127 }
  0x2f   :  { %vm620_vm5 = vcmp.lt.s32.totalorder %v3358_v18, 113  ;;  %vm714_vm6 = vcmp.lt.s32.totalorder %v3358_v18, 112  ;;  %vm808_vm7 = vcmp.lt.s32.totalorder %v3358_v18, 111 }
  0x30   :  { %126 = vrot.lane.b32.xlu1 %v3197_v4, %s3075_s24  ;;  %124 = vrot.lane.b32.xlu0 %v3202_v5, %s3075_s24 }
  0x34   :  { %134 = vrot.lane.b32.xlu1 %v3207_v6, %s3075_s24  ;;  %132 = vrot.lane.b32.xlu0 %v3212_v7, %s3075_s24 }
  0x38   :  { %114 = vrot.lane.b32.xlu1 %v3225_v8, %s3075_s24  ;;  %112 = vrot.lane.b32.xlu0 %v3230_v9, %s3075_s24 }
  0x3c   :  { %122 = vrot.lane.b32.xlu1 %v3239_v10, %s3075_s24  ;;  %120 = vrot.lane.b32.xlu0 %v3244_v11, %s3075_s24 }
  0x40   :  { %130 = vrot.lane.b32.xlu1 %v3253_v12, %s3075_s24  ;;  %128 = vrot.lane.b32.xlu0 %v3258_v13, %s3075_s24 }
  0x44   :  { %138 = vrot.lane.b32.xlu1 %v3267_v14, %s3075_s24  ;;  %136 = vrot.lane.b32.xlu0 %v3272_v15, %s3075_s24 }
  0x48   :  { %206 = vrot.lane.b32.xlu1 %v3188_v3, %s3076_s11  ;;  %204 = vrot.lane.b32.xlu0 %v3174_v1, %s3076_s11 }
  0x4c   :  { %214 = vrot.lane.b32.xlu1 %v3183_v2, %s3076_s11  ;;  %212 = vrot.lane.b32.xlu0 %v3169_v0, %s3076_s11 }
  0x50   :  { %222 = vrot.lane.b32.xlu1 %v3197_v4, %s3076_s11  ;;  %220 = vrot.lane.b32.xlu0 %v3202_v5, %s3076_s11 }
  0x54   :  { %230 = vrot.lane.b32.xlu1 %v3207_v6, %s3076_s11  ;;  %228 = vrot.lane.b32.xlu0 %v3212_v7, %s3076_s11 }
  0x58   :  { %210 = vrot.lane.b32.xlu1 %v3225_v8, %s3076_s11  ;;  %208 = vrot.lane.b32.xlu0 %v3230_v9, %s3076_s11 }
  0x5c   :  { %218 = vrot.lane.b32.xlu1 %v3239_v10, %s3076_s11  ;;  %216 = vrot.lane.b32.xlu0 %v3244_v11, %s3076_s11 }
  0x60   :  { %226 = vrot.lane.b32.xlu1 %v3253_v12, %s3076_s11  ;;  %224 = vrot.lane.b32.xlu0 %v3258_v13, %s3076_s11 }
  0x64   :  { %234 = vrot.lane.b32.xlu1 %v3267_v14, %s3076_s11  ;;  %232 = vrot.lane.b32.xlu0 %v3272_v15, %s3076_s11 }
  0x68   :  { %300 = vrot.lane.b32.xlu1 %v3188_v3, %s3077_s12  ;;  %298 = vrot.lane.b32.xlu0 %v3174_v1, %s3077_s12 }
  0x6c   :  { %308 = vrot.lane.b32.xlu1 %v3183_v2, %s3077_s12  ;;  %306 = vrot.lane.b32.xlu0 %v3169_v0, %s3077_s12 }
  0x70   :  { %316 = vrot.lane.b32.xlu1 %v3197_v4, %s3077_s12  ;;  %314 = vrot.lane.b32.xlu0 %v3202_v5, %s3077_s12 }
  0x74   :  { %324 = vrot.lane.b32.xlu1 %v3207_v6, %s3077_s12  ;;  %322 = vrot.lane.b32.xlu0 %v3212_v7, %s3077_s12 }
  0x78   :  { %304 = vrot.lane.b32.xlu1 %v3225_v8, %s3077_s12  ;;  %302 = vrot.lane.b32.xlu0 %v3230_v9, %s3077_s12 }
  0x7c   :  { %312 = vrot.lane.b32.xlu1 %v3239_v10, %s3077_s12  ;;  %310 = vrot.lane.b32.xlu0 %v3244_v11, %s3077_s12 }
  0x80   :  { %320 = vrot.lane.b32.xlu1 %v3253_v12, %s3077_s12  ;;  %318 = vrot.lane.b32.xlu0 %v3258_v13, %s3077_s12 }
  0x84   :  { %328 = vrot.lane.b32.xlu1 %v3267_v14, %s3077_s12  ;;  %326 = vrot.lane.b32.xlu0 %v3272_v15, %s3077_s12 }
  0x88   :  { %394 = vrot.lane.b32.xlu1 %v3188_v3, %s3078_s13  ;;  %392 = vrot.lane.b32.xlu0 %v3174_v1, %s3078_s13 }
  0x8c   :  { %402 = vrot.lane.b32.xlu1 %v3183_v2, %s3078_s13  ;;  %400 = vrot.lane.b32.xlu0 %v3169_v0, %s3078_s13 }
  0x90   :  { %410 = vrot.lane.b32.xlu1 %v3197_v4, %s3078_s13  ;;  %408 = vrot.lane.b32.xlu0 %v3202_v5, %s3078_s13 }
  0x94   :  { %418 = vrot.lane.b32.xlu1 %v3207_v6, %s3078_s13  ;;  %416 = vrot.lane.b32.xlu0 %v3212_v7, %s3078_s13 }
  0x98   :  { %398 = vrot.lane.b32.xlu1 %v3225_v8, %s3078_s13  ;;  %396 = vrot.lane.b32.xlu0 %v3230_v9, %s3078_s13 }
  0x9a   :  { %v117_v21 = vpop.permute.xlu1 %116  ;;  %v109_v22 = vpop.permute.xlu0 %108 }
  0x9b   :  { %v151_v24 = vsel %vm142_vm0, %v109_v22, %v117_v21 }
  0x9c   :  { %406 = vrot.lane.b32.xlu1 %v3239_v10, %s3078_s13  ;;  %404 = vrot.lane.b32.xlu0 %v3244_v11, %s3078_s13  ;;  %v181_v29 = vmul.f32 %v3372_v23, %v151_v24 }
  0x9e   :  { %v119_v25 = vpop.permute.xlu1 %118  ;;  %v111_v26 = vpop.permute.xlu0 %110 }
  0x9f   :  { %v152_v28 = vsel %vm142_vm0, %v111_v26, %v119_v25 }
  0xa0   :  { %414 = vrot.lane.b32.xlu1 %v3253_v12, %s3078_s13  ;;  %412 = vrot.lane.b32.xlu0 %v3258_v13, %s3078_s13  ;;  %v185_v30 = vmul.f32 %v3372_v23, %v152_v28 }
  0xa2   :  { %v127_v33 = vpop.permute.xlu1 %126  ;;  %v125_v34 = vpop.permute.xlu0 %124  ;;  %v197_v35 = vpack.c.bf16 %v185_v30, %v181_v29 }
  0xa3   :  { %v148_v37 = vsel %vm142_vm0, %v119_v25, %v127_v33  ;;  %v147_v38 = vsel %vm142_vm0, %v117_v21, %v125_v34 }
  0xa4   :  { %422 = vrot.lane.b32.xlu1 %v3267_v14, %s3078_s13  ;;  %420 = vrot.lane.b32.xlu0 %v3272_v15, %s3078_s13  ;;  %v182_v43 = vmul.f32 %v3391_v36, %v147_v38  ;;  %v186_v44 = vmul.f32 %v3391_v36, %v148_v37 }
  0xa5   :  { %927 = vmatprep.subr.bf16.mxu0 %v197_v35 }
  0xa6   :  { %v135_v41 = vpop.permute.xlu1 %134  ;;  %v133_v42 = vpop.permute.xlu0 %132  ;;  %v198_v57 = vpack.c.bf16 %v186_v44, %v182_v43 }
  0xa7   :  { %v156_v45 = vsel %vm142_vm0, %v135_v41, %v111_v26  ;;  %v155_v46 = vsel %vm142_vm0, %v133_v42, %v109_v22  ;;  %v143_v47 = vsel %vm142_vm0, %v125_v34, %v133_v42  ;;  %v144_v48 = vsel %vm142_vm0, %v127_v33, %v135_v41  ;;  %v83_v42 = vld [vmem:[#allocation2 + $0x4] sm:$0xf] }
  0xa8   :  { %496 = vrot.lane.b32.xlu1 %v3188_v3, %s3079_s15  ;;  %494 = vrot.lane.b32.xlu0 %v3174_v1, %s3079_s15  ;;  %v180_v49 = vmul.f32 %v3402_v39, %v155_v46  ;;  %v184_v50 = vmul.f32 %v3402_v39, %v156_v45  ;;  %v183_v51 = vmul.f32 %v3405_v40, %v143_v47 }
  0xa9   :  { %v187_v52 = vmul.f32 %v3405_v40, %v144_v48  ;;  %v3469_v48 = vrot.slane %v83_v42, %v3364_v19 }
  0xaa   :  { %v115_v53 = vpop.permute.xlu1 %114  ;;  %v113_v54 = vpop.permute.xlu0 %112  ;;  %v196_v55 = vpack.c.bf16 %v184_v50, %v180_v49 }
  0xab   :  { %v199_v56 = vpack.c.bf16 %v187_v52, %v183_v51 }
  0xac   :  { %504 = vrot.lane.b32.xlu1 %v3183_v2, %s3079_s15  ;;  %502 = vrot.lane.b32.xlu0 %v3169_v0, %s3079_s15 }
  0xad   :  { %928 = vmatpush1.bf16.msra.mxu0 %v196_v55  ;;  %1033 = vmatprep.subr.bf16.mxu1 %v199_v56  ;;  %v3484_v55 = vrot.slane %v83_v42, %v3376_v27 }
  0xae   :  { %1034 = vmatpush1.bf16.msra.mxu1 %v198_v57  ;;  %v123_v58 = vpop.permute.xlu1 %122  ;;  %v121_v59 = vpop.permute.xlu0 %120 }
  0xaf   :  { %v154_v60 = vsel %vm142_vm0, %v115_v53, %v123_v58  ;;  %v153_v61 = vsel %vm142_vm0, %v113_v54, %v121_v59 }
  0xb0   :  { %v193_v62 = vmul.f32 %v3372_v23, %v154_v60  ;;  %v189_v63 = vmul.f32 %v3372_v23, %v153_v61  ;;  %512 = vrot.lane.b32.xlu1 %v3197_v4, %s3079_s15  ;;  %510 = vrot.lane.b32.xlu0 %v3202_v5, %s3079_s15  ;;  %v3493_v61 = vrot.slane %v83_v42, %v3386_v31 }
  0xb2   :  { %v131_v16 = vpop.permute.xlu1 %130  ;;  %v129_v17 = vpop.permute.xlu0 %128  ;;  %v201_v20 = vpack.c.bf16 %v193_v62, %v189_v63  ;;  %v3496_v62 = vrot.slane %v83_v42, %v3388_v32 }
  0xb3   :  { %v150_v21 = vsel %vm142_vm0, %v123_v58, %v131_v16  ;;  %v149_v22 = vsel %vm142_vm0, %v121_v59, %v129_v17 }
  0xb4   :  { %520 = vrot.lane.b32.xlu1 %v3207_v6, %s3079_s15  ;;  %518 = vrot.lane.b32.xlu0 %v3212_v7, %s3079_s15  ;;  %v194_v24 = vmul.f32 %v3391_v36, %v150_v21  ;;  %v190_v25 = vmul.f32 %v3391_v36, %v149_v22 }
  0xb5   :  { %929 = vmatprep.subr.bf16.mxu0 %v201_v20 }
  0xb6   :  { %v139_v26 = vpop.permute.xlu1 %138  ;;  %v137_v28 = vpop.permute.xlu0 %136  ;;  %v202_v47 = vpack.c.bf16 %v194_v24, %v190_v25 }
  0xb7   :  { %v146_v29 = vsel %vm142_vm0, %v131_v16, %v139_v26  ;;  %v158_v30 = vsel %vm142_vm0, %v139_v26, %v115_v53  ;;  %v145_v33 = vsel %vm142_vm0, %v129_v17, %v137_v28  ;;  %v157_v34 = vsel %vm142_vm0, %v137_v28, %v113_v54 }
  0xb8   :  { %v192_v35 = vmul.f32 %v3402_v39, %v158_v30  ;;  %v195_v37 = vmul.f32 %v3405_v40, %v146_v29  ;;  %v188_v38 = vmul.f32 %v3402_v39, %v157_v34  ;;  %v191_v41 = vmul.f32 %v3405_v40, %v145_v33  ;;  %500 = vrot.lane.b32.xlu1 %v3225_v8, %s3079_s15 }
  0xb9   :  { %498 = vrot.lane.b32.xlu0 %v3230_v9, %s3079_s15 }
  0xba   :  { %v207_v43 = vpop.permute.xlu1 %206  ;;  %v205_v44 = vpop.permute.xlu0 %204  ;;  %v200_v45 = vpack.c.bf16 %v192_v35, %v188_v38  ;;  %v203_v46 = vpack.c.bf16 %v195_v37, %v191_v41 }
  0xbc   :  { %508 = vrot.lane.b32.xlu1 %v3239_v10, %s3079_s15  ;;  %930 = vmatpush1.bf16.msra.mxu0 %v200_v45 }
  0xbd   :  { %506 = vrot.lane.b32.xlu0 %v3244_v11, %s3079_s15  ;;  %1035 = vmatprep.subr.bf16.mxu1 %v203_v46 }
  0xbe   :  { %1036 = vmatpush1.bf16.msra.mxu1 %v202_v47  ;;  %v215_v49 = vpop.permute.xlu1 %214  ;;  %v213_v50 = vpop.permute.xlu0 %212 }
  0xbf   :  { %v246_v51 = vsel %vm236_vm1, %v207_v43, %v215_v49  ;;  %v245_v52 = vsel %vm236_vm1, %v205_v44, %v213_v50 }
  0xc0   :  { %v279_v53 = vmul.f32 %v3469_v48, %v246_v51  ;;  %v275_v54 = vmul.f32 %v3469_v48, %v245_v52  ;;  %516 = vrot.lane.b32.xlu1 %v3253_v12, %s3079_s15 }
  0xc1   :  { %514 = vrot.lane.b32.xlu0 %v3258_v13, %s3079_s15 }
  0xc2   :  { %v223_v56 = vpop.permute.xlu1 %222  ;;  %v221_v57 = vpop.permute.xlu0 %220  ;;  %v291_v58 = vpack.c.bf16 %v279_v53, %v275_v54 }
  0xc3   :  { %v242_v59 = vsel %vm236_vm1, %v215_v49, %v223_v56  ;;  %v241_v60 = vsel %vm236_vm1, %v213_v50, %v221_v57 }
  0xc4   :  { %524 = vrot.lane.b32.xlu1 %v3267_v14, %s3079_s15  ;;  %931 = vmatprep.subr.bf16.mxu0 %v291_v58  ;;  %v280_v63 = vmul.f32 %v3484_v55, %v242_v59  ;;  %v276_v16 = vmul.f32 %v3484_v55, %v241_v60 }
  0xc5   :  { %522 = vrot.lane.b32.xlu0 %v3272_v15, %s3079_s15 }
  0xc6   :  { %v231_v17 = vpop.permute.xlu1 %230  ;;  %v229_v20 = vpop.permute.xlu0 %228  ;;  %v292_v38 = vpack.c.bf16 %v280_v63, %v276_v16 }
  0xc7   :  { %v238_v21 = vsel %vm236_vm1, %v223_v56, %v231_v17  ;;  %v250_v22 = vsel %vm236_vm1, %v231_v17, %v207_v43  ;;  %v237_v24 = vsel %vm236_vm1, %v221_v57, %v229_v20  ;;  %v249_v25 = vsel %vm236_vm1, %v229_v20, %v205_v44 }
  0xc8   :  { %v278_v26 = vmul.f32 %v3493_v61, %v250_v22  ;;  %v281_v28 = vmul.f32 %v3496_v62, %v238_v21  ;;  %v274_v29 = vmul.f32 %v3493_v61, %v249_v25  ;;  %v277_v30 = vmul.f32 %v3496_v62, %v237_v24  ;;  %590 = vrot.lane.b32.xlu1 %v3188_v3, %s3080_s16  ;;  %v85_v22 = vld [vmem:[#allocation2 + $0x8] sm:$0xf] }
  0xc9   :  { %588 = vrot.lane.b32.xlu0 %v3174_v1, %s3080_s16 }
  0xca   :  { %v211_v33 = vpop.permute.xlu1 %210  ;;  %v209_v34 = vpop.permute.xlu0 %208  ;;  %v290_v35 = vpack.c.bf16 %v278_v26, %v274_v29  ;;  %v293_v37 = vpack.c.bf16 %v281_v28, %v277_v30  ;;  %v3562_v30 = vrot.slane %v85_v22, %v3364_v19 }
  0xcc   :  { %598 = vrot.lane.b32.xlu1 %v3183_v2, %s3080_s16  ;;  %932 = vmatpush1.bf16.msra.mxu0 %v290_v35 }
  0xcd   :  { %596 = vrot.lane.b32.xlu0 %v3169_v0, %s3080_s16  ;;  %1037 = vmatprep.subr.bf16.mxu1 %v293_v37 }
  0xce   :  { %1038 = vmatpush1.bf16.msra.mxu1 %v292_v38  ;;  %v219_v41 = vpop.permute.xlu1 %218  ;;  %v217_v42 = vpop.permute.xlu0 %216 }
  0xcf   :  { %v248_v43 = vsel %vm236_vm1, %v211_v33, %v219_v41  ;;  %v247_v44 = vsel %vm236_vm1, %v209_v34, %v217_v42 }
  0xd0   :  { %v287_v45 = vmul.f32 %v3469_v48, %v248_v43  ;;  %v283_v46 = vmul.f32 %v3469_v48, %v247_v44  ;;  %606 = vrot.lane.b32.xlu1 %v3197_v4, %s3080_s16 }
  0xd1   :  { %604 = vrot.lane.b32.xlu0 %v3202_v5, %s3080_s16 }
  0xd2   :  { %v227_v47 = vpop.permute.xlu1 %226  ;;  %v225_v49 = vpop.permute.xlu0 %224  ;;  %v295_v50 = vpack.c.bf16 %v287_v45, %v283_v46 }
  0xd3   :  { %v244_v51 = vsel %vm236_vm1, %v219_v41, %v227_v47  ;;  %v243_v52 = vsel %vm236_vm1, %v217_v42, %v225_v49  ;;  %v3577_v42 = vrot.slane %v85_v22, %v3376_v27 }
  0xd4   :  { %614 = vrot.lane.b32.xlu1 %v3207_v6, %s3080_s16  ;;  %933 = vmatprep.subr.bf16.mxu0 %v295_v50  ;;  %v288_v53 = vmul.f32 %v3484_v55, %v244_v51  ;;  %v284_v54 = vmul.f32 %v3484_v55, %v243_v52  ;;  %v3589_v50 = vrot.slane %v85_v22, %v3388_v32 }
  0xd5   :  { %612 = vrot.lane.b32.xlu0 %v3212_v7, %s3080_s16  ;;  %5523 = vst [vmem:[#allocation11_spill] sm:$0xff] %v3577_v42 }
  0xd6   :  { %v235_v56 = vpop.permute.xlu1 %234  ;;  %v233_v57 = vpop.permute.xlu0 %232  ;;  %v296_v29 = vpack.c.bf16 %v288_v53, %v284_v54  ;;  %5525 = vst [vmem:[#allocation13_spill] sm:$0xff] %v3589_v50 }
  0xd7   :  { %v240_v58 = vsel %vm236_vm1, %v227_v47, %v235_v56  ;;  %v252_v59 = vsel %vm236_vm1, %v235_v56, %v211_v33  ;;  %v239_v60 = vsel %vm236_vm1, %v225_v49, %v233_v57  ;;  %v251_v63 = vsel %vm236_vm1, %v233_v57, %v209_v34 }
  0xd8   :  { %v286_v16 = vmul.f32 %v3493_v61, %v252_v59  ;;  %v289_v17 = vmul.f32 %v3496_v62, %v240_v58  ;;  %v282_v20 = vmul.f32 %v3493_v61, %v251_v63  ;;  %v285_v21 = vmul.f32 %v3496_v62, %v239_v60  ;;  %594 = vrot.lane.b32.xlu1 %v3225_v8, %s3080_s16 }
  0xd9   :  { %592 = vrot.lane.b32.xlu0 %v3230_v9, %s3080_s16  ;;  %v3586_v49 = vrot.slane %v85_v22, %v3386_v31 }
  0xda   :  { %v301_v24 = vpop.permute.xlu1 %300  ;;  %v299_v25 = vpop.permute.xlu0 %298  ;;  %v294_v26 = vpack.c.bf16 %v286_v16, %v282_v20  ;;  %v297_v28 = vpack.c.bf16 %v289_v17, %v285_v21 }
  0xdb   :  { %5524 = vst [vmem:[#allocation12_spill] sm:$0xff] %v3586_v49 }
  0xdc   :  { %602 = vrot.lane.b32.xlu1 %v3239_v10, %s3080_s16  ;;  %934 = vmatpush1.bf16.msra.mxu0 %v294_v26 }
  0xdd   :  { %600 = vrot.lane.b32.xlu0 %v3244_v11, %s3080_s16  ;;  %1039 = vmatprep.subr.bf16.mxu1 %v297_v28 }
  0xde   :  { %1040 = vmatpush1.bf16.msra.mxu1 %v296_v29  ;;  %v309_v33 = vpop.permute.xlu1 %308  ;;  %v307_v34 = vpop.permute.xlu0 %306 }
  0xdf   :  { %v340_v35 = vsel %vm330_vm2, %v301_v24, %v309_v33  ;;  %v339_v37 = vsel %vm330_vm2, %v299_v25, %v307_v34 }
  0xe0   :  { %v373_v38 = vmul.f32 %v3562_v30, %v340_v35  ;;  %v369_v41 = vmul.f32 %v3562_v30, %v339_v37  ;;  %610 = vrot.lane.b32.xlu1 %v3253_v12, %s3080_s16 }
  0xe1   :  { %608 = vrot.lane.b32.xlu0 %v3258_v13, %s3080_s16 }
  0xe2   :  { %v317_v43 = vpop.permute.xlu1 %316  ;;  %v315_v44 = vpop.permute.xlu0 %314  ;;  %v385_v45 = vpack.c.bf16 %v373_v38, %v369_v41 }
  0xe3   :  { %v336_v46 = vsel %vm330_vm2, %v309_v33, %v317_v43  ;;  %v335_v47 = vsel %vm330_vm2, %v307_v34, %v315_v44 }
  0xe4   :  { %618 = vrot.lane.b32.xlu1 %v3267_v14, %s3080_s16  ;;  %935 = vmatprep.subr.bf16.mxu0 %v385_v45  ;;  %v374_v51 = vmul.f32 %v3577_v42, %v336_v46  ;;  %v370_v52 = vmul.f32 %v3577_v42, %v335_v47 }
  0xe5   :  { %616 = vrot.lane.b32.xlu0 %v3272_v15, %s3080_s16 }
  0xe6   :  { %v325_v53 = vpop.permute.xlu1 %324  ;;  %v323_v54 = vpop.permute.xlu0 %322 }
  0xe7   :  { %v332_v56 = vsel %vm330_vm2, %v317_v43, %v325_v53  ;;  %v344_v57 = vsel %vm330_vm2, %v325_v53, %v301_v24  ;;  %v331_v58 = vsel %vm330_vm2, %v315_v44, %v323_v54  ;;  %v343_v59 = vsel %vm330_vm2, %v323_v54, %v299_v25 }
  0xe8   :  { %v372_v60 = vmul.f32 %v3586_v49, %v344_v57  ;;  %v375_v63 = vmul.f32 %v3589_v50, %v332_v56  ;;  %v368_v16 = vmul.f32 %v3586_v49, %v343_v59  ;;  %v371_v17 = vmul.f32 %v3589_v50, %v331_v58  ;;  %684 = vrot.lane.b32.xlu1 %v3188_v3, %s3081_s17 }
  0xe9   :  { %682 = vrot.lane.b32.xlu0 %v3174_v1, %s3081_s17  ;;  %v386_v25 = vpack.c.bf16 %v374_v51, %v370_v52 }
  0xea   :  { %v305_v20 = vpop.permute.xlu1 %304  ;;  %v303_v21 = vpop.permute.xlu0 %302  ;;  %v384_v22 = vpack.c.bf16 %v372_v60, %v368_v16  ;;  %v387_v24 = vpack.c.bf16 %v375_v63, %v371_v17  ;;  %v87_v63 = vld [vmem:[#allocation2 + $0xc] sm:$0xf] }
  0xec   :  { %692 = vrot.lane.b32.xlu1 %v3183_v2, %s3081_s17  ;;  %936 = vmatpush1.bf16.msra.mxu0 %v384_v22 }
  0xed   :  { %690 = vrot.lane.b32.xlu0 %v3169_v0, %s3081_s17  ;;  %1041 = vmatprep.subr.bf16.mxu1 %v387_v24  ;;  %v3655_v24 = vrot.slane %v87_v63, %v3364_v19 }
  0xee   :  { %1042 = vmatpush1.bf16.msra.mxu1 %v386_v25  ;;  %v313_v26 = vpop.permute.xlu1 %312  ;;  %v311_v28 = vpop.permute.xlu0 %310 }
  0xef   :  { %v342_v29 = vsel %vm330_vm2, %v305_v20, %v313_v26  ;;  %v341_v33 = vsel %vm330_vm2, %v303_v21, %v311_v28  ;;  %5526 = vst [vmem:[#allocation14_spill] sm:$0xff] %v3655_v24 }
  0xf0   :  { %v381_v34 = vmul.f32 %v3562_v30, %v342_v29  ;;  %v377_v35 = vmul.f32 %v3562_v30, %v341_v33  ;;  %700 = vrot.lane.b32.xlu1 %v3197_v4, %s3081_s17 }
  0xf1   :  { %698 = vrot.lane.b32.xlu0 %v3202_v5, %s3081_s17 }
  0xf2   :  { %v321_v37 = vpop.permute.xlu1 %320  ;;  %v319_v38 = vpop.permute.xlu0 %318  ;;  %v389_v41 = vpack.c.bf16 %v381_v34, %v377_v35  ;;  %v3670_v35 = vrot.slane %v87_v63, %v3376_v27 }
  0xf3   :  { %v338_v43 = vsel %vm330_vm2, %v313_v26, %v321_v37  ;;  %v337_v44 = vsel %vm330_vm2, %v311_v28, %v319_v38 }
  0xf4   :  { %708 = vrot.lane.b32.xlu1 %v3207_v6, %s3081_s17  ;;  %937 = vmatprep.subr.bf16.mxu0 %v389_v41  ;;  %v382_v45 = vmul.f32 %v3577_v42, %v338_v43  ;;  %v378_v46 = vmul.f32 %v3577_v42, %v337_v44  ;;  %5527 = vst [vmem:[#allocation15_spill] sm:$0xff] %v3670_v35 }
  0xf5   :  { %706 = vrot.lane.b32.xlu0 %v3212_v7, %s3081_s17 }
  0xf6   :  { %v329_v47 = vpop.permute.xlu1 %328  ;;  %v327_v51 = vpop.permute.xlu0 %326 }
  0xf7   :  { %v334_v52 = vsel %vm330_vm2, %v321_v37, %v329_v47  ;;  %v346_v53 = vsel %vm330_vm2, %v329_v47, %v305_v20  ;;  %v333_v54 = vsel %vm330_vm2, %v319_v38, %v327_v51  ;;  %v345_v56 = vsel %vm330_vm2, %v327_v51, %v303_v21 }
  0xf8   :  { %v380_v57 = vmul.f32 %v3586_v49, %v346_v53  ;;  %v383_v58 = vmul.f32 %v3589_v50, %v334_v52  ;;  %v376_v59 = vmul.f32 %v3586_v49, %v345_v56  ;;  %v379_v60 = vmul.f32 %v3589_v50, %v333_v54  ;;  %688 = vrot.lane.b32.xlu1 %v3225_v8, %s3081_s17 }
  0xf9   :  { %686 = vrot.lane.b32.xlu0 %v3230_v9, %s3081_s17  ;;  %v390_v21 = vpack.c.bf16 %v382_v45, %v378_v46  ;;  %v3679_v45 = vrot.slane %v87_v63, %v3386_v31  ;;  %v3682_v46 = vrot.slane %v87_v63, %v3388_v32 }
  0xfa   :  { %v395_v16 = vpop.permute.xlu1 %394  ;;  %v393_v17 = vpop.permute.xlu0 %392  ;;  %v388_v20 = vpack.c.bf16 %v380_v57, %v376_v59  ;;  %v391_v22 = vpack.c.bf16 %v383_v58, %v379_v60  ;;  %v2895_v59 = vld [vmem:[%s5466_s2 + $0x4] ss:$12 sps:$4 sm:$0xff]  }
  0xfb   :  { %5528 = vst [vmem:[#allocation16_spill] sm:$0xff] %v3679_v45  ;;  %5529 = vst [vmem:[#allocation17_spill] sm:$0xff] %v3682_v46  ;;  %959 = vmatprep.mubr.bf16.mxu0 %v2895_v59  ;;  %1065 = vmatprep.mubr.bf16.mxu1 %v2895_v59 }
  0xfc   :  { %696 = vrot.lane.b32.xlu1 %v3239_v10, %s3081_s17  ;;  %938 = vmatpush1.bf16.msra.mxu0 %v388_v20 }
  0xfd   :  { %694 = vrot.lane.b32.xlu0 %v3244_v11, %s3081_s17  ;;  %1043 = vmatprep.subr.bf16.mxu1 %v391_v22 }
  0xfe   :  { %1044 = vmatpush1.bf16.msra.mxu1 %v390_v21  ;;  %v403_v25 = vpop.permute.xlu1 %402  ;;  %v401_v26 = vpop.permute.xlu0 %400 }
  0xff   :  { %v434_v28 = vsel %vm424_vm3, %v395_v16, %v403_v25  ;;  %v433_v29 = vsel %vm424_vm3, %v393_v17, %v401_v26 }
 0x100   :  { %v467_v33 = vmul.f32 %v3655_v24, %v434_v28  ;;  %v463_v34 = vmul.f32 %v3655_v24, %v433_v29  ;;  %704 = vrot.lane.b32.xlu1 %v3253_v12, %s3081_s17 }
 0x101   :  { %702 = vrot.lane.b32.xlu0 %v3258_v13, %s3081_s17 }
 0x102   :  { %v411_v37 = vpop.permute.xlu1 %410  ;;  %v409_v38 = vpop.permute.xlu0 %408  ;;  %v479_v41 = vpack.c.bf16 %v467_v33, %v463_v34 }
 0x103   :  { %v430_v43 = vsel %vm424_vm3, %v403_v25, %v411_v37  ;;  %v429_v44 = vsel %vm424_vm3, %v401_v26, %v409_v38 }
 0x104   :  { %712 = vrot.lane.b32.xlu1 %v3267_v14, %s3081_s17  ;;  %939 = vmatprep.subr.bf16.mxu0 %v479_v41  ;;  %v468_v47 = vmul.f32 %v3670_v35, %v430_v43  ;;  %v464_v51 = vmul.f32 %v3670_v35, %v429_v44 }
 0x105   :  { %710 = vrot.lane.b32.xlu0 %v3272_v15, %s3081_s17 }
 0x106   :  { %v419_v52 = vpop.permute.xlu1 %418  ;;  %v417_v53 = vpop.permute.xlu0 %416  ;;  %v480_v26 = vpack.c.bf16 %v468_v47, %v464_v51 }
 0x107   :  { %v426_v54 = vsel %vm424_vm3, %v411_v37, %v419_v52  ;;  %v438_v56 = vsel %vm424_vm3, %v419_v52, %v395_v16  ;;  %v425_v57 = vsel %vm424_vm3, %v409_v38, %v417_v53  ;;  %v437_v58 = vsel %vm424_vm3, %v417_v53, %v393_v17 }
 0x108   :  { %v466_v60 = vmul.f32 %v3679_v45, %v438_v56  ;;  %v469_v63 = vmul.f32 %v3682_v46, %v426_v54  ;;  %v462_v20 = vmul.f32 %v3679_v45, %v437_v58  ;;  %v465_v22 = vmul.f32 %v3682_v46, %v425_v57  ;;  %778 = vrot.lane.b32.xlu1 %v3188_v3, %s3082_s18 }
 0x109   :  { %776 = vrot.lane.b32.xlu0 %v3174_v1, %s3082_s18 }
 0x10a   :  { %v399_v16 = vpop.permute.xlu1 %398  ;;  %v397_v17 = vpop.permute.xlu0 %396  ;;  %v478_v21 = vpack.c.bf16 %v466_v60, %v462_v20  ;;  %v481_v25 = vpack.c.bf16 %v469_v63, %v465_v22 }
 0x10c   :  { %786 = vrot.lane.b32.xlu1 %v3183_v2, %s3082_s18  ;;  %940 = vmatpush1.bf16.msra.mxu0 %v478_v21 }
 0x10d   :  { %784 = vrot.lane.b32.xlu0 %v3169_v0, %s3082_s18  ;;  %1045 = vmatprep.subr.bf16.mxu1 %v481_v25 }
 0x10e   :  { %1046 = vmatpush1.bf16.msra.mxu1 %v480_v26  ;;  %v407_v28 = vpop.permute.xlu1 %406  ;;  %v405_v29 = vpop.permute.xlu0 %404 }
 0x10f   :  { %v436_v33 = vsel %vm424_vm3, %v399_v16, %v407_v28  ;;  %v435_v34 = vsel %vm424_vm3, %v397_v17, %v405_v29 }
 0x110   :  { %v475_v37 = vmul.f32 %v3655_v24, %v436_v33  ;;  %v471_v38 = vmul.f32 %v3655_v24, %v435_v34  ;;  %794 = vrot.lane.b32.xlu1 %v3197_v4, %s3082_s18  ;;  %v489_v33 = vpack.c.bf16 %v3207_v6, %v3212_v7 }
 0x111   :  { %792 = vrot.lane.b32.xlu0 %v3202_v5, %s3082_s18 }
 0x112   :  { %v415_v41 = vpop.permute.xlu1 %414  ;;  %v413_v43 = vpop.permute.xlu0 %412  ;;  %v483_v44 = vpack.c.bf16 %v475_v37, %v471_v38  ;;  %v486_v37 = vpack.c.bf16 %v3188_v3, %v3174_v1  ;;  %v488_v38 = vpack.c.bf16 %v3197_v4, %v3202_v5  ;;  %v490_v4 = vpack.c.bf16 %v3225_v8, %v3230_v9 }
 0x113   :  { %v432_v47 = vsel %vm424_vm3, %v407_v28, %v415_v41  ;;  %v431_v51 = vsel %vm424_vm3, %v405_v29, %v413_v43  ;;  %v89_v29 = vld [vmem:[#allocation2 + $0x14] sm:$0xf] }
 0x114   :  { %802 = vrot.lane.b32.xlu1 %v3207_v6, %s3082_s18  ;;  %941 = vmatprep.subr.bf16.mxu0 %v483_v44  ;;  %v476_v52 = vmul.f32 %v3670_v35, %v432_v47  ;;  %v472_v53 = vmul.f32 %v3670_v35, %v431_v51  ;;  %v492_v51 = vpack.c.bf16 %v3253_v12, %v3258_v13 }
 0x115   :  { %800 = vrot.lane.b32.xlu0 %v3212_v7, %s3082_s18 }
 0x116   :  { %v423_v54 = vpop.permute.xlu1 %422  ;;  %v421_v56 = vpop.permute.xlu0 %420  ;;  %v484_v34 = vpack.c.bf16 %v476_v52, %v472_v53 }
 0x117   :  { %v428_v57 = vsel %vm424_vm3, %v415_v41, %v423_v54  ;;  %v440_v58 = vsel %vm424_vm3, %v423_v54, %v399_v16  ;;  %v427_v59 = vsel %vm424_vm3, %v413_v43, %v421_v56  ;;  %v439_v60 = vsel %vm424_vm3, %v421_v56, %v397_v17 }
 0x118   :  { %v474_v63 = vmul.f32 %v3679_v45, %v440_v58  ;;  %v477_v20 = vmul.f32 %v3682_v46, %v428_v57  ;;  %v470_v22 = vmul.f32 %v3679_v45, %v439_v60  ;;  %v473_v21 = vmul.f32 %v3682_v46, %v427_v59  ;;  %782 = vrot.lane.b32.xlu1 %v3225_v8, %s3082_s18 }
 0x119   :  { %780 = vrot.lane.b32.xlu0 %v3230_v9, %s3082_s18  ;;  %v487_v17 = vpack.c.bf16 %v3183_v2, %v3169_v0  ;;  %v491_v0 = vpack.c.bf16 %v3239_v10, %v3244_v11  ;;  %v3761_v2 = vrot.slane %v89_v29, %v3386_v31  ;;  %v3775_v41 = vrot.slane %v89_v29, %v3364_v19 }
 0x11a   :  { %v497_v16 = vpop.permute.xlu1 %496  ;;  %v495_v25 = vpop.permute.xlu0 %494  ;;  %v482_v26 = vpack.c.bf16 %v474_v63, %v470_v22  ;;  %v485_v28 = vpack.c.bf16 %v477_v20, %v473_v21  ;;  %v3791_v9 = vrot.slane %v89_v29, %v3376_v27 }
 0x11b   :  { %5530 = vst [vmem:[#allocation18_spill] sm:$0xff] %v3761_v2  ;;  %5531 = vst [vmem:[#allocation19_spill] sm:$0xff] %v3775_v41 }
 0x11c   :  { %790 = vrot.lane.b32.xlu1 %v3239_v10, %s3082_s18  ;;  %942 = vmatpush1.bf16.msra.mxu0 %v482_v26  ;;  %v493_v10 = vpack.c.bf16 %v3267_v14, %v3272_v15  ;;  %5532 = vst [vmem:[#allocation20_spill] sm:$0xff] %v3791_v9  ;;  %v105_v26 = vld [vmem:[%s5467_s3 + $0x8] sm:$0xff] }
 0x11d   :  { %788 = vrot.lane.b32.xlu0 %v3244_v11, %s3082_s18  ;;  %1047 = vmatprep.subr.bf16.mxu1 %v485_v28  ;;  %v5475_v11 = vmov 0  }
 0x11e   :  { %1048 = vmatpush1.bf16.msra.mxu1 %v484_v34  ;;  %v505_v6 = vpop.permute.xlu1 %504  ;;  %v503_v7 = vpop.permute.xlu0 %502  ;;  %943 = vmatprep.subr.bf16.mxu0 %v487_v17  ;;  %v106_v34 = vld [vmem:[%s5467_s3 + $0x10] sm:$0xff] }
 0x11f   :  { %v536_v1 = vsel %vm526_vm4, %v497_v16, %v505_v6  ;;  %v535_v3 = vsel %vm526_vm4, %v495_v25, %v503_v7  ;;  %1049 = vmatprep.subr.bf16.mxu1 %v489_v33  ;;  %2891 = vset.pattern.permute.xlu0 %v5475_v11  ;;  %v107_v33 = vld [vmem:[%s5467_s3 + $0x18] sm:$0xff] }
 0x120   :  { %798 = vrot.lane.b32.xlu1 %v3253_v12, %s3082_s18  ;;  %944 = vmatpush1.bf16.msra.mxu0 %v486_v37  ;;  %v568_v5 = vmul.f32 %v3761_v2, %v536_v1  ;;  %v564_v43 = vmul.f32 %v3761_v2, %v535_v3  ;;  %v3798_v12 = vrot.slane %v89_v29, %v3388_v32 }
 0x121   :  { %796 = vrot.lane.b32.xlu0 %v3258_v13, %s3082_s18  ;;  %945 = vmatprep.subr.bf16.mxu0 %v491_v0 }
 0x122   :  { %v513_v44 = vpop.permute.xlu1 %512  ;;  %v511_v47 = vpop.permute.xlu0 %510  ;;  %1050 = vmatpush1.bf16.msra.mxu1 %v488_v38  ;;  %2892 = vset.pattern.permute.xlu1 %v5475_v11  ;;  %5533 = vst [vmem:[#allocation21_spill] sm:$0xff] %v3798_v12  ;;  %v580_v58 = vpack.c.bf16 %v568_v5, %v564_v43 }
 0x123   :  { %v532_v52 = vsel %vm526_vm4, %v505_v6, %v513_v44  ;;  %v531_v8 = vsel %vm526_vm4, %v503_v7, %v511_v47  ;;  %1051 = vmatprep.subr.bf16.mxu1 %v493_v10  ;;  %v1139_v6 = vld [vmem:[%s5468_s4] sm:$0xff]  ;;  %v1140_v7 = vld [vmem:[%s5468_s4 + $0x8] sm:$0xff] }
 0x124   :  { %v569_v53 = vmul.f32 %v3775_v41, %v532_v52  ;;  %v565_v54 = vmul.f32 %v3775_v41, %v531_v8  ;;  %806 = vrot.lane.b32.xlu1 %v3267_v14, %s3082_s18  ;;  %946 = vmatpush1.bf16.msra.mxu0 %v490_v4 }
 0x125   :  { %804 = vrot.lane.b32.xlu0 %v3272_v15, %s3082_s18 }
 0x126   :  { %v521_v13 = vpop.permute.xlu1 %520  ;;  %v519_v56 = vpop.permute.xlu0 %518  ;;  %v581_v57 = vpack.c.bf16 %v569_v53, %v565_v54  ;;  %1052 = vmatpush1.bf16.msra.mxu1 %v492_v51 }
 0x127   :  { %v528_v59 = vsel %vm526_vm4, %v513_v44, %v521_v13  ;;  %v540_v60 = vsel %vm526_vm4, %v521_v13, %v497_v16  ;;  %v527_v14 = vsel %vm526_vm4, %v511_v47, %v519_v56  ;;  %v539_v63 = vsel %vm526_vm4, %v519_v56, %v495_v25  ;;  %v104_v16 = vld [vmem:[%s5467_s3] sm:$0xff]  ;;  %v1144_v44 = vld [vmem:[%s5469_s5 + $0x8] sm:$0xff] }
 0x128   :  { %v570_v20 = vmul.f32 %v3791_v9, %v528_v59  ;;  %v571_v15 = vmul.f32 %v3798_v12, %v540_v60  ;;  %v566_v22 = vmul.f32 %v3791_v9, %v527_v14  ;;  %v567_v21 = vmul.f32 %v3798_v12, %v539_v63  ;;  %947 = vmatprep.subr.bf16.mxu0 %v581_v57  ;;  %v1143_v47 = vld [vmem:[%s5469_s5] sm:$0xff]  ;;  %v1142_v59 = vld [vmem:[%s5468_s4 + $0x18] sm:$0xff] }
 0x129   :  { %948 = vmatpush1.bf16.msra.mxu0 %v580_v58  ;;  %872 = vperm.xlu0 %2891, %v104_v16  }
 0x12a   :  { %v501_v28 = vpop.permute.xlu1 %500  ;;  %v583_v25 = vpack.c.bf16 %v571_v15, %v567_v21  ;;  %v582_v17 = vpack.c.bf16 %v570_v20, %v566_v22  ;;  %877 = vperm.xlu1 %2892, %v105_v26   ;;  %v1141_v15 = vld [vmem:[%s5468_s4 + $0x10] sm:$0xff] }
 0x12b   :  { %v499_v29 = vpop.permute.xlu0 %498 }
 0x12c   :  { %1053 = vmatprep.subr.bf16.mxu1 %v583_v25 }
 0x12d   :  { %1054 = vmatpush1.bf16.msra.mxu1 %v582_v17  ;;  %887 = vperm.xlu0 %2891, %v107_v33   ;;  %v1146_v17 = vld [vmem:[%s5469_s5 + $0x18] sm:$0xff]  ;;  %v1145_v33 = vld [vmem:[%s5469_s5 + $0x10] sm:$0xff] }
 0x12e   :  { %v509_v37 = vpop.permute.xlu1 %508  ;;  %882 = vperm.xlu1 %2892, %v106_v34  }
 0x12f   :  { %v507_v0 = vpop.permute.xlu0 %506  ;;  %v538_v38 = vsel %vm526_vm4, %v501_v28, %v509_v37 }
 0x130   :  { %v537_v1 = vsel %vm526_vm4, %v499_v29, %v507_v0  ;;  %v576_v10 = vmul.f32 %v3761_v2, %v538_v38 }
 0x131   :  { %1293 = vperm.xlu0 %2891, %v1139_v6   ;;  %v572_v4 = vmul.f32 %v3761_v2, %v537_v1 }
 0x132   :  { %v517_v3 = vpop.permute.xlu1 %516  ;;  %1298 = vperm.xlu1 %2892, %v1140_v7  }
 0x133   :  { %v534_v5 = vsel %vm526_vm4, %v509_v37, %v517_v3  ;;  %v515_v43 = vpop.permute.xlu0 %514  ;;  %v584_v58 = vpack.c.bf16 %v576_v10, %v572_v4 }
 0x134   :  { %v577_v51 = vmul.f32 %v3775_v41, %v534_v5  ;;  %v533_v52 = vsel %vm526_vm4, %v507_v0, %v515_v43 }
 0x135   :  { %v573_v8 = vmul.f32 %v3775_v41, %v533_v52  ;;  %1334 = vperm.xlu0 %2891, %v1144_v44  }
 0x136   :  { %v525_v53 = vpop.permute.xlu1 %524  ;;  %1329 = vperm.xlu1 %2892, %v1143_v47  }
 0x137   :  { %v530_v54 = vsel %vm526_vm4, %v517_v3, %v525_v53  ;;  %v542_v13 = vsel %vm526_vm4, %v525_v53, %v501_v28  ;;  %v523_v56 = vpop.permute.xlu0 %522  ;;  %v585_v57 = vpack.c.bf16 %v577_v51, %v573_v8 }
 0x138   :  { %v578_v60 = vmul.f32 %v3791_v9, %v530_v54  ;;  %v579_v14 = vmul.f32 %v3798_v12, %v542_v13  ;;  %v529_v63 = vsel %vm526_vm4, %v515_v43, %v523_v56  ;;  %v541_v20 = vsel %vm526_vm4, %v523_v56, %v499_v29  ;;  %v91_v29 = vld [vmem:[#allocation2 + $0x18] sm:$0xf] }
 0x139   :  { %v574_v22 = vmul.f32 %v3791_v9, %v529_v63  ;;  %v575_v21 = vmul.f32 %v3798_v12, %v541_v20  ;;  %949 = vmatprep.subr.bf16.mxu0 %v585_v57  ;;  %1308 = vperm.xlu0 %2891, %v1142_v59   ;;  %v3876_v37 = vrot.slane %v91_v29, %v3386_v31 }
 0x13a   :  { %950 = vmatpush1.bf16.msra.mxu0 %v584_v58  ;;  %v591_v16 = vpop.permute.xlu1 %590  ;;  %1303 = vperm.xlu1 %2892, %v1141_v15   ;;  %v3883_v38 = vrot.slane %v91_v29, %v3364_v19  ;;  %v3893_v47 = vrot.slane %v91_v29, %v3376_v27  ;;  %v3896_v51 = vrot.slane %v91_v29, %v3388_v32 }
 0x13b   :  { %v589_v26 = vpop.permute.xlu0 %588  ;;  %v587_v28 = vpack.c.bf16 %v579_v14, %v575_v21  ;;  %v586_v25 = vpack.c.bf16 %v578_v60, %v574_v22  ;;  %5534 = vst [vmem:[#allocation22_spill] sm:$0xff] %v3876_v37 }
 0x13c   :  { %5535 = vst [vmem:[#allocation23_spill] sm:$0xff] %v3883_v38  ;;  %5536 = vst [vmem:[#allocation24_spill] sm:$0xff] %v3893_v47 }
 0x13d   :  { %1055 = vmatprep.subr.bf16.mxu1 %v587_v28  ;;  %1344 = vperm.xlu0 %2891, %v1146_v17   ;;  %5537 = vst [vmem:[#allocation25_spill] sm:$0xff] %v3896_v51 }
 0x13e   :  { %1056 = vmatpush1.bf16.msra.mxu1 %v586_v25  ;;  %v599_v34 = vpop.permute.xlu1 %598  ;;  %1339 = vperm.xlu1 %2892, %v1145_v33  }
 0x13f   :  { %v597_v0 = vpop.permute.xlu0 %596  ;;  %v630_v6 = vsel %vm620_vm5, %v591_v16, %v599_v34 }
 0x140   :  { %v629_v7 = vsel %vm620_vm5, %v589_v26, %v597_v0  ;;  %v662_v3 = vmul.f32 %v3876_v37, %v630_v6 }
 0x141   :  { %v658_v10 = vmul.f32 %v3876_v37, %v629_v7 }
 0x142   :  { %v607_v1 = vpop.permute.xlu1 %606 }
 0x143   :  { %v626_v4 = vsel %vm620_vm5, %v599_v34, %v607_v1  ;;  %v605_v5 = vpop.permute.xlu0 %604  ;;  %v674_v57 = vpack.c.bf16 %v662_v3, %v658_v10 }
 0x144   :  { %v663_v43 = vmul.f32 %v3883_v38, %v626_v4  ;;  %v625_v44 = vsel %vm620_vm5, %v597_v0, %v605_v5 }
 0x145   :  { %v659_v52 = vmul.f32 %v3883_v38, %v625_v44 }
 0x146   :  { %v615_v8 = vpop.permute.xlu1 %614 }
 0x147   :  { %v622_v53 = vsel %vm620_vm5, %v607_v1, %v615_v8  ;;  %v634_v54 = vsel %vm620_vm5, %v615_v8, %v591_v16  ;;  %v613_v13 = vpop.permute.xlu0 %612  ;;  %v675_v56 = vpack.c.bf16 %v663_v43, %v659_v52 }
 0x148   :  { %v664_v58 = vmul.f32 %v3893_v47, %v622_v53  ;;  %v665_v59 = vmul.f32 %v3896_v51, %v634_v54  ;;  %v621_v60 = vsel %vm620_vm5, %v605_v5, %v613_v13  ;;  %v633_v14 = vsel %vm620_vm5, %v613_v13, %v589_v26 }
 0x149   :  { %v660_v63 = vmul.f32 %v3893_v47, %v621_v60  ;;  %v661_v20 = vmul.f32 %v3896_v51, %v633_v14  ;;  %951 = vmatprep.subr.bf16.mxu0 %v675_v56 }
 0x14a   :  { %952 = vmatpush1.bf16.msra.mxu0 %v674_v57  ;;  %v595_v15 = vpop.permute.xlu1 %594 }
 0x14b   :  { %v593_v22 = vpop.permute.xlu0 %592  ;;  %v677_v21 = vpack.c.bf16 %v665_v59, %v661_v20  ;;  %v676_v16 = vpack.c.bf16 %v664_v58, %v660_v63  ;;  %v93_v63 = vld [vmem:[#allocation2 + $0x1c] sm:$0xf] }
 0x14d   :  { %1057 = vmatprep.subr.bf16.mxu1 %v677_v21 }
 0x14e   :  { %1058 = vmatpush1.bf16.msra.mxu1 %v676_v16  ;;  %v603_v28 = vpop.permute.xlu1 %602 }
 0x14f   :  { %v601_v25 = vpop.permute.xlu0 %600  ;;  %v632_v17 = vsel %vm620_vm5, %v595_v15, %v603_v28 }
 0x150   :  { %v631_v26 = vsel %vm620_vm5, %v593_v22, %v601_v25  ;;  %v670_v33 = vmul.f32 %v3876_v37, %v632_v17 }
 0x151   :  { %v666_v34 = vmul.f32 %v3876_v37, %v631_v26 }
 0x152   :  { %v611_v29 = vpop.permute.xlu1 %610 }
 0x153   :  { %v628_v0 = vsel %vm620_vm5, %v603_v28, %v611_v29  ;;  %v609_v6 = vpop.permute.xlu0 %608  ;;  %v678_v52 = vpack.c.bf16 %v670_v33, %v666_v34  ;;  %v3944_v28 = vrot.slane %v93_v63, %v3364_v19 }
 0x154   :  { %v671_v7 = vmul.f32 %v3883_v38, %v628_v0  ;;  %v627_v1 = vsel %vm620_vm5, %v601_v25, %v609_v6 }
 0x155   :  { %v667_v3 = vmul.f32 %v3883_v38, %v627_v1  ;;  %5539 = vst [vmem:[#allocation27_spill] sm:$0xff] %v3944_v28 }
 0x156   :  { %v619_v10 = vpop.permute.xlu1 %618 }
 0x157   :  { %v624_v4 = vsel %vm620_vm5, %v611_v29, %v619_v10  ;;  %v636_v5 = vsel %vm620_vm5, %v619_v10, %v595_v15  ;;  %v617_v43 = vpop.permute.xlu0 %616  ;;  %v679_v44 = vpack.c.bf16 %v671_v7, %v667_v3  ;;  %v3937_v15 = vrot.slane %v93_v63, %v3386_v31 }
 0x158   :  { %v672_v8 = vmul.f32 %v3893_v47, %v624_v4  ;;  %v673_v53 = vmul.f32 %v3896_v51, %v636_v5  ;;  %v623_v54 = vsel %vm620_vm5, %v609_v6, %v617_v43  ;;  %v635_v13 = vsel %vm620_vm5, %v617_v43, %v593_v22 }
 0x159   :  { %v668_v56 = vmul.f32 %v3893_v47, %v623_v54  ;;  %v669_v57 = vmul.f32 %v3896_v51, %v635_v13  ;;  %953 = vmatprep.subr.bf16.mxu0 %v679_v44  ;;  %5538 = vst [vmem:[#allocation26_spill] sm:$0xff] %v3937_v15  ;;  %v3954_v6 = vrot.slane %v93_v63, %v3376_v27 }
 0x15a   :  { %954 = vmatpush1.bf16.msra.mxu0 %v678_v52  ;;  %v685_v58 = vpop.permute.xlu1 %684  ;;  %v3957_v7 = vrot.slane %v93_v63, %v3388_v32 }
 0x15b   :  { %v683_v59 = vpop.permute.xlu0 %682  ;;  %v681_v60 = vpack.c.bf16 %v673_v53, %v669_v57  ;;  %v680_v14 = vpack.c.bf16 %v672_v8, %v668_v56  ;;  %5540 = vst [vmem:[#allocation28_spill] sm:$0xff] %v3954_v6 }
 0x15c   :  { %5541 = vst [vmem:[#allocation29_spill] sm:$0xff] %v3957_v7 }
 0x15d   :  { %1059 = vmatprep.subr.bf16.mxu1 %v681_v60 }
 0x15e   :  { %1060 = vmatpush1.bf16.msra.mxu1 %v680_v14  ;;  %v693_v20 = vpop.permute.xlu1 %692 }
 0x15f   :  { %v691_v22 = vpop.permute.xlu0 %690  ;;  %v724_v21 = vsel %vm714_vm6, %v685_v58, %v693_v20 }
 0x160   :  { %v723_v16 = vsel %vm714_vm6, %v683_v59, %v691_v22  ;;  %v756_v17 = vmul.f32 %v3937_v15, %v724_v21 }
 0x161   :  { %v752_v26 = vmul.f32 %v3937_v15, %v723_v16 }
 0x162   :  { %v701_v25 = vpop.permute.xlu1 %700 }
 0x163   :  { %v720_v29 = vsel %vm714_vm6, %v693_v20, %v701_v25  ;;  %v699_v33 = vpop.permute.xlu0 %698  ;;  %v768_v44 = vpack.c.bf16 %v756_v17, %v752_v26 }
 0x164   :  { %v757_v34 = vmul.f32 %v3944_v28, %v720_v29  ;;  %v719_v0 = vsel %vm714_vm6, %v691_v22, %v699_v33 }
 0x165   :  { %v753_v1 = vmul.f32 %v3944_v28, %v719_v0 }
 0x166   :  { %v709_v3 = vpop.permute.xlu1 %708 }
 0x167   :  { %v716_v10 = vsel %vm714_vm6, %v701_v25, %v709_v3  ;;  %v728_v4 = vsel %vm714_vm6, %v709_v3, %v685_v58  ;;  %v707_v5 = vpop.permute.xlu0 %706  ;;  %v769_v43 = vpack.c.bf16 %v757_v34, %v753_v1 }
 0x168   :  { %v758_v52 = vmul.f32 %v3954_v6, %v716_v10  ;;  %v759_v8 = vmul.f32 %v3957_v7, %v728_v4  ;;  %v715_v53 = vsel %vm714_vm6, %v699_v33, %v707_v5  ;;  %v727_v54 = vsel %vm714_vm6, %v707_v5, %v683_v59 }
 0x169   :  { %v754_v13 = vmul.f32 %v3954_v6, %v715_v53  ;;  %v755_v56 = vmul.f32 %v3957_v7, %v727_v54  ;;  %955 = vmatprep.subr.bf16.mxu0 %v769_v43 }
 0x16a   :  { %956 = vmatpush1.bf16.msra.mxu0 %v768_v44  ;;  %v689_v57 = vpop.permute.xlu1 %688 }
 0x16b   :  { %v687_v58 = vpop.permute.xlu0 %686  ;;  %v771_v60 = vpack.c.bf16 %v759_v8, %v755_v56  ;;  %v770_v14 = vpack.c.bf16 %v758_v52, %v754_v13  ;;  %v2893_v13 = vld [vmem:[%s5466_s2] ss:$12 sps:$4 sm:$0xff]  }
 0x16d   :  { %1061 = vmatprep.subr.bf16.mxu1 %v771_v60 }
 0x16e   :  { %1062 = vmatpush1.bf16.msra.mxu1 %v770_v14  ;;  %v697_v63 = vpop.permute.xlu1 %696 }
 0x16f   :  { %v695_v20 = vpop.permute.xlu0 %694  ;;  %v726_v22 = vsel %vm714_vm6, %v689_v57, %v697_v63 }
 0x170   :  { %v725_v59 = vsel %vm714_vm6, %v687_v58, %v695_v20  ;;  %v764_v16 = vmul.f32 %v3937_v15, %v726_v22 }
 0x171   :  { %v760_v25 = vmul.f32 %v3937_v15, %v725_v59 }
 0x172   :  { %v705_v21 = vpop.permute.xlu1 %704 }
 0x173   :  { %v722_v17 = vsel %vm714_vm6, %v697_v63, %v705_v21  ;;  %v703_v26 = vpop.permute.xlu0 %702  ;;  %v772_v5 = vpack.c.bf16 %v764_v16, %v760_v25 }
 0x174   :  { %v765_v29 = vmul.f32 %v3944_v28, %v722_v17  ;;  %v721_v33 = vsel %vm714_vm6, %v695_v20, %v703_v26  ;;  %v95_v20 = vld [vmem:[#allocation2 + $0x20] sm:$0xf]  ;;  %v2898_v17 = vld [vmem:[%s5466_s2 + $0x18] ss:$12 sps:$4 sm:$0xff]  }
 0x175   :  { %v761_v34 = vmul.f32 %v3944_v28, %v721_v33  ;;  %v4004_v22 = vrot.slane %v95_v20, %v3386_v31  ;;  %v4011_v25 = vrot.slane %v95_v20, %v3364_v19 }
 0x176   :  { %v713_v0 = vpop.permute.xlu1 %712 }
 0x177   :  { %v718_v1 = vsel %vm714_vm6, %v705_v21, %v713_v0  ;;  %v730_v3 = vsel %vm714_vm6, %v713_v0, %v689_v57  ;;  %v711_v10 = vpop.permute.xlu0 %710  ;;  %v773_v4 = vpack.c.bf16 %v765_v29, %v761_v34  ;;  %v2896_v57 = vld [vmem:[%s5466_s2 + $0x1c] ss:$12 sps:$4 sm:$0xff]   ;;  %5542 = vst [vmem:[#allocation30_spill] sm:$0xff] %v4004_v22  ;;  %5543 = vst [vmem:[#allocation31_spill] sm:$0xff] %v4011_v25 }
 0x178   :  { %v766_v43 = vmul.f32 %v3954_v6, %v718_v1  ;;  %v767_v44 = vmul.f32 %v3957_v7, %v730_v3  ;;  %v717_v52 = vsel %vm714_vm6, %v703_v26, %v711_v10  ;;  %v729_v8 = vsel %vm714_vm6, %v711_v10, %v687_v58 }
 0x179   :  { %v762_v53 = vmul.f32 %v3954_v6, %v717_v52  ;;  %v763_v54 = vmul.f32 %v3957_v7, %v729_v8  ;;  %957 = vmatprep.subr.bf16.mxu0 %v773_v4  ;;  %v4024_v1 = vrot.slane %v95_v20, %v3376_v27  ;;  %v4027_v3 = vrot.slane %v95_v20, %v3388_v32 }
 0x17a   :  { %958 = vmatpush1.bf16.msra.mxu0 %v772_v5  ;;  %v779_v56 = vpop.permute.xlu1 %778 }
 0x17b   :  { %v777_v60 = vpop.permute.xlu0 %776  ;;  %v775_v14 = vpack.c.bf16 %v767_v44, %v763_v54  ;;  %v774_v63 = vpack.c.bf16 %v766_v43, %v762_v53  ;;  %5544 = vst [vmem:[#allocation32_spill] sm:$0xff] %v4024_v1  ;;  %5545 = vst [vmem:[#allocation33_spill] sm:$0xff] %v4027_v3 }
 0x17d   :  { %1063 = vmatprep.subr.bf16.mxu1 %v775_v14  ;;  %960 = vmatmul.mubr.bf16.vlgmr.msra.gmra.mrb[0].mxu0 %v2893_v13 }
 0x17e   :  { %1064 = vmatpush1.bf16.msra.mxu1 %v774_v63  ;;  %v787_v58 = vpop.permute.xlu1 %786  ;;  %969 = vmatprep.mubr.bf16.mxu0 %v2896_v57 }
 0x17f   :  { %v785_v59 = vpop.permute.xlu0 %784  ;;  %v818_v21 = vsel %vm808_vm7, %v779_v56, %v787_v58 }
 0x180   :  { %v817_v16 = vsel %vm808_vm7, %v777_v60, %v785_v59  ;;  %v850_v31 = vmul.f32 %v4004_v22, %v818_v21 }
 0x181   :  { %1066 = vmatmul.mubr.bf16.vlgmr.msra.gmra.mrb[0].mxu1 %v2893_v13  ;;  %v846_v29 = vmul.f32 %v4004_v22, %v817_v16 }
 0x182   :  { %v795_v26 = vpop.permute.xlu1 %794  ;;  %1075 = vmatprep.mubr.bf16.mxu1 %v2896_v57 }
 0x183   :  { %v814_v33 = vsel %vm808_vm7, %v787_v58, %v795_v26  ;;  %v793_v34 = vpop.permute.xlu0 %792  ;;  %v862_v5 = vpack.c.bf16 %v850_v31, %v846_v29 }
 0x184   :  { %v851_v0 = vmul.f32 %v4011_v25, %v814_v33  ;;  %v813_v19 = vsel %vm808_vm7, %v785_v59, %v793_v34 }
 0x185   :  { %v847_v10 = vmul.f32 %v4011_v25, %v813_v19  ;;  %970 = vmatmul.mubr.bf16.gmra.mrb[4].mxu0 %v2898_v17 }
 0x186   :  { %v803_v4 = vpop.permute.xlu1 %802  ;;  %1012 = vmatprep.mubr.bf16.mxu0 %v5475_v11 }
 0x187   :  { %v810_v43 = vsel %vm808_vm7, %v795_v26, %v803_v4  ;;  %v822_v44 = vsel %vm808_vm7, %v803_v4, %v779_v56  ;;  %v801_v52 = vpop.permute.xlu0 %800  ;;  %v863_v8 = vpack.c.bf16 %v851_v0, %v847_v10 }
 0x188   :  { %v852_v27 = vmul.f32 %v4024_v1, %v810_v43  ;;  %v853_v32 = vmul.f32 %v4027_v3, %v822_v44  ;;  %v809_v53 = vsel %vm808_vm7, %v793_v34, %v801_v52  ;;  %v821_v54 = vsel %vm808_vm7, %v801_v52, %v777_v60 }
 0x189   :  { %v848_v13 = vmul.f32 %v4024_v1, %v809_v53  ;;  %v849_v57 = vmul.f32 %v4027_v3, %v821_v54  ;;  %980 = vmatprep.subr.bf16.mxu0 %v863_v8  ;;  %1076 = vmatmul.mubr.bf16.gmra.mrb[4].mxu1 %v2898_v17 }
 0x18a   :  { %981 = vmatpush1.bf16.msra.mxu0 %v862_v5  ;;  %v783_v56 = vpop.permute.xlu1 %782  ;;  %1118 = vmatprep.mubr.bf16.mxu1 %v5475_v11 }
 0x18b   :  { %v864_v14 = vpack.c.bf16 %v852_v27, %v848_v13  ;;  %v781_v63 = vpop.permute.xlu0 %780  ;;  %v865_v20 = vpack.c.bf16 %v853_v32, %v849_v57  ;;  %v2899_v13 = vld [vmem:[%s5466_s2 + $0x8] ss:$12 sps:$4 sm:$0xff]  }
 0x18d   :  { %1086 = vmatprep.subr.bf16.mxu1 %v865_v20 }
 0x18e   :  { %1087 = vmatpush1.bf16.msra.mxu1 %v864_v14  ;;  %v791_v58 = vpop.permute.xlu1 %790  ;;  %v2900_v14 = vld [vmem:[%s5466_s2 + $0x20] ss:$12 sps:$4 sm:$0xff]  }
 0x18f   :  { %v789_v59 = vpop.permute.xlu0 %788  ;;  %v820_v60 = vsel %vm808_vm7, %v783_v56, %v791_v58 }
 0x190   :  { %v819_v21 = vsel %vm808_vm7, %v781_v63, %v789_v59  ;;  %v858_v17 = vmul.f32 %v4004_v22, %v820_v60 }
 0x191   :  { %v854_v26 = vmul.f32 %v4004_v22, %v819_v21 }
 0x192   :  { %v799_v16 = vpop.permute.xlu1 %798 }
 0x193   :  { %v816_v31 = vsel %vm808_vm7, %v791_v58, %v799_v16  ;;  %v797_v29 = vpop.permute.xlu0 %796  ;;  %v866_v10 = vpack.c.bf16 %v858_v17, %v854_v26 }
 0x194   :  { %v859_v33 = vmul.f32 %v4011_v25, %v816_v31  ;;  %v815_v34 = vsel %vm808_vm7, %v789_v59, %v797_v29 }
 0x195   :  { %v855_v0 = vmul.f32 %v4011_v25, %v815_v34 }
 0x196   :  { %v807_v19 = vpop.permute.xlu1 %806 }
 0x197   :  { %v812_v4 = vsel %vm808_vm7, %v799_v16, %v807_v19  ;;  %v824_v5 = vsel %vm808_vm7, %v807_v19, %v783_v56  ;;  %v805_v43 = vpop.permute.xlu0 %804  ;;  %v867_v44 = vpack.c.bf16 %v859_v33, %v855_v0 }
 0x198   :  { %v860_v52 = vmul.f32 %v4024_v1, %v812_v4  ;;  %v861_v8 = vmul.f32 %v4027_v3, %v824_v5  ;;  %v811_v27 = vsel %vm808_vm7, %v797_v29, %v805_v43  ;;  %v823_v32 = vsel %vm808_vm7, %v805_v43, %v781_v63 }
 0x199   :  { %v856_v53 = vmul.f32 %v4024_v1, %v811_v27  ;;  %v857_v54 = vmul.f32 %v4027_v3, %v823_v32  ;;  %982 = vmatprep.subr.bf16.mxu0 %v867_v44 }
 0x19a   :  { %983 = vmatpush1.bf16.msra.mxu0 %v866_v10 }
 0x19b   :  { %v868_v57 = vpack.c.bf16 %v860_v52, %v856_v53  ;;  %v869_v56 = vpack.c.bf16 %v861_v8, %v857_v54 }
 0x19d   :  { %2795 = vmatmul.mubr.msk.bf16.vlgmr.msra.gmra.mrb[0].mxu0 %vm920_vm8, %v2899_v13  ;;  %1088 = vmatprep.subr.bf16.mxu1 %v869_v56 }
 0x19e   :  { %1089 = vmatpush1.bf16.msra.mxu1 %v868_v57  ;;  %1022 = vmatprep.mubr.bf16.mxu0 %v5475_v11 }
 0x1a1   :  { %2797 = vmatmul.mubr.msk.bf16.vlgmr.msra.gmra.mrb[0].mxu1 %vm920_vm8, %v2899_v13 }
 0x1a2   :  { %1128 = vmatprep.mubr.bf16.mxu1 %v5475_v11 }
 0x1a5   :  { %2796 = vmatmul.mubr.msk.bf16.gmra.mrb[4].mxu0 %vm920_vm8, %v2900_v14 }
 0x1a8   :  { %v873_v63 = vpop.permute.xlu0 %872 }
 0x1a9   :  { %2798 = vmatmul.mubr.msk.bf16.gmra.mrb[4].mxu1 %vm920_vm8, %v2900_v14  ;;  %v878_v33 = vpop.permute.xlu1 %877 }
 0x270   :  { %v1014_v20 = vpop.f32.mrb[0].mxu0 }
 0x271   :  { %v4080_v58 = vadd.f32 %v1014_v20, %v873_v63  ;;  %v1016_v59 = vpop.f32.mrb[1].mxu0 }
 0x272   :  { %v4082_v60 = vadd.f32 %v1016_v59, %v873_v63  ;;  %v1018_v21 = vpop.f32.mrb[2].mxu0 }
 0x273   :  { %v1020_v16 = vpop.f32.mrb[3].mxu0  ;;  %v4092_v4 = vadd.f32 %v1018_v21, %v878_v33  ;;  %v1169_v27 = vmul.f32 %v4080_v58, %v4080_v58 }
 0x274   :  { %v1120_v17 = vpop.f32.mrb[0].mxu1  ;;  %v1147_v26 = vadd.f32 %v4082_v60, %v4080_v58  ;;  %v4094_v5 = vadd.f32 %v1020_v16, %v878_v33  ;;  %v1170_v32 = vmul.f32 %v4082_v60, %v4082_v60 }
 0x275   :  { %v4086_v31 = vadd.f32 %v1120_v17, %v873_v63  ;;  %v1122_v29 = vpop.f32.mrb[1].mxu1 }
 0x276   :  { %v4088_v34 = vadd.f32 %v1122_v29, %v873_v63  ;;  %v1124_v0 = vpop.f32.mrb[2].mxu1  ;;  %1148 = vadd.xlane.f32.xlu1 %v1147_v26  ;;  %v1150_v63 = vadd.f32 %v4094_v5, %v4092_v4  ;;  %v1177_v17 = vadd.f32 %v1170_v32, %v1169_v27  ;;  %v883_v29 = vpop.permute.xlu1 %882 }
 0x277   :  { %v4090_v19 = vadd.f32 %v1124_v0, %v878_v33  ;;  %v1126_v10 = vpop.f32.mrb[3].mxu1  ;;  %v1241_v57 = vmul.f32 %v4086_v31, %v4086_v31  ;;  %v1172_v0 = vmul.f32 %v4094_v5, %v4094_v5 }
 0x278   :  { %v4096_v43 = vadd.f32 %v1126_v10, %v878_v33  ;;  %v1024_v44 = vpop.f32.mrb[4].mxu0  ;;  %v1219_v52 = vadd.f32 %v4088_v34, %v4086_v31  ;;  %v1242_v56 = vmul.f32 %v4088_v34, %v4088_v34  ;;  %v1171_v33 = vmul.f32 %v4092_v4, %v4092_v4 }
 0x279   :  { %v1026_v8 = vpop.f32.mrb[5].mxu0  ;;  %v1243_v59 = vmul.f32 %v4090_v19, %v4090_v19 }
 0x27a   :  { %1220 = vadd.xlane.f32.xlu0 %v1219_v52  ;;  %v1028_v53 = vpop.f32.mrb[6].mxu0  ;;  %v1222_v54 = vadd.f32 %v4096_v43, %v4090_v19  ;;  %v1244_v21 = vmul.f32 %v4096_v43, %v4096_v43  ;;  %v1249_v10 = vadd.f32 %v1242_v56, %v1241_v57  ;;  %v4120_v52 = vadd.f32 %v1024_v44, %v883_v29 }
 0x27b   :  { %v1030_v13 = vpop.f32.mrb[7].mxu0  ;;  %v1180_v32 = vadd.f32 %v1172_v0, %v1171_v33 }
 0x27c   :  { %v1130_v14 = vpop.f32.mrb[4].mxu1  ;;  %1223 = vadd.xlane.f32.xlu1 %v1222_v54  ;;  %v4122_v54 = vadd.f32 %v1026_v8, %v883_v29  ;;  %v1252_v27 = vadd.f32 %v1244_v21, %v1243_v59  ;;  %v888_v8 = vpop.permute.xlu0 %887 }
 0x27d   :  { %v1132_v20 = vpop.f32.mrb[5].mxu1  ;;  %v4124_v11 = vadd.f32 %v1130_v14, %v883_v29  ;;  %v4134_v57 = vadd.f32 %v1028_v53, %v888_v8  ;;  %v4136_v56 = vadd.f32 %v1030_v13, %v888_v8 }
 0x27e   :  { %v1134_v16 = vpop.f32.mrb[6].mxu1  ;;  %1151 = vadd.xlane.f32.xlu0 %v1150_v63  ;;  %v4126_v3 = vadd.f32 %v1132_v20, %v883_v29  ;;  %v1173_v63 = vmul.f32 %v4120_v52, %v4120_v52  ;;  %v1174_v1 = vmul.f32 %v4122_v54, %v4122_v54  ;;  %v1153_v14 = vadd.f32 %v4122_v54, %v4120_v52 }
 0x27f   :  { %v1136_v26 = vpop.f32.mrb[7].mxu1  ;;  %v1245_v59 = vmul.f32 %v4124_v11, %v4124_v11  ;;  %v1156_v53 = vadd.f32 %v4136_v56, %v4134_v57  ;;  %v1175_v0 = vmul.f32 %v4134_v57, %v4134_v57 }
 0x280   :  { %1178 = vadd.xlane.f32.xlu1 %v1177_v17  ;;  %v1225_v44 = vadd.f32 %v4126_v3, %v4124_v11  ;;  %v1183_v20 = vadd.f32 %v1174_v1, %v1173_v63  ;;  %v1246_v21 = vmul.f32 %v4126_v3, %v4126_v3  ;;  %v4144_v17 = vadd.f32 %v1134_v16, %v888_v8  ;;  %v4162_v63 = vpop.permute.xlu0 %1293 }
 0x281   :  { %v4146_v29 = vadd.f32 %v1136_v26, %v888_v8  ;;  %v1176_v16 = vmul.f32 %v4136_v56, %v4136_v56 }
 0x282   :  { %1250 = vadd.xlane.f32.xlu0 %v1249_v10  ;;  %v1247_v13 = vmul.f32 %v4144_v17, %v4144_v17  ;;  %v1255_v33 = vadd.f32 %v1246_v21, %v1245_v59 }
 0x283   :  { %v1248_v1 = vmul.f32 %v4146_v29, %v4146_v29  ;;  %v1228_v26 = vadd.f32 %v4146_v29, %v4144_v17 }
 0x284   :  { %1253 = vadd.xlane.f32.xlu1 %v1252_v27  ;;  %v1186_v27 = vadd.f32 %v1176_v16, %v1175_v0  ;;  %v4166_v8 = vpop.permute.xlu0 %1334 }
 0x285   :  { %v1258_v10 = vadd.f32 %v1248_v1, %v1247_v13 }
 0x286   :  { %1181 = vadd.xlane.f32.xlu0 %v1180_v32  ;;  %v4160_v32 = vpop.permute.xlu1 %1298 }
 0x288   :  { %1226 = vadd.xlane.f32.xlu1 %v1225_v44 }
 0x28a   :  { %1154 = vadd.xlane.f32.xlu0 %v1153_v14  ;;  %v4164_v44 = vpop.permute.xlu1 %1329 }
 0x28c   :  { %1184 = vadd.xlane.f32.xlu1 %v1183_v20  ;;  %v4170_v20 = vpop.permute.xlu0 %1308 }
 0x28e   :  { %1157 = vadd.xlane.f32.xlu0 %v1156_v53  ;;  %v4168_v14 = vpop.permute.xlu1 %1303 }
 0x290   :  { %1256 = vadd.xlane.f32.xlu1 %v1255_v33  ;;  %v4174_v21 = vpop.permute.xlu0 %1344 }
 0x292   :  { %1229 = vadd.xlane.f32.xlu0 %v1228_v26  ;;  %v4172_v59 = vpop.permute.xlu1 %1339 }
 0x294   :  { %1259 = vadd.xlane.f32.xlu1 %v1258_v10 }
 0x296   :  { %1187 = vadd.xlane.f32.xlu0 %v1186_v27 }
 0x303   :  { %v1149_v53 = vpop.xlane.xlu1 %1148 }
 0x307   :  { %v1221_v13 = vpop.xlane.xlu0 %1220 }
 0x309   :  { %v1224_v1 = vpop.xlane.xlu1 %1223 }
 0x30a   :  { %v1231_v28 = vadd.f32 %v1224_v1, %v1221_v13 }
 0x30b   :  { %v1152_v33 = vpop.xlane.xlu0 %1151 }
 0x30c   :  { %v1159_v25 = vadd.f32 %v1152_v33, %v1149_v53 }
 0x30d   :  { %v1179_v0 = vpop.xlane.xlu1 %1178 }
 0x30f   :  { %v1251_v16 = vpop.xlane.xlu0 %1250 }
 0x311   :  { %v1254_v26 = vpop.xlane.xlu1 %1253 }
 0x312   :  { %v1261_v37 = vadd.f32 %v1254_v26, %v1251_v16 }
 0x313   :  { %v1182_v10 = vpop.xlane.xlu0 %1181 }
 0x314   :  { %v1189_v2 = vadd.f32 %v1182_v10, %v1179_v0 }
 0x315   :  { %v1227_v27 = vpop.xlane.xlu1 %1226 }
 0x316   :  { %v1232_v38 = vadd.f32 %v1231_v28, %v1227_v27 }
 0x317   :  { %v1155_v22 = vpop.xlane.xlu0 %1154 }
 0x318   :  { %v1160_v6 = vadd.f32 %v1159_v25, %v1155_v22 }
 0x319   :  { %v1185_v7 = vpop.xlane.xlu1 %1184 }
 0x31a   :  { %v1190_v24 = vadd.f32 %v1189_v2, %v1185_v7 }
 0x31b   :  { %v1158_v15 = vpop.xlane.xlu0 %1157 }
 0x31c   :  { %v1161_v51 = vadd.f32 %v1160_v6, %v1158_v15 }
 0x31d   :  { %v1257_v47 = vpop.xlane.xlu1 %1256 }
 0x31e   :  { %v1162_v12 = vrot.slane %v1161_v51, 4  ;;  %v1262_v35 = vadd.f32 %v1261_v37, %v1257_v47 }
 0x31f   :  { %v1230_v9 = vpop.xlane.xlu0 %1229 }
 0x320   :  { %v1163_v41 = vadd.f32 %v1162_v12, %v1161_v51  ;;  %v1233_v46 = vadd.f32 %v1232_v38, %v1230_v9 }
 0x321   :  { %v1260_v45 = vpop.xlane.xlu1 %1259 }
 0x322   :  { %v1164_v42 = vrot.slane %v1163_v41, 2  ;;  %v1234_v50 = vrot.slane %v1233_v46, 4  ;;  %v1263_v49 = vadd.f32 %v1262_v35, %v1260_v45 }
 0x323   :  { %v1188_v53 = vpop.xlane.xlu0 %1187 }
 0x324   :  { %v1235_v33 = vadd.f32 %v1234_v50, %v1233_v46  ;;  %v1264_v22 = vrot.slane %v1263_v49, 4  ;;  %v1191_v25 = vadd.f32 %v1190_v24, %v1188_v53  ;;  %v1165_v13 = vadd.f32 %v1164_v42, %v1163_v41 }
 0x326   :  { %v1236_v15 = vrot.slane %v1235_v33, 2  ;;  %v1265_v6 = vadd.f32 %v1264_v22, %v1263_v49  ;;  %v1192_v1 = vrot.slane %v1191_v25, 4  ;;  %v1166_v0 = vrot.slane %v1165_v13, 1 }
 0x328   :  { %v1237_v28 = vadd.f32 %v1236_v15, %v1235_v33  ;;  %v1266_v16 = vrot.slane %v1265_v6, 2  ;;  %v1193_v26 = vadd.f32 %v1192_v1, %v1191_v25  ;;  %v1167_v38 = vadd.f32 %v1166_v0, %v1165_v13 }
 0x32a   :  { %v1238_v12 = vrot.slane %v1237_v28, 1  ;;  %v1267_v37 = vadd.f32 %v1266_v16, %v1265_v6  ;;  %v1194_v9 = vrot.slane %v1193_v26, 2  ;;  %v4178_v24 = vmul.f32 0.00012207031, %v1167_v38 }
 0x32c   :  { %v1239_v2 = vadd.f32 %v1238_v12, %v1237_v28  ;;  %v1268_v47 = vrot.slane %v1267_v37, 1  ;;  %v1195_v51 = vadd.f32 %v1194_v9, %v1193_v26  ;;  %v1199_v10 = vmul.f32 %v4178_v24, %v4178_v24 }
 0x32d   :  { %v1201_v6 = vsub.f32 %v4080_v58, %v4178_v24  ;;  %v1202_v1 = vsub.f32 %v4082_v60, %v4178_v24  ;;  %v1203_v28 = vsub.f32 %v4092_v4, %v4178_v24 }
 0x32e   :  { %v4176_v35 = vmul.f32 0.00012207031, %v1239_v2  ;;  %v1269_v50 = vadd.f32 %v1268_v47, %v1267_v37  ;;  %v1196_v45 = vrot.slane %v1195_v51, 1 }
 0x330   :  { %v1271_v42 = vmul.f32 %v4176_v35, %v4176_v35  ;;  %v1270_v49 = vmul.f32 0.00012207031, %v1269_v50  ;;  %v1197_v46 = vadd.f32 %v1196_v45, %v1195_v51  ;;  %v1273_v22 = vsub.f32 %v4086_v31, %v4176_v35 }
 0x331   :  { %v1275_v25 = vsub.f32 %v4090_v19, %v4176_v35  ;;  %v1276_v13 = vsub.f32 %v4096_v43, %v4176_v35  ;;  %v1204_v31 = vsub.f32 %v4094_v5, %v4178_v24  ;;  %v1274_v58 = vsub.f32 %v4088_v34, %v4176_v35 }
 0x332   :  { %v1272_v41 = vsub.f32 %v1270_v49, %v1271_v42  ;;  %v1198_v7 = vmul.f32 0.00012207031, %v1197_v46  ;;  %v1205_v50 = vsub.f32 %v4120_v52, %v4178_v24  ;;  %v1206_v45 = vsub.f32 %v4122_v54, %v4178_v24 }
 0x334   :  { %v1281_v27 = vadd.f32 1e-05, %v1272_v41  ;;  %v1200_v53 = vsub.f32 %v1198_v7, %v1199_v10 }
 0x336   :  { %2909 = vrsqrt.f32 %v1281_v27  ;;  %v1209_v33 = vadd.f32 1e-05, %v1200_v53  ;;  %v1207_v53 = vsub.f32 %v4134_v57, %v4178_v24 }
 0x338   :  { %2911 = vrsqrt.f32 %v1209_v33  ;;  %v1208_v33 = vsub.f32 %v4136_v56, %v4178_v24 }
 0x340   :  { %v4190_v15 = vpop.eup %2909 }
 0x341   :  { %v1285_v16 = vmul.f32 %v4190_v15, %v1275_v25  ;;  %v1283_v19 = vmul.f32 %v4190_v15, %v1273_v22  ;;  %v1286_v43 = vmul.f32 %v4190_v15, %v1276_v13  ;;  %v1284_v38 = vmul.f32 %v4190_v15, %v1274_v58 }
 0x342   :  { %v4203_v26 = vpop.eup %2911  ;;  %v1277_v13 = vsub.f32 %v4124_v11, %v4176_v35 }
 0x343   :  { %v1213_v0 = vmul.f32 %v4203_v26, %v1203_v28  ;;  %v1211_v60 = vmul.f32 %v4203_v26, %v1201_v6  ;;  %v1214_v4 = vmul.f32 %v4203_v26, %v1204_v31  ;;  %v1212_v12 = vmul.f32 %v4203_v26, %v1202_v1 }
 0x344   :  { %v1317_v5 = vmul.f32 %v4160_v32, %v1285_v16  ;;  %v1313_v37 = vmul.f32 %v4162_v63, %v1283_v19  ;;  %v1318_v9 = vmul.f32 %v4160_v32, %v1286_v43  ;;  %v1314_v27 = vmul.f32 %v4162_v63, %v1284_v38 }
 0x345   :  { %v1315_v2 = vmul.f32 %v4160_v32, %v1213_v0  ;;  %v1311_v34 = vmul.f32 %v4162_v63, %v1211_v60  ;;  %v1316_v47 = vmul.f32 %v4160_v32, %v1214_v4  ;;  %v1312_v51 = vmul.f32 %v4162_v63, %v1212_v12 }
 0x346   :  { %v4224_v42 = vadd.f32 %v4166_v8, %v1317_v5  ;;  %v4227_v49 = vadd.f32 %v4164_v44, %v1313_v37  ;;  %v4244_v10 = vadd.f32 %v4166_v8, %v1318_v9  ;;  %v1279_v6 = vsub.f32 %v4144_v17, %v4176_v35 }
 0x347   :  { %v4230_v46 = vadd.f32 %v4166_v8, %v1315_v2  ;;  %v4233_v41 = vadd.f32 %v4164_v44, %v1311_v34  ;;  %v4236_v32 = vadd.f32 %v4166_v8, %v1316_v47  ;;  %v4239_v52 = vadd.f32 %v4164_v44, %v1312_v51 }
 0x348   :  { %v1385_v54 = vmul.f32 0.044715, %v4224_v42  ;;  %v1381_v7 = vmul.f32 0.044715, %v4227_v49  ;;  %v1386_v16 = vmul.f32 0.044715, %v4244_v10  ;;  %v4267_v17 = vadd.f32 %v4164_v44, %v1314_v27 }
 0x349   :  { %v1383_v22 = vmul.f32 0.044715, %v4230_v46  ;;  %v1379_v25 = vmul.f32 0.044715, %v4233_v41  ;;  %v1384_v8 = vmul.f32 0.044715, %v4236_v32  ;;  %v1280_v60 = vsub.f32 %v4146_v29, %v4176_v35 }
 0x34a   :  { %v1380_v63 = vmul.f32 0.044715, %v4239_v52  ;;  %v1401_v56 = vmul.f32 %v1385_v54, %v4224_v42  ;;  %v1397_v24 = vmul.f32 %v1381_v7, %v4227_v49  ;;  %v1402_v5 = vmul.f32 %v1386_v16, %v4244_v10 }
 0x34b   :  { %v1399_v1 = vmul.f32 %v1383_v22, %v4230_v46  ;;  %v1395_v57 = vmul.f32 %v1379_v25, %v4233_v41  ;;  %v1400_v28 = vmul.f32 %v1384_v8, %v4236_v32  ;;  %v1382_v47 = vmul.f32 0.044715, %v4267_v17 }
 0x34c   :  { %v1396_v31 = vmul.f32 %v1380_v63, %v4239_v52  ;;  %v1417_v58 = vmul.f32 %v1401_v56, %v4224_v42  ;;  %v1413_v0 = vmul.f32 %v1397_v24, %v4227_v49  ;;  %v1418_v29 = vmul.f32 %v1402_v5, %v4244_v10 }
 0x34d   :  { %v1415_v19 = vmul.f32 %v1399_v1, %v4230_v46  ;;  %v1411_v43 = vmul.f32 %v1395_v57, %v4233_v41  ;;  %v1416_v4 = vmul.f32 %v1400_v28, %v4236_v32  ;;  %v1217_v7 = vmul.f32 %v4203_v26, %v1207_v53 }
 0x34e   :  { %v1412_v12 = vmul.f32 %v1396_v31, %v4239_v52  ;;  %v1433_v9 = vadd.f32 %v1417_v58, %v4224_v42  ;;  %v1429_v38 = vadd.f32 %v1413_v0, %v4227_v49  ;;  %v1289_v27 = vmul.f32 %v4190_v15, %v1279_v6 }
 0x34f   :  { %v1431_v44 = vadd.f32 %v1415_v19, %v4230_v46  ;;  %v1427_v37 = vadd.f32 %v1411_v43, %v4233_v41  ;;  %v1432_v2 = vadd.f32 %v1416_v4, %v4236_v32  ;;  %v1434_v63 = vadd.f32 %v1418_v29, %v4244_v10 }
 0x350   :  { %v1428_v34 = vadd.f32 %v1412_v12, %v4239_v52  ;;  %v1449_v8 = vmul.f32 0.7978846, %v1433_v9  ;;  %v1398_v1 = vmul.f32 %v1382_v47, %v4267_v17  ;;  %v1323_v57 = vmul.f32 %v4170_v20, %v1217_v7 }
 0x351   :  { %v1447_v51 = vmul.f32 0.7978846, %v1431_v44  ;;  %v1443_v54 = vmul.f32 0.7978846, %v1427_v37  ;;  %v1448_v22 = vmul.f32 0.7978846, %v1432_v2  ;;  %v1215_v56 = vmul.f32 %v4203_v26, %v1205_v50 }
 0x352   :  { %v1444_v25 = vmul.f32 0.7978846, %v1428_v34  ;;  %v1445_v24 = vmul.f32 0.7978846, %v1429_v38  ;;  %v1218_v28 = vmul.f32 %v4203_v26, %v1208_v33  ;;  %v1216_v53 = vmul.f32 %v4203_v26, %v1206_v45 }
 0x353   :  { %2913 = vtanh.f32 %v1447_v51  ;;  %v1414_v6 = vmul.f32 %v1398_v1, %v4267_v17  ;;  %v4296_v31 = vadd.f32 %v4174_v21, %v1323_v57  ;;  %v1319_v16 = vmul.f32 %v4168_v14, %v1215_v56 }
 0x354   :  { %2915 = vtanh.f32 %v1443_v54  ;;  %v1324_v19 = vmul.f32 %v4170_v20, %v1218_v28  ;;  %v1320_v43 = vmul.f32 %v4168_v14, %v1216_v53  ;;  %v1325_v50 = vmul.f32 %v4170_v20, %v1289_v27 }
 0x355   :  { %2917 = vtanh.f32 %v1448_v22  ;;  %v1450_v58 = vmul.f32 0.7978846, %v1434_v63  ;;  %v1430_v33 = vadd.f32 %v1414_v6, %v4267_v17  ;;  %v1391_v26 = vmul.f32 0.044715, %v4296_v31 }
 0x356   :  { %2919 = vtanh.f32 %v1444_v25  ;;  %v4305_v45 = vadd.f32 %v4172_v59, %v1319_v16  ;;  %v4308_v0 = vadd.f32 %v4174_v21, %v1324_v19  ;;  %v4311_v4 = vadd.f32 %v4172_v59, %v1320_v43 }
 0x357   :  { %2921 = vtanh.f32 %v1449_v8  ;;  %v1446_v12 = vmul.f32 0.7978846, %v1430_v33  ;;  %v1407_v5 = vmul.f32 %v1391_v26, %v4296_v31  ;;  %v4315_v44 = vadd.f32 %v4174_v21, %v1325_v50 }
 0x358   :  { %2923 = vtanh.f32 %v1445_v24  ;;  %v1287_v37 = vmul.f32 %v4190_v15, %v1277_v13  ;;  %v1278_v9 = vsub.f32 %v4126_v3, %v4176_v35  ;;  %v1387_v38 = vmul.f32 0.044715, %v4305_v45 }
 0x359   :  { %v1392_v2 = vmul.f32 0.044715, %v4308_v0  ;;  %v1290_v34 = vmul.f32 %v4190_v15, %v1280_v60  ;;  %v1367_v29 = vmul.f32 0.5, %v4230_v46  ;;  %2925 = vtanh.f32 %v1450_v58 }
 0x35a   :  { %v1423_v47 = vmul.f32 %v1407_v5, %v4296_v31  ;;  %v1388_v51 = vmul.f32 0.044715, %v4311_v4  ;;  %2927 = vtanh.f32 %v1446_v12  ;;  %v1403_v11 = vmul.f32 %v1387_v38, %v4305_v45 }
 0x35b   :  { %v1408_v13 = vmul.f32 %v1392_v2, %v4308_v0  ;;  %v1393_v3 = vmul.f32 0.044715, %v4315_v44  ;;  %v1363_v54 = vmul.f32 0.5, %v4233_v41  ;;  %v1321_v46 = vmul.f32 %v4168_v14, %v1287_v37 }
 0x35c   :  { %v1439_v7 = vadd.f32 %v1423_v47, %v4296_v31  ;;  %v1404_v60 = vmul.f32 %v1388_v51, %v4311_v4  ;;  %v1419_v25 = vmul.f32 %v1403_v11, %v4305_v45  ;;  %v1368_v12 = vmul.f32 0.5, %v4236_v32 }
 0x35d   :  { %v2914_v35 = vpop.eup %2913  ;;  %v1424_v8 = vmul.f32 %v1408_v13, %v4308_v0  ;;  %v1409_v63 = vmul.f32 %v1393_v3, %v4315_v44  ;;  %v4341_v41 = vadd.f32 %v4172_v59, %v1321_v46  ;;  %v1326_v38 = vmul.f32 %v4170_v20, %v1290_v34 }
 0x35e   :  { %v2916_v27 = vpop.eup %2915  ;;  %v1479_v22 = vadd.f32 1.0, %v2914_v35  ;;  %v1455_v56 = vmul.f32 0.7978846, %v1439_v7  ;;  %v1420_v24 = vmul.f32 %v1404_v60, %v4311_v4  ;;  %v1435_v16 = vadd.f32 %v1419_v25, %v4305_v45 }
 0x35f   :  { %v2918_v1 = vpop.eup %2917  ;;  %v1475_v57 = vadd.f32 1.0, %v2916_v27  ;;  %v1440_v19 = vadd.f32 %v1424_v8, %v4308_v0  ;;  %v1364_v2 = vmul.f32 0.5, %v4239_v52  ;;  %v1425_v47 = vmul.f32 %v1409_v63, %v4315_v44 }
 0x360   :  { %v2920_v28 = vpop.eup %2919  ;;  %v4343_v53 = vmul.f32 %v1479_v22, %v1367_v29  ;;  %v1480_v6 = vadd.f32 1.0, %v2918_v1  ;;  %2929 = vtanh.f32 %v1455_v56  ;;  %v1436_v33 = vadd.f32 %v1420_v24, %v4311_v4 }
 0x361   :  { %v2922_v43 = vpop.eup %2921  ;;  %v4347_v50 = vmul.f32 %v1475_v57, %v1363_v54  ;;  %v1476_v58 = vadd.f32 1.0, %v2920_v28  ;;  %v1451_v5 = vmul.f32 0.7978846, %v1435_v16  ;;  %v1456_v37 = vmul.f32 0.7978846, %v1440_v19 }
 0x362   :  { %v2924_v26 = vpop.eup %2923  ;;  %1521 = vrot.lane.b32.xlu0 %v4343_v53, %s3075_s24  ;;  %v1452_v29 = vmul.f32 0.7978846, %v1436_v33  ;;  %v1288_v51 = vmul.f32 %v4190_v15, %v1278_v9  ;;  %v4359_v11 = vmul.f32 %v1480_v6, %v1368_v12  ;;  %v1481_v13 = vadd.f32 1.0, %v2922_v43 }
 0x363   :  { %1519 = vrot.lane.b32.xlu1 %v4347_v50, %s3075_s24  ;;  %v1477_v3 = vadd.f32 1.0, %v2924_v26  ;;  %2931 = vtanh.f32 %v1451_v5  ;;  %v2926_v32 = vpop.eup %2925  ;;  %v4361_v35 = vmul.f32 %v1476_v58, %v1364_v2  ;;  %v1441_v20 = vadd.f32 %v1425_v47, %v4315_v44 }
 0x364   :  { %2933 = vtanh.f32 %v1456_v37  ;;  %v1389_v34 = vmul.f32 0.044715, %v4341_v41  ;;  %v2928_v54 = vpop.eup %2927  ;;  %v1369_v52 = vmul.f32 0.5, %v4224_v42  ;;  %v1365_v15 = vmul.f32 0.5, %v4227_v49 }
 0x365   :  { %2935 = vtanh.f32 %v1452_v29  ;;  %v4370_v9 = vadd.f32 %v4174_v21, %v1326_v38  ;;  %v1457_v7 = vmul.f32 0.7978846, %v1441_v20  ;;  %v1322_v46 = vmul.f32 %v4168_v14, %v1288_v51 }
 0x366   :  { %1529 = vrot.lane.b32.xlu0 %v4359_v11, %s3075_s24  ;;  %v1405_v60 = vmul.f32 %v1389_v34, %v4341_v41  ;;  %v4376_v27 = vmul.f32 %v1481_v13, %v1369_v52  ;;  %v4378_v22 = vmul.f32 %v1477_v3, %v1365_v15  ;;  %v1482_v25 = vadd.f32 1.0, %v2926_v32 }
 0x367   :  { %1527 = vrot.lane.b32.xlu1 %v4361_v35, %s3075_s24  ;;  %v1394_v42 = vmul.f32 0.044715, %v4370_v9  ;;  %v1478_v49 = vadd.f32 1.0, %v2928_v54  ;;  %2937 = vtanh.f32 %v1457_v7  ;;  %v1358_v8 = vadd.f32 %v4172_v59, %v1322_v46 }
 0x368   :  { %v1421_v21 = vmul.f32 %v1405_v60, %v4341_v41  ;;  %v1370_v63 = vmul.f32 0.5, %v4244_v10  ;;  %v1366_v57 = vmul.f32 0.5, %v4267_v17  ;;  %v1375_v58 = vmul.f32 0.5, %v4296_v31 }
 0x369   :  { %v1410_v14 = vmul.f32 %v1394_v42, %v4370_v9  ;;  %v1390_v24 = vmul.f32 0.044715, %v1358_v8  ;;  %v1371_v26 = vmul.f32 0.5, %v4305_v45  ;;  %v1376_v13 = vmul.f32 0.5, %v4308_v0 }
 0x36a   :  { %1537 = vrot.lane.b32.xlu0 %v4376_v27, %s3075_s24  ;;  %v2930_v1 = vpop.eup %2929  ;;  %v1437_v56 = vadd.f32 %v1421_v21, %v4341_v41  ;;  %v4391_v28 = vmul.f32 %v1482_v25, %v1370_v63  ;;  %v4394_v16 = vmul.f32 %v1478_v49, %v1366_v57  ;;  %v1372_v45 = vmul.f32 0.5, %v4311_v4 }
 0x36b   :  { %1535 = vrot.lane.b32.xlu1 %v4378_v22, %s3075_s24  ;;  %v1487_v6 = vadd.f32 1.0, %v2930_v1  ;;  %v1426_v59 = vmul.f32 %v1410_v14, %v4370_v9  ;;  %v1406_v10 = vmul.f32 %v1390_v24, %v1358_v8  ;;  %v1377_v52 = vmul.f32 0.5, %v4315_v44 }
 0x36c   :  { %v1453_v19 = vmul.f32 0.7978846, %v1437_v56  ;;  %v1373_v4 = vmul.f32 0.5, %v4341_v41  ;;  %v1378_v25 = vmul.f32 0.5, %v4370_v9  ;;  %v1374_v21 = vmul.f32 0.5, %v1358_v8 }
 0x36d   :  { %v2932_v43 = vpop.eup %2931  ;;  %v1442_v17 = vadd.f32 %v1426_v59, %v4370_v9  ;;  %v1422_v5 = vmul.f32 %v1406_v10, %v1358_v8  ;;  %v4403_v38 = vmul.f32 %v1487_v6, %v1375_v58 }
 0x36e   :  { %1545 = vrot.lane.b32.xlu0 %v4391_v28, %s3075_s24  ;;  %v2934_v33 = vpop.eup %2933  ;;  %v1483_v12 = vadd.f32 1.0, %v2932_v43  ;;  %2939 = vtanh.f32 %v1453_v19 }
 0x36f   :  { %1543 = vrot.lane.b32.xlu1 %v4394_v16, %s3075_s24  ;;  %v2936_v37 = vpop.eup %2935  ;;  %v1488_v2 = vadd.f32 1.0, %v2934_v33  ;;  %v1458_v29 = vmul.f32 0.7978846, %v1442_v17  ;;  %v1438_v31 = vadd.f32 %v1422_v5, %v1358_v8 }
 0x370   :  { %v4405_v47 = vmul.f32 %v1483_v12, %v1371_v26  ;;  %v1484_v51 = vadd.f32 1.0, %v2936_v37 }
 0x371   :  { %2941 = vtanh.f32 %v1458_v29  ;;  %v2938_v3 = vpop.eup %2937  ;;  %v1454_v32 = vmul.f32 0.7978846, %v1438_v31  ;;  %v4413_v20 = vmul.f32 %v1488_v2, %v1376_v13 }
 0x372   :  { %1525 = vrot.lane.b32.xlu0 %v4403_v38, %s3075_s24  ;;  %v1489_v34 = vadd.f32 1.0, %v2938_v3  ;;  %v4415_v54 = vmul.f32 %v1484_v51, %v1372_v45 }
 0x373   :  { %1523 = vrot.lane.b32.xlu1 %v4405_v47, %s3075_s24  ;;  %2943 = vtanh.f32 %v1454_v32 }
 0x374   :  { %v4422_v0 = vmul.f32 %v1489_v34, %v1377_v52 }
 0x376   :  { %1533 = vrot.lane.b32.xlu0 %v4413_v20, %s3075_s24 }
 0x377   :  { %1531 = vrot.lane.b32.xlu1 %v4415_v54, %s3075_s24 }
 0x378   :  { %v2940_v15 = vpop.eup %2939 }
 0x379   :  { %v1485_v7 = vadd.f32 1.0, %v2940_v15 }
 0x37a   :  { %1541 = vrot.lane.b32.xlu0 %v4422_v0, %s3075_s24 }
 0x37b   :  { %v2942_v60 = vpop.eup %2941  ;;  %v4427_v46 = vmul.f32 %v1485_v7, %v1373_v4 }
 0x37c   :  { %v1490_v42 = vadd.f32 1.0, %v2942_v60 }
 0x37d   :  { %1539 = vrot.lane.b32.xlu1 %v4427_v46, %s3075_s24  ;;  %v2944_v44 = vpop.eup %2943 }
 0x37e   :  { %v4432_v49 = vmul.f32 %v1490_v42, %v1378_v25  ;;  %v1486_v63 = vadd.f32 1.0, %v2944_v44 }
 0x380   :  { %1549 = vrot.lane.b32.xlu0 %v4432_v49, %s3075_s24  ;;  %v4436_v14 = vmul.f32 %v1486_v63, %v1374_v21 }
 0x382   :  { %1547 = vrot.lane.b32.xlu1 %v4436_v14, %s3075_s24 }
 0x384   :  { %1593 = vrot.lane.b32.xlu0 %v4343_v53, %s3076_s11 }
 0x386   :  { %1591 = vrot.lane.b32.xlu1 %v4347_v50, %s3076_s11 }
 0x388   :  { %1601 = vrot.lane.b32.xlu0 %v4359_v11, %s3076_s11 }
 0x38a   :  { %1599 = vrot.lane.b32.xlu1 %v4361_v35, %s3076_s11 }
 0x38c   :  { %1609 = vrot.lane.b32.xlu0 %v4376_v27, %s3076_s11 }
 0x38e   :  { %1607 = vrot.lane.b32.xlu1 %v4378_v22, %s3076_s11 }
 0x390   :  { %1617 = vrot.lane.b32.xlu0 %v4391_v28, %s3076_s11 }
 0x392   :  { %1615 = vrot.lane.b32.xlu1 %v4394_v16, %s3076_s11 }
 0x394   :  { %1597 = vrot.lane.b32.xlu0 %v4403_v38, %s3076_s11 }
 0x396   :  { %1595 = vrot.lane.b32.xlu1 %v4405_v47, %s3076_s11 }
 0x398   :  { %1605 = vrot.lane.b32.xlu0 %v4413_v20, %s3076_s11 }
 0x39a   :  { %1603 = vrot.lane.b32.xlu1 %v4415_v54, %s3076_s11 }
 0x39c   :  { %1613 = vrot.lane.b32.xlu0 %v4422_v0, %s3076_s11 }
 0x39e   :  { %1611 = vrot.lane.b32.xlu1 %v4427_v46, %s3076_s11 }
 0x3a0   :  { %1621 = vrot.lane.b32.xlu0 %v4432_v49, %s3076_s11 }
 0x3a2   :  { %1619 = vrot.lane.b32.xlu1 %v4436_v14, %s3076_s11 }
 0x3a4   :  { %1665 = vrot.lane.b32.xlu0 %v4343_v53, %s3077_s12 }
 0x3a6   :  { %1663 = vrot.lane.b32.xlu1 %v4347_v50, %s3077_s12 }
 0x3a8   :  { %1673 = vrot.lane.b32.xlu0 %v4359_v11, %s3077_s12 }
 0x3aa   :  { %1671 = vrot.lane.b32.xlu1 %v4361_v35, %s3077_s12 }
 0x3ac   :  { %1681 = vrot.lane.b32.xlu0 %v4376_v27, %s3077_s12 }
 0x3ae   :  { %1679 = vrot.lane.b32.xlu1 %v4378_v22, %s3077_s12 }
 0x3b0   :  { %1689 = vrot.lane.b32.xlu0 %v4391_v28, %s3077_s12 }
 0x3b2   :  { %1687 = vrot.lane.b32.xlu1 %v4394_v16, %s3077_s12 }
 0x3b4   :  { %1669 = vrot.lane.b32.xlu0 %v4403_v38, %s3077_s12 }
 0x3b6   :  { %1667 = vrot.lane.b32.xlu1 %v4405_v47, %s3077_s12 }
 0x3b8   :  { %1677 = vrot.lane.b32.xlu0 %v4413_v20, %s3077_s12 }
 0x3ba   :  { %1675 = vrot.lane.b32.xlu1 %v4415_v54, %s3077_s12 }
 0x3bc   :  { %1685 = vrot.lane.b32.xlu0 %v4422_v0, %s3077_s12 }
 0x3be   :  { %1683 = vrot.lane.b32.xlu1 %v4427_v46, %s3077_s12 }
 0x3c0   :  { %1693 = vrot.lane.b32.xlu0 %v4432_v49, %s3077_s12 }
 0x3c2   :  { %1691 = vrot.lane.b32.xlu1 %v4436_v14, %s3077_s12 }
 0x3c4   :  { %1737 = vrot.lane.b32.xlu0 %v4343_v53, %s3078_s13 }
 0x3c6   :  { %1735 = vrot.lane.b32.xlu1 %v4347_v50, %s3078_s13 }
 0x3c8   :  { %1745 = vrot.lane.b32.xlu0 %v4359_v11, %s3078_s13 }
 0x3ca   :  { %1743 = vrot.lane.b32.xlu1 %v4361_v35, %s3078_s13 }
 0x3cc   :  { %1753 = vrot.lane.b32.xlu0 %v4376_v27, %s3078_s13 }
 0x3ce   :  { %1751 = vrot.lane.b32.xlu1 %v4378_v22, %s3078_s13 }
 0x3d0   :  { %1761 = vrot.lane.b32.xlu0 %v4391_v28, %s3078_s13 }
 0x3d2   :  { %1759 = vrot.lane.b32.xlu1 %v4394_v16, %s3078_s13 }
 0x3d4   :  { %v1522_v41 = vpop.permute.xlu0 %1521  ;;  %1741 = vrot.lane.b32.xlu0 %v4403_v38, %s3078_s13 }
 0x3d5   :  { %v1520_v9 = vpop.permute.xlu1 %1519 }
 0x3d6   :  { %1739 = vrot.lane.b32.xlu1 %v4405_v47, %s3078_s13 }
 0x3d8   :  { %v1530_v8 = vpop.permute.xlu0 %1529  ;;  %1749 = vrot.lane.b32.xlu0 %v4413_v20, %s3078_s13 }
 0x3d9   :  { %v1560_v1 = vsel %vm142_vm0, %v1522_v41, %v1530_v8  ;;  %v1528_v57 = vpop.permute.xlu1 %1527 }
 0x3da   :  { %v1572_v56 = vmul.f32 %v1560_v1, %v3372_v23  ;;  %v1559_v24 = vsel %vm142_vm0, %v1520_v9, %v1528_v57  ;;  %1747 = vrot.lane.b32.xlu1 %v4415_v54, %s3078_s13 }
 0x3db   :  { %v1568_v6 = vmul.f32 %v1559_v24, %v3372_v23 }
 0x3dc   :  { %v1538_v59 = vpop.permute.xlu0 %1537  ;;  %1757 = vrot.lane.b32.xlu0 %v4422_v0, %s3078_s13 }
 0x3dd   :  { %v1536_v19 = vpop.permute.xlu1 %1535  ;;  %v1584_v10 = vpack.c.bf16 %v1572_v56, %v1568_v6  ;;  %v1556_v43 = vsel %vm142_vm0, %v1530_v8, %v1538_v59 }
 0x3de   :  { %v1555_v58 = vsel %vm142_vm0, %v1528_v57, %v1536_v19  ;;  %1755 = vrot.lane.b32.xlu1 %v4427_v46, %s3078_s13  ;;  %v1573_v33 = vmul.f32 %v1556_v43, %v3391_v36 }
 0x3df   :  { %2159 = vmatprep.subr.bf16.mxu0 %v1584_v10  ;;  %v1569_v26 = vmul.f32 %v1555_v58, %v3391_v36 }
 0x3e0   :  { %v1546_v17 = vpop.permute.xlu0 %1545  ;;  %1765 = vrot.lane.b32.xlu0 %v4432_v49, %s3078_s13 }
 0x3e1   :  { %v1552_v12 = vsel %vm142_vm0, %v1538_v59, %v1546_v17  ;;  %v1564_v5 = vsel %vm142_vm0, %v1546_v17, %v1522_v41  ;;  %v1544_v37 = vpop.permute.xlu1 %1543  ;;  %v1585_v15 = vpack.c.bf16 %v1573_v33, %v1569_v26 }
 0x3e2   :  { %v1571_v2 = vmul.f32 %v1564_v5, %v3402_v39  ;;  %v1574_v29 = vmul.f32 %v1552_v12, %v3405_v40  ;;  %v1551_v51 = vsel %vm142_vm0, %v1536_v19, %v1544_v37  ;;  %v1563_v31 = vsel %vm142_vm0, %v1544_v37, %v1520_v9  ;;  %1763 = vrot.lane.b32.xlu1 %v4436_v14, %s3078_s13 }
 0x3e3   :  { %v1567_v13 = vmul.f32 %v1563_v31, %v3402_v39  ;;  %v1570_v3 = vmul.f32 %v1551_v51, %v3405_v40 }
 0x3e4   :  { %v1526_v45 = vpop.permute.xlu0 %1525  ;;  %1817 = vrot.lane.b32.xlu0 %v4343_v53, %s3079_s15 }
 0x3e5   :  { %v1583_v32 = vpack.c.bf16 %v1571_v2, %v1567_v13  ;;  %v1524_v34 = vpop.permute.xlu1 %1523  ;;  %v1586_v52 = vpack.c.bf16 %v1574_v29, %v1570_v3 }
 0x3e6   :  { %1815 = vrot.lane.b32.xlu1 %v4347_v50, %s3079_s15 }
 0x3e7   :  { %2160 = vmatpush1.bf16.msra.mxu0 %v1583_v32  ;;  %2265 = vmatprep.subr.bf16.mxu1 %v1586_v52 }
 0x3e8   :  { %2266 = vmatpush1.bf16.msra.mxu1 %v1585_v15  ;;  %v1534_v4 = vpop.permute.xlu0 %1533  ;;  %1825 = vrot.lane.b32.xlu0 %v4359_v11, %s3079_s15 }
 0x3e9   :  { %v1562_v7 = vsel %vm142_vm0, %v1526_v45, %v1534_v4  ;;  %v1532_v60 = vpop.permute.xlu1 %1531 }
 0x3ea   :  { %v1580_v25 = vmul.f32 %v1562_v7, %v3372_v23  ;;  %v1561_v42 = vsel %vm142_vm0, %v1524_v34, %v1532_v60  ;;  %1823 = vrot.lane.b32.xlu1 %v4361_v35, %s3079_s15 }
 0x3eb   :  { %v1576_v44 = vmul.f32 %v1561_v42, %v3372_v23 }
 0x3ec   :  { %1833 = vrot.lane.b32.xlu0 %v4376_v27, %s3079_s15  ;;  %v1542_v21 = vpop.permute.xlu0 %1541 }
 0x3ed   :  { %v1588_v63 = vpack.c.bf16 %v1580_v25, %v1576_v44  ;;  %v1558_v1 = vsel %vm142_vm0, %v1534_v4, %v1542_v21 }
 0x3ee   :  { %1831 = vrot.lane.b32.xlu1 %v4378_v22, %s3079_s15  ;;  %v1581_v43 = vmul.f32 %v1558_v1, %v3391_v36 }
 0x3ef   :  { %2161 = vmatprep.subr.bf16.mxu0 %v1588_v63  ;;  %v1540_v41 = vpop.permute.xlu1 %1539 }
 0x3f0   :  { %1841 = vrot.lane.b32.xlu0 %v4391_v28, %s3079_s15  ;;  %v1557_v57 = vsel %vm142_vm0, %v1532_v60, %v1540_v41 }
 0x3f1   :  { %v1577_v58 = vmul.f32 %v1557_v57, %v3391_v36 }
 0x3f2   :  { %v1550_v9 = vpop.permute.xlu0 %1549  ;;  %1839 = vrot.lane.b32.xlu1 %v4394_v16, %s3079_s15 }
 0x3f3   :  { %v1554_v23 = vsel %vm142_vm0, %v1542_v21, %v1550_v9  ;;  %v1566_v8 = vsel %vm142_vm0, %v1550_v9, %v1526_v45  ;;  %v1589_v2 = vpack.c.bf16 %v1581_v43, %v1577_v58 }
 0x3f4   :  { %1821 = vrot.lane.b32.xlu0 %v4403_v38, %s3079_s15  ;;  %v1579_v56 = vmul.f32 %v1566_v8, %v3402_v39  ;;  %v1582_v24 = vmul.f32 %v1554_v23, %v3405_v40  ;;  %v1548_v6 = vpop.permute.xlu1 %1547 }
 0x3f5   :  { %v1553_v59 = vsel %vm142_vm0, %v1540_v41, %v1548_v6  ;;  %v1565_v19 = vsel %vm142_vm0, %v1548_v6, %v1524_v34 }
 0x3f6   :  { %v1594_v10 = vpop.permute.xlu0 %1593  ;;  %v1575_v17 = vmul.f32 %v1565_v19, %v3402_v39  ;;  %v1578_v33 = vmul.f32 %v1553_v59, %v3405_v40  ;;  %1819 = vrot.lane.b32.xlu1 %v4405_v47, %s3079_s15 }
 0x3f8   :  { %1829 = vrot.lane.b32.xlu0 %v4413_v20, %s3079_s15  ;;  %v1587_v26 = vpack.c.bf16 %v1579_v56, %v1575_v17  ;;  %v1592_v12 = vpop.permute.xlu1 %1591  ;;  %v1590_v5 = vpack.c.bf16 %v1582_v24, %v1578_v33 }
 0x3fa   :  { %v1602_v37 = vpop.permute.xlu0 %1601  ;;  %1827 = vrot.lane.b32.xlu1 %v4415_v54, %s3079_s15  ;;  %2162 = vmatpush1.bf16.msra.mxu0 %v1587_v26 }
 0x3fb   :  { %v1632_v36 = vsel %vm236_vm1, %v1594_v10, %v1602_v37  ;;  %2267 = vmatprep.subr.bf16.mxu1 %v1590_v5 }
 0x3fc   :  { %1837 = vrot.lane.b32.xlu0 %v4422_v0, %s3079_s15  ;;  %2268 = vmatpush1.bf16.msra.mxu1 %v1589_v2  ;;  %v1644_v39 = vmul.f32 %v1632_v36, %v3469_v48  ;;  %v1600_v40 = vpop.permute.xlu1 %1599 }
 0x3fd   :  { %v1631_v29 = vsel %vm236_vm1, %v1592_v12, %v1600_v40 }
 0x3fe   :  { %v1610_v51 = vpop.permute.xlu0 %1609  ;;  %v1640_v31 = vmul.f32 %v1631_v29, %v3469_v48  ;;  %1835 = vrot.lane.b32.xlu1 %v4427_v46, %s3079_s15 }
 0x3ff   :  { %v1628_v52 = vsel %vm236_vm1, %v1602_v37, %v1610_v51 }
 0x400   :  { %1845 = vrot.lane.b32.xlu0 %v4432_v49, %s3079_s15  ;;  %v1608_v13 = vpop.permute.xlu1 %1607  ;;  %v1656_v3 = vpack.c.bf16 %v1644_v39, %v1640_v31  ;;  %v1645_v21 = vmul.f32 %v1628_v52, %v3484_v55 }
 0x401   :  { %v1627_v15 = vsel %vm236_vm1, %v1600_v40, %v1608_v13 }
 0x402   :  { %v1618_v45 = vpop.permute.xlu0 %1617  ;;  %1843 = vrot.lane.b32.xlu1 %v4436_v14, %s3079_s15  ;;  %2163 = vmatprep.subr.bf16.mxu0 %v1656_v3  ;;  %v1641_v63 = vmul.f32 %v1627_v15, %v3484_v55 }
 0x403   :  { %v1624_v32 = vsel %vm236_vm1, %v1610_v51, %v1618_v45  ;;  %v1636_v34 = vsel %vm236_vm1, %v1618_v45, %v1594_v10 }
 0x404   :  { %1889 = vrot.lane.b32.xlu0 %v4343_v53, %s3080_s16  ;;  %v1643_v4 = vmul.f32 %v1636_v34, %v3493_v61  ;;  %v1646_v7 = vmul.f32 %v1624_v32, %v3496_v62  ;;  %v1616_v60 = vpop.permute.xlu1 %1615  ;;  %v1657_v56 = vpack.c.bf16 %v1645_v21, %v1641_v63 }
 0x405   :  { %v1623_v25 = vsel %vm236_vm1, %v1608_v13, %v1616_v60  ;;  %v1635_v42 = vsel %vm236_vm1, %v1616_v60, %v1592_v12 }
 0x406   :  { %v1598_v44 = vpop.permute.xlu0 %1597  ;;  %v1639_v41 = vmul.f32 %v1635_v42, %v3493_v61  ;;  %v1642_v9 = vmul.f32 %v1623_v25, %v3496_v62  ;;  %1887 = vrot.lane.b32.xlu1 %v4347_v50, %s3080_s16 }
 0x408   :  { %1897 = vrot.lane.b32.xlu0 %v4359_v11, %s3080_s16  ;;  %v1655_v23 = vpack.c.bf16 %v1643_v4, %v1639_v41  ;;  %v1596_v8 = vpop.permute.xlu1 %1595  ;;  %v1658_v1 = vpack.c.bf16 %v1646_v7, %v1642_v9 }
 0x40a   :  { %v1606_v57 = vpop.permute.xlu0 %1605  ;;  %1895 = vrot.lane.b32.xlu1 %v4361_v35, %s3080_s16  ;;  %2164 = vmatpush1.bf16.msra.mxu0 %v1655_v23  ;;  %v5546_v23 = vld [vmem:[#allocation12_spill] sm:$0xff] }
 0x40b   :  { %v1634_v24 = vsel %vm236_vm1, %v1598_v44, %v1606_v57  ;;  %2269 = vmatprep.subr.bf16.mxu1 %v1658_v1  ;;  %v5547_v1 = vld [vmem:[#allocation13_spill] sm:$0xff] }
 0x40c   :  { %1905 = vrot.lane.b32.xlu0 %v4376_v27, %s3080_s16  ;;  %2270 = vmatpush1.bf16.msra.mxu1 %v1657_v56  ;;  %v1652_v6 = vmul.f32 %v1634_v24, %v3469_v48  ;;  %v1604_v59 = vpop.permute.xlu1 %1603 }
 0x40d   :  { %v1633_v19 = vsel %vm236_vm1, %v1596_v8, %v1604_v59 }
 0x40e   :  { %v1614_v10 = vpop.permute.xlu0 %1613  ;;  %v1648_v43 = vmul.f32 %v1633_v19, %v3469_v48  ;;  %1903 = vrot.lane.b32.xlu1 %v4378_v22, %s3080_s16  ;;  %v5548_v19 = vld [vmem:[#allocation11_spill] sm:$0xff] }
 0x40f   :  { %v1630_v48 = vsel %vm236_vm1, %v1606_v57, %v1614_v10 }
 0x410   :  { %1913 = vrot.lane.b32.xlu0 %v4391_v28, %s3080_s16  ;;  %v1612_v58 = vpop.permute.xlu1 %1611  ;;  %v1660_v17 = vpack.c.bf16 %v1652_v6, %v1648_v43  ;;  %v1653_v51 = vmul.f32 %v1630_v48, %v3484_v55 }
 0x411   :  { %v1629_v5 = vsel %vm236_vm1, %v1604_v59, %v1612_v58 }
 0x412   :  { %v1622_v33 = vpop.permute.xlu0 %1621  ;;  %1911 = vrot.lane.b32.xlu1 %v4394_v16, %s3080_s16  ;;  %2165 = vmatprep.subr.bf16.mxu0 %v1660_v17  ;;  %v1649_v31 = vmul.f32 %v1629_v5, %v3484_v55 }
 0x413   :  { %v1626_v26 = vsel %vm236_vm1, %v1614_v10, %v1622_v33  ;;  %v1638_v12 = vsel %vm236_vm1, %v1622_v33, %v1598_v44 }
 0x414   :  { %1893 = vrot.lane.b32.xlu0 %v4403_v38, %s3080_s16  ;;  %v1651_v37 = vmul.f32 %v1638_v12, %v3493_v61  ;;  %v1654_v2 = vmul.f32 %v1626_v26, %v3496_v62  ;;  %v1620_v36 = vpop.permute.xlu1 %1619  ;;  %v1661_v15 = vpack.c.bf16 %v1653_v51, %v1649_v31 }
 0x415   :  { %v1625_v39 = vsel %vm236_vm1, %v1612_v58, %v1620_v36  ;;  %v1637_v40 = vsel %vm236_vm1, %v1620_v36, %v1596_v8 }
 0x416   :  { %v1666_v29 = vpop.permute.xlu0 %1665  ;;  %v1647_v13 = vmul.f32 %v1637_v40, %v3493_v61  ;;  %v1650_v3 = vmul.f32 %v1625_v39, %v3496_v62  ;;  %1891 = vrot.lane.b32.xlu1 %v4405_v47, %s3080_s16 }
 0x418   :  { %1901 = vrot.lane.b32.xlu0 %v4413_v20, %s3080_s16  ;;  %v1659_v45 = vpack.c.bf16 %v1651_v37, %v1647_v13  ;;  %v1664_v32 = vpop.permute.xlu1 %1663  ;;  %v1662_v34 = vpack.c.bf16 %v1654_v2, %v1650_v3 }
 0x41a   :  { %v1674_v52 = vpop.permute.xlu0 %1673  ;;  %1899 = vrot.lane.b32.xlu1 %v4415_v54, %s3080_s16  ;;  %2166 = vmatpush1.bf16.msra.mxu0 %v1659_v45 }
 0x41b   :  { %v1704_v55 = vsel %vm330_vm2, %v1666_v29, %v1674_v52  ;;  %2271 = vmatprep.subr.bf16.mxu1 %v1662_v34 }
 0x41c   :  { %1909 = vrot.lane.b32.xlu0 %v4422_v0, %s3080_s16  ;;  %2272 = vmatpush1.bf16.msra.mxu1 %v1661_v15  ;;  %v1716_v61 = vmul.f32 %v1704_v55, %v3562_v30  ;;  %v1672_v62 = vpop.permute.xlu1 %1671 }
 0x41d   :  { %v1703_v4 = vsel %vm330_vm2, %v1664_v32, %v1672_v62 }
 0x41e   :  { %v1682_v7 = vpop.permute.xlu0 %1681  ;;  %v1712_v60 = vmul.f32 %v1703_v4, %v3562_v30  ;;  %1907 = vrot.lane.b32.xlu1 %v4427_v46, %s3080_s16 }
 0x41f   :  { %v1700_v41 = vsel %vm330_vm2, %v1674_v52, %v1682_v7 }
 0x420   :  { %1917 = vrot.lane.b32.xlu0 %v4432_v49, %s3080_s16  ;;  %v1680_v25 = vpop.permute.xlu1 %1679  ;;  %v1728_v42 = vpack.c.bf16 %v1716_v61, %v1712_v60  ;;  %v1717_v10 = vmul.f32 %v1700_v41, %v5548_v19 }
 0x421   :  { %v1699_v9 = vsel %vm330_vm2, %v1672_v62, %v1680_v25 }
 0x422   :  { %v1690_v44 = vpop.permute.xlu0 %1689  ;;  %1915 = vrot.lane.b32.xlu1 %v4436_v14, %s3080_s16  ;;  %2167 = vmatprep.subr.bf16.mxu0 %v1728_v42  ;;  %v1713_v43 = vmul.f32 %v1699_v9, %v5548_v19 }
 0x423   :  { %v1696_v21 = vsel %vm330_vm2, %v1682_v7, %v1690_v44  ;;  %v1708_v63 = vsel %vm330_vm2, %v1690_v44, %v1666_v29 }
 0x424   :  { %1961 = vrot.lane.b32.xlu0 %v4343_v53, %s3081_s17  ;;  %v1715_v8 = vmul.f32 %v1708_v63, %v5546_v23  ;;  %v1718_v57 = vmul.f32 %v1696_v21, %v5547_v1  ;;  %v1688_v56 = vpop.permute.xlu1 %1687  ;;  %v1729_v5 = vpack.c.bf16 %v1717_v10, %v1713_v43 }
 0x425   :  { %v1695_v24 = vsel %vm330_vm2, %v1680_v25, %v1688_v56  ;;  %v1707_v6 = vsel %vm330_vm2, %v1688_v56, %v1664_v32 }
 0x426   :  { %v1670_v59 = vpop.permute.xlu0 %1669  ;;  %v1711_v58 = vmul.f32 %v1707_v6, %v5546_v23  ;;  %v1714_v17 = vmul.f32 %v1695_v24, %v5547_v1  ;;  %1959 = vrot.lane.b32.xlu1 %v4347_v50, %s3081_s17 }
 0x428   :  { %1969 = vrot.lane.b32.xlu0 %v4359_v11, %s3081_s17  ;;  %v1727_v33 = vpack.c.bf16 %v1715_v8, %v1711_v58  ;;  %v1668_v26 = vpop.permute.xlu1 %1667  ;;  %v1730_v12 = vpack.c.bf16 %v1718_v57, %v1714_v17 }
 0x42a   :  { %v1678_v48 = vpop.permute.xlu0 %1677  ;;  %1967 = vrot.lane.b32.xlu1 %v4361_v35, %s3081_s17  ;;  %2168 = vmatpush1.bf16.msra.mxu0 %v1727_v33  ;;  %v5550_v33 = vld [vmem:[#allocation16_spill] sm:$0xff] }
 0x42b   :  { %v1706_v37 = vsel %vm330_vm2, %v1670_v59, %v1678_v48  ;;  %2273 = vmatprep.subr.bf16.mxu1 %v1730_v12  ;;  %v5551_v12 = vld [vmem:[#allocation17_spill] sm:$0xff] }
 0x42c   :  { %1977 = vrot.lane.b32.xlu0 %v4376_v27, %s3081_s17  ;;  %2274 = vmatpush1.bf16.msra.mxu1 %v1729_v5  ;;  %v1724_v2 = vmul.f32 %v1706_v37, %v3562_v30  ;;  %v1676_v36 = vpop.permute.xlu1 %1675 }
 0x42d   :  { %v1705_v39 = vsel %vm330_vm2, %v1668_v26, %v1676_v36 }
 0x42e   :  { %v1686_v40 = vpop.permute.xlu0 %1685  ;;  %v1720_v29 = vmul.f32 %v1705_v39, %v3562_v30  ;;  %1975 = vrot.lane.b32.xlu1 %v4378_v22, %s3081_s17  ;;  %v5552_v39 = vld [vmem:[#allocation15_spill] sm:$0xff] }
 0x42f   :  { %v1702_v30 = vsel %vm330_vm2, %v1678_v48, %v1686_v40 }
 0x430   :  { %1985 = vrot.lane.b32.xlu0 %v4391_v28, %s3081_s17  ;;  %v1684_v51 = vpop.permute.xlu1 %1683  ;;  %v1732_v31 = vpack.c.bf16 %v1724_v2, %v1720_v29  ;;  %v1725_v4 = vmul.f32 %v1702_v30, %v5548_v19  ;;  %v2903_v30 = vld [vmem:[#allocation5 + $0x4] ss:$12 sps:$4 sm:$0xff]  }
 0x431   :  { %v1701_v32 = vsel %vm330_vm2, %v1676_v36, %v1684_v51  ;;  %2191 = vmatprep.mubr.bf16.mxu0 %v2903_v30  ;;  %2297 = vmatprep.mubr.bf16.mxu1 %v2903_v30 }
 0x432   :  { %v1694_v13 = vpop.permute.xlu0 %1693  ;;  %1983 = vrot.lane.b32.xlu1 %v4394_v16, %s3081_s17  ;;  %2169 = vmatprep.subr.bf16.mxu0 %v1732_v31  ;;  %v1721_v7 = vmul.f32 %v1701_v32, %v5548_v19 }
 0x433   :  { %v1698_v3 = vsel %vm330_vm2, %v1686_v40, %v1694_v13  ;;  %v1710_v45 = vsel %vm330_vm2, %v1694_v13, %v1670_v59 }
 0x434   :  { %1965 = vrot.lane.b32.xlu0 %v4403_v38, %s3081_s17  ;;  %v1723_v34 = vmul.f32 %v1710_v45, %v5546_v23  ;;  %v1726_v52 = vmul.f32 %v1698_v3, %v5547_v1  ;;  %v1692_v15 = vpop.permute.xlu1 %1691  ;;  %v1733_v41 = vpack.c.bf16 %v1725_v4, %v1721_v7 }
 0x435   :  { %v1697_v55 = vsel %vm330_vm2, %v1684_v51, %v1692_v15  ;;  %v1709_v61 = vsel %vm330_vm2, %v1692_v15, %v1668_v26 }
 0x436   :  { %v1738_v62 = vpop.permute.xlu0 %1737  ;;  %v1719_v60 = vmul.f32 %v1709_v61, %v5546_v23  ;;  %v1722_v25 = vmul.f32 %v1697_v55, %v5547_v1  ;;  %1963 = vrot.lane.b32.xlu1 %v4405_v47, %s3081_s17  ;;  %v5549_v23 = vld [vmem:[#allocation14_spill] sm:$0xff] }
 0x438   :  { %1973 = vrot.lane.b32.xlu0 %v4413_v20, %s3081_s17  ;;  %v1731_v42 = vpack.c.bf16 %v1723_v34, %v1719_v60  ;;  %v1736_v44 = vpop.permute.xlu1 %1735  ;;  %v1734_v21 = vpack.c.bf16 %v1726_v52, %v1722_v25 }
 0x43a   :  { %v1746_v63 = vpop.permute.xlu0 %1745  ;;  %1971 = vrot.lane.b32.xlu1 %v4415_v54, %s3081_s17  ;;  %2170 = vmatpush1.bf16.msra.mxu0 %v1731_v42 }
 0x43b   :  { %v1776_v9 = vsel %vm424_vm3, %v1738_v62, %v1746_v63  ;;  %2275 = vmatprep.subr.bf16.mxu1 %v1734_v21 }
 0x43c   :  { %1981 = vrot.lane.b32.xlu0 %v4422_v0, %s3081_s17  ;;  %2276 = vmatpush1.bf16.msra.mxu1 %v1733_v41  ;;  %v1788_v8 = vmul.f32 %v1776_v9, %v5549_v23  ;;  %v1744_v1 = vpop.permute.xlu1 %1743 }
 0x43d   :  { %v1775_v57 = vsel %vm424_vm3, %v1736_v44, %v1744_v1 }
 0x43e   :  { %v1754_v56 = vpop.permute.xlu0 %1753  ;;  %v1784_v24 = vmul.f32 %v1775_v57, %v5549_v23  ;;  %1979 = vrot.lane.b32.xlu1 %v4427_v46, %s3081_s17 }
 0x43f   :  { %v1772_v58 = vsel %vm424_vm3, %v1746_v63, %v1754_v56 }
 0x440   :  { %1989 = vrot.lane.b32.xlu0 %v4432_v49, %s3081_s17  ;;  %v1752_v6 = vpop.permute.xlu1 %1751  ;;  %v1800_v59 = vpack.c.bf16 %v1788_v8, %v1784_v24  ;;  %v1789_v40 = vmul.f32 %v1772_v58, %v5552_v39  ;;  %v1808_v58 = vpack.c.bf16 %v4359_v11, %v4361_v35 }
 0x441   :  { %v1771_v17 = vsel %vm424_vm3, %v1744_v1, %v1752_v6 }
 0x442   :  { %v1762_v19 = vpop.permute.xlu0 %1761  ;;  %1987 = vrot.lane.b32.xlu1 %v4436_v14, %s3081_s17  ;;  %2171 = vmatprep.subr.bf16.mxu0 %v1800_v59  ;;  %v1785_v29 = vmul.f32 %v1771_v17, %v5552_v39 }
 0x443   :  { %v1768_v10 = vsel %vm424_vm3, %v1754_v56, %v1762_v19  ;;  %v1780_v43 = vsel %vm424_vm3, %v1762_v19, %v1738_v62 }
 0x444   :  { %2033 = vrot.lane.b32.xlu0 %v4343_v53, %s3082_s18  ;;  %v1787_v26 = vmul.f32 %v1780_v43, %v5550_v33  ;;  %v1790_v48 = vmul.f32 %v1768_v10, %v5551_v12  ;;  %v1760_v5 = vpop.permute.xlu1 %1759  ;;  %v1801_v34 = vpack.c.bf16 %v1789_v40, %v1785_v29  ;;  %v1813_v40 = vpack.c.bf16 %v4422_v0, %v4427_v46 }
 0x445   :  { %v1767_v37 = vsel %vm424_vm3, %v1752_v6, %v1760_v5  ;;  %v1779_v2 = vsel %vm424_vm3, %v1760_v5, %v1736_v44 }
 0x446   :  { %v1742_v36 = vpop.permute.xlu0 %1741  ;;  %v1783_v51 = vmul.f32 %v1779_v2, %v5550_v33  ;;  %v1786_v31 = vmul.f32 %v1767_v37, %v5551_v12  ;;  %2031 = vrot.lane.b32.xlu1 %v4347_v50, %s3082_s18 }
 0x448   :  { %2041 = vrot.lane.b32.xlu0 %v4359_v11, %s3082_s18  ;;  %v1799_v13 = vpack.c.bf16 %v1787_v26, %v1783_v51  ;;  %v1740_v3 = vpop.permute.xlu1 %1739  ;;  %v1802_v45 = vpack.c.bf16 %v1790_v48, %v1786_v31  ;;  %v1807_v48 = vpack.c.bf16 %v4343_v53, %v4347_v50  ;;  %v1812_v11 = vpack.c.bf16 %v4413_v20, %v4415_v54  ;;  %v1516_v51 = vld [vmem:[%s5471_s7 + $0x8] sm:$0xff] }
 0x449   :  { %v1814_v50 = vpack.c.bf16 %v4432_v49, %v4436_v14 }
 0x44a   :  { %v1750_v32 = vpop.permute.xlu0 %1749  ;;  %2039 = vrot.lane.b32.xlu1 %v4361_v35, %s3082_s18  ;;  %2172 = vmatpush1.bf16.msra.mxu0 %v1799_v13  ;;  %v1809_v35 = vpack.c.bf16 %v4376_v27, %v4378_v22  ;;  %v5556_v13 = vld [vmem:[#allocation21_spill] sm:$0xff] }
 0x44b   :  { %v1778_v52 = vsel %vm424_vm3, %v1742_v36, %v1750_v32  ;;  %2277 = vmatprep.subr.bf16.mxu1 %v1802_v45 }
 0x44c   :  { %2049 = vrot.lane.b32.xlu0 %v4376_v27, %s3082_s18  ;;  %2278 = vmatpush1.bf16.msra.mxu1 %v1801_v34  ;;  %v1796_v15 = vmul.f32 %v1778_v52, %v5549_v23  ;;  %v1748_v55 = vpop.permute.xlu1 %1747  ;;  %v5553_v27 = vld [vmem:[#allocation19_spill] sm:$0xff] }
 0x44d   :  { %v1777_v61 = vsel %vm424_vm3, %v1740_v3, %v1748_v55 }
 0x44e   :  { %v1758_v62 = vpop.permute.xlu0 %1757  ;;  %v1792_v4 = vmul.f32 %v1777_v61, %v5549_v23  ;;  %2047 = vrot.lane.b32.xlu1 %v4378_v22, %s3082_s18 }
 0x44f   :  { %v1774_v21 = vsel %vm424_vm3, %v1750_v32, %v1758_v62 }
 0x450   :  { %2057 = vrot.lane.b32.xlu0 %v4391_v28, %s3082_s18  ;;  %v1756_v7 = vpop.permute.xlu1 %1755  ;;  %v1804_v60 = vpack.c.bf16 %v1796_v15, %v1792_v4  ;;  %v1797_v56 = vmul.f32 %v1774_v21, %v5552_v39  ;;  %v1518_v15 = vld [vmem:[%s5471_s7 + $0x18] sm:$0xff] }
 0x451   :  { %v1773_v63 = vsel %vm424_vm3, %v1748_v55, %v1756_v7 }
 0x452   :  { %v1766_v25 = vpop.permute.xlu0 %1765  ;;  %2055 = vrot.lane.b32.xlu1 %v4394_v16, %s3082_s18  ;;  %2173 = vmatprep.subr.bf16.mxu0 %v1804_v60  ;;  %v1793_v24 = vmul.f32 %v1773_v63, %v5552_v39 }
 0x453   :  { %v1770_v42 = vsel %vm424_vm3, %v1758_v62, %v1766_v25  ;;  %v1782_v44 = vsel %vm424_vm3, %v1766_v25, %v1742_v36  ;;  %v1517_v62 = vld [vmem:[%s5471_s7 + $0x10] sm:$0xff] }
 0x454   :  { %2037 = vrot.lane.b32.xlu0 %v4403_v38, %s3082_s18  ;;  %v1795_v41 = vmul.f32 %v1782_v44, %v5550_v33  ;;  %v1798_v9 = vmul.f32 %v1770_v42, %v5551_v12  ;;  %v1764_v23 = vpop.permute.xlu1 %1763  ;;  %v1805_v26 = vpack.c.bf16 %v1797_v56, %v1793_v24 }
 0x455   :  { %v1769_v8 = vsel %vm424_vm3, %v1756_v7, %v1764_v23  ;;  %v1781_v1 = vsel %vm424_vm3, %v1764_v23, %v1740_v3 }
 0x456   :  { %v1818_v57 = vpop.permute.xlu0 %1817  ;;  %v1791_v6 = vmul.f32 %v1781_v1, %v5550_v33  ;;  %v1794_v59 = vmul.f32 %v1769_v8, %v5551_v12  ;;  %2035 = vrot.lane.b32.xlu1 %v4405_v47, %s3082_s18  ;;  %v1810_v33 = vpack.c.bf16 %v4391_v28, %v4394_v16 }
 0x458   :  { %2045 = vrot.lane.b32.xlu0 %v4413_v20, %s3082_s18  ;;  %v1803_v19 = vpack.c.bf16 %v1795_v41, %v1791_v6  ;;  %v1816_v10 = vpop.permute.xlu1 %1815  ;;  %v1806_v43 = vpack.c.bf16 %v1798_v9, %v1794_v59  ;;  %v1811_v20 = vpack.c.bf16 %v4403_v38, %v4405_v47 }
 0x45a   :  { %v1826_v17 = vpop.permute.xlu0 %1825  ;;  %2043 = vrot.lane.b32.xlu1 %v4415_v54, %s3082_s18  ;;  %2174 = vmatpush1.bf16.msra.mxu0 %v1803_v19  ;;  %v5554_v54 = vld [vmem:[#allocation18_spill] sm:$0xff] }
 0x45b   :  { %2279 = vmatprep.subr.bf16.mxu1 %v1806_v43  ;;  %2175 = vmatprep.subr.bf16.mxu0 %v1808_v58  ;;  %v1856_v37 = vsel %vm526_vm4, %v1818_v57, %v1826_v17 }
 0x45c   :  { %2280 = vmatpush1.bf16.msra.mxu1 %v1805_v26  ;;  %v1824_v12 = vpop.permute.xlu1 %1823  ;;  %2053 = vrot.lane.b32.xlu0 %v4422_v0, %s3082_s18  ;;  %v1867_v2 = vmul.f32 %v1856_v37, %v5554_v54  ;;  %v1515_v0 = vld [vmem:[%s5471_s7] sm:$0xff] }
 0x45d   :  { %2281 = vmatprep.subr.bf16.mxu1 %v1810_v33  ;;  %v1855_v28 = vsel %vm526_vm4, %v1816_v10, %v1824_v12 }
 0x45e   :  { %v1834_v5 = vpop.permute.xlu0 %1833  ;;  %2051 = vrot.lane.b32.xlu1 %v4427_v46, %s3082_s18  ;;  %2176 = vmatpush1.bf16.msra.mxu0 %v1807_v48  ;;  %v1863_v36 = vmul.f32 %v1855_v28, %v5554_v54  ;;  %v5555_v46 = vld [vmem:[#allocation20_spill] sm:$0xff] }
 0x45f   :  { %v1852_v53 = vsel %vm526_vm4, %v1826_v17, %v1834_v5  ;;  %2177 = vmatprep.subr.bf16.mxu0 %v1812_v11 }
 0x460   :  { %2282 = vmatpush1.bf16.msra.mxu1 %v1809_v35  ;;  %v1868_v22 = vmul.f32 %v1852_v53, %v5553_v27  ;;  %v1832_v16 = vpop.permute.xlu1 %1831  ;;  %2061 = vrot.lane.b32.xlu0 %v4432_v49, %s3082_s18 }
 0x461   :  { %2283 = vmatprep.subr.bf16.mxu1 %v1814_v50  ;;  %v1851_v39 = vsel %vm526_vm4, %v1824_v12, %v1832_v16 }
 0x462   :  { %v1842_v29 = vpop.permute.xlu0 %1841  ;;  %v1864_v49 = vmul.f32 %v1851_v39, %v5553_v27  ;;  %2059 = vrot.lane.b32.xlu1 %v4436_v14, %s3082_s18  ;;  %2178 = vmatpush1.bf16.msra.mxu0 %v1811_v20  ;;  %v1879_v14 = vpack.c.bf16 %v1867_v2, %v1863_v36  ;;  %v5557_v20 = vld [vmem:[#allocation23_spill] sm:$0xff]  ;;  %v5558_v36 = vld [vmem:[#allocation22_spill] sm:$0xff] }
 0x463   :  { %v1848_v38 = vsel %vm526_vm4, %v1834_v5, %v1842_v29  ;;  %v1860_v47 = vsel %vm526_vm4, %v1842_v29, %v1818_v57 }
 0x464   :  { %2284 = vmatpush1.bf16.msra.mxu1 %v1813_v40  ;;  %v1869_v31 = vmul.f32 %v1848_v38, %v5555_v46  ;;  %v1870_v3 = vmul.f32 %v1860_v47, %v5556_v13  ;;  %v1840_v45 = vpop.permute.xlu1 %1839  ;;  %2110 = vperm.xlu0 %2891, %v1516_v51   ;;  %v1880_v30 = vpack.c.bf16 %v1868_v22, %v1864_v49 }
 0x465   :  { %v1847_v32 = vsel %vm526_vm4, %v1832_v16, %v1840_v45  ;;  %v1859_v34 = vsel %vm526_vm4, %v1840_v45, %v1816_v10 }
 0x466   :  { %v1822_v52 = vpop.permute.xlu0 %1821  ;;  %v1865_v55 = vmul.f32 %v1847_v32, %v5555_v46  ;;  %v1866_v61 = vmul.f32 %v1859_v34, %v5556_v13  ;;  %2105 = vperm.xlu1 %2892, %v1515_v0   ;;  %2179 = vmatprep.subr.bf16.mxu0 %v1880_v30  ;;  %v5559_v0 = vld [vmem:[#allocation24_spill] sm:$0xff] }
 0x467   :  { %2180 = vmatpush1.bf16.msra.mxu0 %v1879_v14 }
 0x468   :  { %v1881_v4 = vpack.c.bf16 %v1869_v31, %v1865_v55  ;;  %v1820_v7 = vpop.permute.xlu1 %1819  ;;  %2120 = vperm.xlu0 %2891, %v1518_v15   ;;  %v1882_v60 = vpack.c.bf16 %v1870_v3, %v1866_v61  ;;  %v5560_v31 = vld [vmem:[#allocation25_spill] sm:$0xff] }
 0x46a   :  { %v1830_v25 = vpop.permute.xlu0 %1829  ;;  %2115 = vperm.xlu1 %2892, %v1517_v62   ;;  %2285 = vmatprep.subr.bf16.mxu1 %v1882_v60 }
 0x46b   :  { %2286 = vmatpush1.bf16.msra.mxu1 %v1881_v4  ;;  %v1858_v21 = vsel %vm526_vm4, %v1822_v52, %v1830_v25 }
 0x46c   :  { %v1828_v42 = vpop.permute.xlu1 %1827  ;;  %v1875_v8 = vmul.f32 %v1858_v21, %v5554_v54 }
 0x46d   :  { %v1857_v63 = vsel %vm526_vm4, %v1820_v7, %v1828_v42 }
 0x46e   :  { %v1838_v44 = vpop.permute.xlu0 %1837  ;;  %v1871_v1 = vmul.f32 %v1857_v63, %v5554_v54 }
 0x46f   :  { %v1854_v41 = vsel %vm526_vm4, %v1830_v25, %v1838_v44 }
 0x470   :  { %v1876_v9 = vmul.f32 %v1854_v41, %v5553_v27  ;;  %v1836_v23 = vpop.permute.xlu1 %1835  ;;  %v1883_v17 = vpack.c.bf16 %v1875_v8, %v1871_v1 }
 0x471   :  { %v1853_v57 = vsel %vm526_vm4, %v1828_v42, %v1836_v23 }
 0x472   :  { %v1846_v56 = vpop.permute.xlu0 %1845  ;;  %v1872_v24 = vmul.f32 %v1853_v57, %v5553_v27 }
 0x473   :  { %v1850_v6 = vsel %vm526_vm4, %v1838_v44, %v1846_v56  ;;  %v1862_v59 = vsel %vm526_vm4, %v1846_v56, %v1822_v52 }
 0x474   :  { %v1877_v19 = vmul.f32 %v1850_v6, %v5555_v46  ;;  %v1878_v10 = vmul.f32 %v1862_v59, %v5556_v13  ;;  %v1844_v43 = vpop.permute.xlu1 %1843  ;;  %v1884_v58 = vpack.c.bf16 %v1876_v9, %v1872_v24 }
 0x475   :  { %v1849_v26 = vsel %vm526_vm4, %v1836_v23, %v1844_v43  ;;  %v1861_v33 = vsel %vm526_vm4, %v1844_v43, %v1820_v7 }
 0x476   :  { %v1890_v12 = vpop.permute.xlu0 %1889  ;;  %v1873_v48 = vmul.f32 %v1849_v26, %v5555_v46  ;;  %v1874_v11 = vmul.f32 %v1861_v33, %v5556_v13  ;;  %2181 = vmatprep.subr.bf16.mxu0 %v1884_v58 }
 0x477   :  { %2182 = vmatpush1.bf16.msra.mxu0 %v1883_v17 }
 0x478   :  { %v1885_v35 = vpack.c.bf16 %v1877_v19, %v1873_v48  ;;  %v1888_v5 = vpop.permute.xlu1 %1887  ;;  %v1886_v37 = vpack.c.bf16 %v1878_v10, %v1874_v11 }
 0x47a   :  { %v1898_v28 = vpop.permute.xlu0 %1897  ;;  %2287 = vmatprep.subr.bf16.mxu1 %v1886_v37 }
 0x47b   :  { %2288 = vmatpush1.bf16.msra.mxu1 %v1885_v35  ;;  %v1928_v27 = vsel %vm620_vm5, %v1890_v12, %v1898_v28 }
 0x47c   :  { %v1896_v53 = vpop.permute.xlu1 %1895  ;;  %v1939_v39 = vmul.f32 %v1928_v27, %v5558_v36  ;;  %v5561_v27 = vld [vmem:[#allocation27_spill] sm:$0xff] }
 0x47d   :  { %v1927_v22 = vsel %vm620_vm5, %v1888_v5, %v1896_v53 }
 0x47e   :  { %v1906_v50 = vpop.permute.xlu0 %1905  ;;  %v1935_v40 = vmul.f32 %v1927_v22, %v5558_v36 }
 0x47f   :  { %v1924_v16 = vsel %vm620_vm5, %v1898_v28, %v1906_v50 }
 0x480   :  { %v1940_v54 = vmul.f32 %v1924_v16, %v5557_v20  ;;  %v1904_v2 = vpop.permute.xlu1 %1903  ;;  %v1951_v30 = vpack.c.bf16 %v1939_v39, %v1935_v40 }
 0x481   :  { %v1923_v29 = vsel %vm620_vm5, %v1896_v53, %v1904_v2 }
 0x482   :  { %v1914_v51 = vpop.permute.xlu0 %1913  ;;  %v1936_v49 = vmul.f32 %v1923_v29, %v5557_v20 }
 0x483   :  { %v1920_v38 = vsel %vm620_vm5, %v1906_v50, %v1914_v51  ;;  %v1932_v47 = vsel %vm620_vm5, %v1914_v51, %v1890_v12 }
 0x484   :  { %v1941_v46 = vmul.f32 %v1920_v38, %v5559_v0  ;;  %v1942_v13 = vmul.f32 %v1932_v47, %v5560_v31  ;;  %v1912_v3 = vpop.permute.xlu1 %1911  ;;  %v1952_v45 = vpack.c.bf16 %v1940_v54, %v1936_v49  ;;  %v5563_v49 = vld [vmem:[#allocation28_spill] sm:$0xff]  ;;  %v5564_v47 = vld [vmem:[#allocation29_spill] sm:$0xff] }
 0x485   :  { %v1919_v14 = vsel %vm620_vm5, %v1904_v2, %v1912_v3  ;;  %v1931_v32 = vsel %vm620_vm5, %v1912_v3, %v1888_v5 }
 0x486   :  { %v1894_v34 = vpop.permute.xlu0 %1893  ;;  %v1937_v52 = vmul.f32 %v1919_v14, %v5559_v0  ;;  %v1938_v15 = vmul.f32 %v1931_v32, %v5560_v31  ;;  %2183 = vmatprep.subr.bf16.mxu0 %v1952_v45 }
 0x487   :  { %2184 = vmatpush1.bf16.msra.mxu0 %v1951_v30 }
 0x488   :  { %v1953_v55 = vpack.c.bf16 %v1941_v46, %v1937_v52  ;;  %v1892_v61 = vpop.permute.xlu1 %1891  ;;  %v1954_v62 = vpack.c.bf16 %v1942_v13, %v1938_v15 }
 0x48a   :  { %v1902_v4 = vpop.permute.xlu0 %1901  ;;  %2289 = vmatprep.subr.bf16.mxu1 %v1954_v62 }
 0x48b   :  { %2290 = vmatpush1.bf16.msra.mxu1 %v1953_v55  ;;  %v1930_v25 = vsel %vm620_vm5, %v1894_v34, %v1902_v4 }
 0x48c   :  { %v1900_v7 = vpop.permute.xlu1 %1899  ;;  %v1947_v41 = vmul.f32 %v1930_v25, %v5558_v36 }
 0x48d   :  { %v1929_v42 = vsel %vm620_vm5, %v1892_v61, %v1900_v7 }
 0x48e   :  { %v1910_v60 = vpop.permute.xlu0 %1909  ;;  %v1943_v9 = vmul.f32 %v1929_v42, %v5558_v36 }
 0x48f   :  { %v1926_v44 = vsel %vm620_vm5, %v1902_v4, %v1910_v60 }
 0x490   :  { %v1948_v21 = vmul.f32 %v1926_v44, %v5557_v20  ;;  %v1908_v63 = vpop.permute.xlu1 %1907  ;;  %v1955_v10 = vpack.c.bf16 %v1947_v41, %v1943_v9 }
 0x491   :  { %v1925_v23 = vsel %vm620_vm5, %v1900_v7, %v1908_v63 }
 0x492   :  { %v1918_v8 = vpop.permute.xlu0 %1917  ;;  %v1944_v1 = vmul.f32 %v1925_v23, %v5557_v20  ;;  %v5562_v20 = vld [vmem:[#allocation26_spill] sm:$0xff] }
 0x493   :  { %v1922_v57 = vsel %vm620_vm5, %v1910_v60, %v1918_v8  ;;  %v1934_v56 = vsel %vm620_vm5, %v1918_v8, %v1894_v34 }
 0x494   :  { %v1949_v24 = vmul.f32 %v1922_v57, %v5559_v0  ;;  %v1950_v6 = vmul.f32 %v1934_v56, %v5560_v31  ;;  %v1916_v59 = vpop.permute.xlu1 %1915  ;;  %v1956_v19 = vpack.c.bf16 %v1948_v21, %v1944_v1 }
 0x495   :  { %v1921_v43 = vsel %vm620_vm5, %v1908_v63, %v1916_v59  ;;  %v1933_v58 = vsel %vm620_vm5, %v1916_v59, %v1892_v61 }
 0x496   :  { %v1962_v17 = vpop.permute.xlu0 %1961  ;;  %v1945_v26 = vmul.f32 %v1921_v43, %v5559_v0  ;;  %v1946_v33 = vmul.f32 %v1933_v58, %v5560_v31  ;;  %2185 = vmatprep.subr.bf16.mxu0 %v1956_v19 }
 0x497   :  { %2186 = vmatpush1.bf16.msra.mxu0 %v1955_v10 }
 0x498   :  { %v1957_v12 = vpack.c.bf16 %v1949_v24, %v1945_v26  ;;  %v1960_v48 = vpop.permute.xlu1 %1959  ;;  %v1958_v11 = vpack.c.bf16 %v1950_v6, %v1946_v33  ;;  %v2904_v26 = vld [vmem:[#allocation5 + $0x1c] ss:$12 sps:$4 sm:$0xff]  }
 0x49a   :  { %v1970_v35 = vpop.permute.xlu0 %1969  ;;  %2291 = vmatprep.subr.bf16.mxu1 %v1958_v11 }
 0x49b   :  { %2292 = vmatpush1.bf16.msra.mxu1 %v1957_v12  ;;  %v2000_v28 = vsel %vm714_vm6, %v1962_v17, %v1970_v35 }
 0x49c   :  { %v1968_v5 = vpop.permute.xlu1 %1967  ;;  %v2011_v54 = vmul.f32 %v2000_v28, %v5562_v20 }
 0x49d   :  { %v1999_v53 = vsel %vm714_vm6, %v1960_v48, %v1968_v5 }
 0x49e   :  { %v1978_v37 = vpop.permute.xlu0 %1977  ;;  %v2007_v2 = vmul.f32 %v1999_v53, %v5562_v20 }
 0x49f   :  { %v1996_v50 = vsel %vm714_vm6, %v1970_v35, %v1978_v37 }
 0x4a0   :  { %v2012_v22 = vmul.f32 %v1996_v50, %v5561_v27  ;;  %v1976_v16 = vpop.permute.xlu1 %1975  ;;  %v2023_v13 = vpack.c.bf16 %v2011_v54, %v2007_v2  ;;  %v2906_v50 = vld [vmem:[#allocation5 + $0x18] ss:$12 sps:$4 sm:$0xff]  }
 0x4a1   :  { %v1995_v36 = vsel %vm714_vm6, %v1968_v5, %v1976_v16 }
 0x4a2   :  { %v1986_v39 = vpop.permute.xlu0 %1985  ;;  %v2008_v40 = vmul.f32 %v1995_v36, %v5561_v27 }
 0x4a3   :  { %v1992_v29 = vsel %vm714_vm6, %v1978_v37, %v1986_v39  ;;  %v2004_v51 = vsel %vm714_vm6, %v1986_v39, %v1962_v17  ;;  %v2901_v17 = vld [vmem:[#allocation5] ss:$12 sps:$4 sm:$0xff]  }
 0x4a4   :  { %v2013_v38 = vmul.f32 %v1992_v29, %v5563_v49  ;;  %v2014_v0 = vmul.f32 %v2004_v51, %v5564_v47  ;;  %v1984_v46 = vpop.permute.xlu1 %1983  ;;  %v2024_v31 = vpack.c.bf16 %v2012_v22, %v2008_v40 }
 0x4a5   :  { %v1991_v3 = vsel %vm714_vm6, %v1976_v16, %v1984_v46  ;;  %v2003_v45 = vsel %vm714_vm6, %v1984_v46, %v1960_v48 }
 0x4a6   :  { %v1966_v30 = vpop.permute.xlu0 %1965  ;;  %v2009_v14 = vmul.f32 %v1991_v3, %v5563_v49  ;;  %v2010_v32 = vmul.f32 %v2003_v45, %v5564_v47  ;;  %2187 = vmatprep.subr.bf16.mxu0 %v2024_v31 }
 0x4a7   :  { %2188 = vmatpush1.bf16.msra.mxu0 %v2023_v13 }
 0x4a8   :  { %v2025_v34 = vpack.c.bf16 %v2013_v38, %v2009_v14  ;;  %v1964_v52 = vpop.permute.xlu1 %1963  ;;  %v2026_v15 = vpack.c.bf16 %v2014_v0, %v2010_v32  ;;  %v5568_v38 = vld [vmem:[#allocation32_spill] sm:$0xff]  ;;  %v5569_v0 = vld [vmem:[#allocation33_spill] sm:$0xff] }
 0x4aa   :  { %v1974_v55 = vpop.permute.xlu0 %1973  ;;  %2293 = vmatprep.subr.bf16.mxu1 %v2026_v15 }
 0x4ab   :  { %2294 = vmatpush1.bf16.msra.mxu1 %v2025_v34  ;;  %v2002_v4 = vsel %vm714_vm6, %v1966_v30, %v1974_v55 }
 0x4ac   :  { %v1972_v61 = vpop.permute.xlu1 %1971  ;;  %v2019_v44 = vmul.f32 %v2002_v4, %v5562_v20 }
 0x4ad   :  { %v2001_v7 = vsel %vm714_vm6, %v1964_v52, %v1972_v61 }
 0x4ae   :  { %v1982_v62 = vpop.permute.xlu0 %1981  ;;  %v2015_v21 = vmul.f32 %v2001_v7, %v5562_v20  ;;  %v5566_v20 = vld [vmem:[#allocation30_spill] sm:$0xff] }
 0x4af   :  { %v1998_v60 = vsel %vm714_vm6, %v1974_v55, %v1982_v62 }
 0x4b0   :  { %v2020_v25 = vmul.f32 %v1998_v60, %v5561_v27  ;;  %v1980_v42 = vpop.permute.xlu1 %1979  ;;  %v2027_v6 = vpack.c.bf16 %v2019_v44, %v2015_v21 }
 0x4b1   :  { %v1997_v63 = vsel %vm714_vm6, %v1972_v61, %v1980_v42 }
 0x4b2   :  { %v1990_v41 = vpop.permute.xlu0 %1989  ;;  %v2016_v9 = vmul.f32 %v1997_v63, %v5561_v27  ;;  %v5565_v27 = vld [vmem:[#allocation31_spill] sm:$0xff] }
 0x4b3   :  { %v1994_v23 = vsel %vm714_vm6, %v1982_v62, %v1990_v41  ;;  %v2006_v8 = vsel %vm714_vm6, %v1990_v41, %v1966_v30 }
 0x4b4   :  { %v2021_v1 = vmul.f32 %v1994_v23, %v5563_v49  ;;  %v2022_v57 = vmul.f32 %v2006_v8, %v5564_v47  ;;  %v1988_v56 = vpop.permute.xlu1 %1987  ;;  %v2028_v24 = vpack.c.bf16 %v2020_v25, %v2016_v9 }
 0x4b5   :  { %v1993_v59 = vsel %vm714_vm6, %v1980_v42, %v1988_v56  ;;  %v2005_v19 = vsel %vm714_vm6, %v1988_v56, %v1964_v52 }
 0x4b6   :  { %v2034_v10 = vpop.permute.xlu0 %2033  ;;  %v2017_v43 = vmul.f32 %v1993_v59, %v5563_v49  ;;  %v2018_v58 = vmul.f32 %v2005_v19, %v5564_v47  ;;  %2189 = vmatprep.subr.bf16.mxu0 %v2028_v24  ;;  %v5567_v49 = vmov 0  }
 0x4b7   :  { %2190 = vmatpush1.bf16.msra.mxu0 %v2027_v6 }
 0x4b8   :  { %v2029_v33 = vpack.c.bf16 %v2021_v1, %v2017_v43  ;;  %v2032_v12 = vpop.permute.xlu1 %2031  ;;  %v2030_v48 = vpack.c.bf16 %v2022_v57, %v2018_v58 }
 0x4ba   :  { %v2042_v11 = vpop.permute.xlu0 %2041  ;;  %2295 = vmatprep.subr.bf16.mxu1 %v2030_v48  ;;  %2192 = vmatmul.mubr.bf16.vlgmr.msra.gmra.mrb[8].mxu0 %v2901_v17 }
 0x4bb   :  { %2296 = vmatpush1.bf16.msra.mxu1 %v2029_v33  ;;  %2201 = vmatprep.mubr.bf16.mxu0 %v2904_v26  ;;  %v2072_v37 = vsel %vm808_vm7, %v2034_v10, %v2042_v11 }
 0x4bc   :  { %v2040_v35 = vpop.permute.xlu1 %2039  ;;  %v2083_v54 = vmul.f32 %v2072_v37, %v5566_v20 }
 0x4bd   :  { %v2071_v28 = vsel %vm808_vm7, %v2032_v12, %v2040_v35 }
 0x4be   :  { %v2050_v5 = vpop.permute.xlu0 %2049  ;;  %2298 = vmatmul.mubr.bf16.vlgmr.msra.gmra.mrb[8].mxu1 %v2901_v17  ;;  %v2079_v2 = vmul.f32 %v2071_v28, %v5566_v20  ;;  %v2907_v17 = vld [vmem:[#allocation5 + $0x8] ss:$12 sps:$4 sm:$0xff]  }
 0x4bf   :  { %v2068_v53 = vsel %vm808_vm7, %v2042_v11, %v2050_v5  ;;  %2307 = vmatprep.mubr.bf16.mxu1 %v2904_v26 }
 0x4c0   :  { %v2084_v22 = vmul.f32 %v2068_v53, %v5565_v27  ;;  %v2048_v16 = vpop.permute.xlu1 %2047  ;;  %v2095_v3 = vpack.c.bf16 %v2083_v54, %v2079_v2 }
 0x4c1   :  { %v2067_v36 = vsel %vm808_vm7, %v2040_v35, %v2048_v16 }
 0x4c2   :  { %v2058_v39 = vpop.permute.xlu0 %2057  ;;  %v2080_v40 = vmul.f32 %v2067_v36, %v5565_v27  ;;  %2202 = vmatmul.mubr.bf16.gmra.mrb[12].mxu0 %v2906_v50 }
 0x4c3   :  { %v2064_v29 = vsel %vm808_vm7, %v2050_v5, %v2058_v39  ;;  %v2076_v51 = vsel %vm808_vm7, %v2058_v39, %v2034_v10  ;;  %2244 = vmatprep.mubr.bf16.mxu0 %v5567_v49 }
 0x4c4   :  { %v2085_v47 = vmul.f32 %v2064_v29, %v5568_v38  ;;  %v2086_v46 = vmul.f32 %v2076_v51, %v5569_v0  ;;  %v2056_v31 = vpop.permute.xlu1 %2055  ;;  %v2096_v13 = vpack.c.bf16 %v2084_v22, %v2080_v40 }
 0x4c5   :  { %v2063_v45 = vsel %vm808_vm7, %v2048_v16, %v2056_v31  ;;  %v2075_v30 = vsel %vm808_vm7, %v2056_v31, %v2032_v12  ;;  %v2908_v12 = vld [vmem:[#allocation5 + $0x20] ss:$12 sps:$4 sm:$0xff]  }
 0x4c6   :  { %v2038_v14 = vpop.permute.xlu0 %2037  ;;  %v2081_v32 = vmul.f32 %v2063_v45, %v5568_v38  ;;  %v2082_v34 = vmul.f32 %v2075_v30, %v5569_v0  ;;  %2212 = vmatprep.subr.bf16.mxu0 %v2096_v13  ;;  %2308 = vmatmul.mubr.bf16.gmra.mrb[12].mxu1 %v2906_v50 }
 0x4c7   :  { %2213 = vmatpush1.bf16.msra.mxu0 %v2095_v3  ;;  %2350 = vmatprep.mubr.bf16.mxu1 %v5567_v49 }
 0x4c8   :  { %v2097_v52 = vpack.c.bf16 %v2085_v47, %v2081_v32  ;;  %v2036_v15 = vpop.permute.xlu1 %2035  ;;  %v2098_v55 = vpack.c.bf16 %v2086_v46, %v2082_v34 }
 0x4ca   :  { %v2046_v61 = vpop.permute.xlu0 %2045  ;;  %2318 = vmatprep.subr.bf16.mxu1 %v2098_v55 }
 0x4cb   :  { %2319 = vmatpush1.bf16.msra.mxu1 %v2097_v52  ;;  %v2074_v4 = vsel %vm808_vm7, %v2038_v14, %v2046_v61 }
 0x4cc   :  { %v2044_v62 = vpop.permute.xlu1 %2043  ;;  %v2091_v21 = vmul.f32 %v2074_v4, %v5566_v20 }
 0x4cd   :  { %v2073_v7 = vsel %vm808_vm7, %v2036_v15, %v2044_v62 }
 0x4ce   :  { %v2054_v60 = vpop.permute.xlu0 %2053  ;;  %v2087_v63 = vmul.f32 %v2073_v7, %v5566_v20 }
 0x4cf   :  { %v2070_v25 = vsel %vm808_vm7, %v2046_v61, %v2054_v60 }
 0x4d0   :  { %v2092_v42 = vmul.f32 %v2070_v25, %v5565_v27  ;;  %v2052_v44 = vpop.permute.xlu1 %2051  ;;  %v2099_v59 = vpack.c.bf16 %v2091_v21, %v2087_v63 }
 0x4d1   :  { %v2069_v41 = vsel %vm808_vm7, %v2044_v62, %v2052_v44 }
 0x4d2   :  { %v2088_v9 = vmul.f32 %v2069_v41, %v5565_v27  ;;  %v2062_v23 = vpop.permute.xlu0 %2061 }
 0x4d3   :  { %v2066_v8 = vsel %vm808_vm7, %v2054_v60, %v2062_v23  ;;  %v2078_v1 = vsel %vm808_vm7, %v2062_v23, %v2038_v14 }
 0x4d4   :  { %v2093_v57 = vmul.f32 %v2066_v8, %v5568_v38  ;;  %v2094_v56 = vmul.f32 %v2078_v1, %v5569_v0  ;;  %v2060_v24 = vpop.permute.xlu1 %2059  ;;  %v2100_v6 = vpack.c.bf16 %v2092_v42, %v2088_v9 }
 0x4d5   :  { %v2065_v19 = vsel %vm808_vm7, %v2052_v44, %v2060_v24  ;;  %v2077_v10 = vsel %vm808_vm7, %v2060_v24, %v2036_v15 }
 0x4d6   :  { %v2089_v43 = vmul.f32 %v2065_v19, %v5568_v38  ;;  %v2090_v58 = vmul.f32 %v2077_v10, %v5569_v0  ;;  %2214 = vmatprep.subr.bf16.mxu0 %v2100_v6 }
 0x4d7   :  { %2215 = vmatpush1.bf16.msra.mxu0 %v2099_v59 }
 0x4d8   :  { %v2101_v26 = vpack.c.bf16 %v2093_v57, %v2089_v43  ;;  %v2102_v33 = vpack.c.bf16 %v2094_v56, %v2090_v58 }
 0x4da   :  { %2805 = vmatmul.mubr.msk.bf16.vlgmr.msra.gmra.mrb[8].mxu0 %vm920_vm8, %v2907_v17  ;;  %2320 = vmatprep.subr.bf16.mxu1 %v2102_v33 }
 0x4db   :  { %2321 = vmatpush1.bf16.msra.mxu1 %v2101_v26  ;;  %2254 = vmatprep.mubr.bf16.mxu0 %v5567_v49 }
 0x4de   :  { %2807 = vmatmul.mubr.msk.bf16.vlgmr.msra.gmra.mrb[8].mxu1 %vm920_vm8, %v2907_v17 }
 0x4df   :  { %2360 = vmatprep.mubr.bf16.mxu1 %v5567_v49 }
 0x4e2   :  { %2806 = vmatmul.mubr.msk.bf16.gmra.mrb[12].mxu0 %vm920_vm8, %v2908_v12 }
 0x4e3   :  { %v2111_v16 = vpop.permute.xlu0 %2110 }
 0x4e5   :  { %v2106_v18 = vpop.permute.xlu1 %2105 }
 0x4e6   :  { %2808 = vmatmul.mubr.msk.bf16.gmra.mrb[12].mxu1 %vm920_vm8, %v2908_v12 }
 0x4e7   :  { %v2121_v1 = vpop.permute.xlu0 %2120 }
 0x4e9   :  { %v2116_v62 = vpop.permute.xlu1 %2115 }
 0x5ad   :  { %v2246_v48 = vpop.f32.mrb[8].mxu0 }
 0x5ae   :  { %v5084_v11 = vadd.f32 %v2246_v48, %v2106_v18  ;;  %v2248_v35 = vpop.f32.mrb[9].mxu0  ;;  %v2372_v48 = vld [vmem:[%s5472_s8 + $0x8] sm:$0xff] }
 0x5af   :  { %v5086_v5 = vadd.f32 %v2248_v35, %v2106_v18  ;;  %v2250_v37 = vpop.f32.mrb[10].mxu0  ;;  %v2371_v35 = vld [vmem:[%s5472_s8] sm:$0xff] }
 0x5b0   :  { %v2252_v28 = vpop.f32.mrb[11].mxu0  ;;  %v5096_v39 = vadd.f32 %v2250_v37, %v2111_v16  ;;  %v2401_v47 = vmul.f32 %v5084_v11, %v5084_v11  ;;  %v2374_v37 = vld [vmem:[%s5472_s8 + $0x18] sm:$0xff] }
 0x5b1   :  { %v2352_v53 = vpop.f32.mrb[8].mxu1  ;;  %v2379_v50 = vadd.f32 %v5086_v5, %v5084_v11  ;;  %v5098_v40 = vadd.f32 %v2252_v28, %v2111_v16  ;;  %v2402_v0 = vmul.f32 %v5086_v5, %v5086_v5  ;;  %v2376_v28 = vld [vmem:[%s5473_s9 + $0x8] sm:$0xff] }
 0x5b2   :  { %v5090_v27 = vadd.f32 %v2352_v53, %v2106_v18  ;;  %v2354_v22 = vpop.f32.mrb[9].mxu1  ;;  %v2403_v4 = vmul.f32 %v5096_v39, %v5096_v39  ;;  %v2378_v53 = vld [vmem:[%s5473_s9 + $0x18] sm:$0xff] }
 0x5b3   :  { %v5092_v20 = vadd.f32 %v2354_v22, %v2106_v18  ;;  %v2356_v54 = vpop.f32.mrb[10].mxu1  ;;  %2380 = vadd.xlane.f32.xlu1 %v2379_v50  ;;  %v2382_v14 = vadd.f32 %v5098_v40, %v5096_v39  ;;  %v2409_v55 = vadd.f32 %v2402_v0, %v2401_v47  ;;  %v2404_v7 = vmul.f32 %v5098_v40, %v5098_v40 }
 0x5b4   :  { %v5094_v2 = vadd.f32 %v2356_v54, %v2111_v16  ;;  %v2358_v36 = vpop.f32.mrb[11].mxu1  ;;  %v2473_v3 = vmul.f32 %v5090_v27, %v5090_v27  ;;  %v2373_v54 = vld [vmem:[%s5472_s8 + $0x10] sm:$0xff] }
 0x5b5   :  { %v5100_v29 = vadd.f32 %v2358_v36, %v2111_v16  ;;  %v2256_v51 = vpop.f32.mrb[12].mxu0  ;;  %v2451_v49 = vadd.f32 %v5092_v20, %v5090_v27  ;;  %v2474_v45 = vmul.f32 %v5092_v20, %v5092_v20  ;;  %v2412_v41 = vadd.f32 %v2404_v7, %v2403_v4  ;;  %v2375_v36 = vld [vmem:[%s5473_s9] sm:$0xff] }
 0x5b6   :  { %v2258_v38 = vpop.f32.mrb[13].mxu0  ;;  %v2475_v34 = vmul.f32 %v5094_v2, %v5094_v2  ;;  %v5124_v25 = vadd.f32 %v2256_v51, %v2116_v62  ;;  %v2377_v51 = vld [vmem:[%s5473_s9 + $0x10] sm:$0xff] }
 0x5b7   :  { %v2260_v46 = vpop.f32.mrb[14].mxu0  ;;  %2452 = vadd.xlane.f32.xlu0 %v2451_v49  ;;  %v2454_v31 = vadd.f32 %v5100_v29, %v5094_v2  ;;  %v2476_v52 = vmul.f32 %v5100_v29, %v5100_v29  ;;  %v2481_v60 = vadd.f32 %v2474_v45, %v2473_v3  ;;  %v5126_v42 = vadd.f32 %v2258_v38, %v2116_v62 }
 0x5b8   :  { %v2262_v13 = vpop.f32.mrb[15].mxu0  ;;  %v2405_v9 = vmul.f32 %v5124_v25, %v5124_v25  ;;  %v5138_v57 = vadd.f32 %v2260_v46, %v2121_v1 }
 0x5b9   :  { %v2362_v30 = vpop.f32.mrb[12].mxu1  ;;  %2455 = vadd.xlane.f32.xlu1 %v2454_v31  ;;  %v2484_v63 = vadd.f32 %v2476_v52, %v2475_v34  ;;  %v2406_v23 = vmul.f32 %v5126_v42, %v5126_v42  ;;  %v5140_v56 = vadd.f32 %v2262_v13, %v2121_v1  ;;  %v2385_v24 = vadd.f32 %v5126_v42, %v5124_v25 }
 0x5ba   :  { %v2364_v32 = vpop.f32.mrb[13].mxu1  ;;  %v5128_v44 = vadd.f32 %v2362_v30, %v2116_v62  ;;  %v2407_v26 = vmul.f32 %v5138_v57, %v5138_v57 }
 0x5bb   :  { %v2366_v15 = vpop.f32.mrb[14].mxu1  ;;  %2383 = vadd.xlane.f32.xlu0 %v2382_v14  ;;  %v5130_v21 = vadd.f32 %v2364_v32, %v2116_v62  ;;  %v2415_v19 = vadd.f32 %v2406_v23, %v2405_v9  ;;  %v2388_v58 = vadd.f32 %v5140_v56, %v5138_v57  ;;  %v2408_v33 = vmul.f32 %v5140_v56, %v5140_v56 }
 0x5bc   :  { %v2368_v61 = vpop.f32.mrb[15].mxu1  ;;  %v2477_v6 = vmul.f32 %v5128_v44, %v5128_v44  ;;  %v5148_v10 = vadd.f32 %v2366_v15, %v2121_v1 }
 0x5bd   :  { %2410 = vadd.xlane.f32.xlu1 %v2409_v55  ;;  %v2457_v8 = vadd.f32 %v5130_v21, %v5128_v44  ;;  %v2478_v59 = vmul.f32 %v5130_v21, %v5130_v21  ;;  %v5150_v43 = vadd.f32 %v2368_v61, %v2121_v1  ;;  %v2418_v18 = vadd.f32 %v2408_v33, %v2407_v26 }
 0x5be   :  { %v2479_v50 = vmul.f32 %v5148_v10, %v5148_v10 }
 0x5bf   :  { %2482 = vadd.xlane.f32.xlu0 %v2481_v60  ;;  %v2487_v17 = vadd.f32 %v2478_v59, %v2477_v6  ;;  %v2460_v12 = vadd.f32 %v5150_v43, %v5148_v10  ;;  %v2480_v22 = vmul.f32 %v5150_v43, %v5150_v43 }
 0x5c1   :  { %2485 = vadd.xlane.f32.xlu1 %v2484_v63  ;;  %v2490_v16 = vadd.f32 %v2480_v22, %v2479_v50 }
 0x5c3   :  { %2413 = vadd.xlane.f32.xlu0 %v2412_v41 }
 0x5c5   :  { %2458 = vadd.xlane.f32.xlu1 %v2457_v8 }
 0x5c7   :  { %2386 = vadd.xlane.f32.xlu0 %v2385_v24 }
 0x5c9   :  { %2416 = vadd.xlane.f32.xlu1 %v2415_v19 }
 0x5cb   :  { %2389 = vadd.xlane.f32.xlu0 %v2388_v58 }
 0x5cd   :  { %2488 = vadd.xlane.f32.xlu1 %v2487_v17 }
 0x5cf   :  { %2461 = vadd.xlane.f32.xlu0 %v2460_v12 }
 0x5d3   :  { %2419 = vadd.xlane.f32.xlu0 %v2418_v18 }
 0x5de   :  { %2530 = vperm.xlu1 %2892, %v2372_v48  }
 0x5e9   :  { %2525 = vperm.xlu0 %2891, %v2371_v35  }
 0x5ed   :  { %2540 = vperm.xlu0 %2891, %v2374_v37  }
 0x5f1   :  { %2566 = vperm.xlu0 %2891, %v2376_v28  }
 0x5f5   :  { %2576 = vperm.xlu0 %2891, %v2378_v53  }
 0x602   :  { %2491 = vadd.xlane.f32.xlu1 %v2490_v16 }
 0x613   :  { %2535 = vperm.xlu1 %2892, %v2373_v54  }
 0x617   :  { %2561 = vperm.xlu1 %2892, %v2375_v36  }
 0x61b   :  { %2571 = vperm.xlu1 %2892, %v2377_v51  }
 0x640   :  { %v2381_v49 = vpop.xlane.xlu1 %2380 }
 0x644   :  { %v2453_v38 = vpop.xlane.xlu0 %2452 }
 0x646   :  { %v2456_v47 = vpop.xlane.xlu1 %2455 }
 0x647   :  { %v2463_v35 = vadd.f32 %v2456_v47, %v2453_v38 }
 0x648   :  { %v2384_v0 = vpop.xlane.xlu0 %2383 }
 0x649   :  { %v2391_v30 = vadd.f32 %v2384_v0, %v2381_v49 }
 0x64a   :  { %v2411_v46 = vpop.xlane.xlu1 %2410 }
 0x64c   :  { %v5188_v31 = vpop.xlane.xlu0 %2482 }
 0x64e   :  { %v5190_v13 = vpop.xlane.xlu1 %2485 }
 0x650   :  { %v2414_v3 = vpop.xlane.xlu0 %2413 }
 0x651   :  { %v2421_v62 = vadd.f32 %v2414_v3, %v2411_v46 }
 0x652   :  { %v2459_v14 = vpop.xlane.xlu1 %2458 }
 0x653   :  { %v2464_v37 = vadd.f32 %v2463_v35, %v2459_v14 }
 0x654   :  { %v2387_v45 = vpop.xlane.xlu0 %2386 }
 0x655   :  { %v2392_v32 = vadd.f32 %v2391_v30, %v2387_v45 }
 0x656   :  { %v2417_v55 = vpop.xlane.xlu1 %2416 }
 0x657   :  { %v2422_v7 = vadd.f32 %v2421_v62, %v2417_v55 }
 0x658   :  { %v2390_v34 = vpop.xlane.xlu0 %2389 }
 0x659   :  { %v2393_v52 = vadd.f32 %v2392_v32, %v2390_v34 }
 0x65a   :  { %v2489_v50 = vpop.xlane.xlu1 %2488 }
 0x65b   :  { %v2394_v15 = vrot.slane %v2393_v52, 4 }
 0x65c   :  { %v2462_v61 = vpop.xlane.xlu0 %2461 }
 0x65d   :  { %v2395_v4 = vadd.f32 %v2394_v15, %v2393_v52  ;;  %v2465_v53 = vadd.f32 %v2464_v37, %v2462_v61  ;;  %v2981_v61 = vld [vmem:[%s5465_s1 + $0x20] sm:$0xff] }
 0x65e   :  { %v5214_v46 = vpop.permute.xlu1 %2530 }
 0x65f   :  { %v2396_v60 = vrot.slane %v2395_v4, 2  ;;  %v2466_v22 = vrot.slane %v2465_v53, 4 }
 0x660   :  { %v2420_v63 = vpop.xlane.xlu0 %2419 }
 0x661   :  { %v2397_v41 = vadd.f32 %v2396_v60, %v2395_v4  ;;  %v2423_v9 = vadd.f32 %v2422_v7, %v2420_v63  ;;  %v2467_v45 = vadd.f32 %v2466_v22, %v2465_v53  ;;  %v2982_v4 = vld [vmem:[%s5465_s1 + $0x28] sm:$0xff]  ;;  %v2983_v60 = vld [vmem:[%s5465_s1 + $0x60] sm:$0xff] }
 0x663   :  { %v2424_v23 = vrot.slane %v2423_v9, 4  ;;  %v2398_v8 = vrot.slane %v2397_v41, 1  ;;  %v2468_v55 = vrot.slane %v2467_v45, 2 }
 0x665   :  { %v2425_v1 = vadd.f32 %v2424_v23, %v2423_v9  ;;  %v2399_v6 = vadd.f32 %v2398_v8, %v2397_v41  ;;  %v2984_v41 = vld [vmem:[%s5465_s1 + $0x68] sm:$0xff] }
 0x667   :  { %v2426_v24 = vrot.slane %v2425_v1, 2  ;;  %v5192_v58 = vmul.f32 0.00012207031, %v2399_v6  ;;  %v2469_v6 = vadd.f32 %v2468_v55, %v2467_v45 }
 0x668   :  { %v5196_v18 = vpop.permute.xlu0 %2525 }
 0x669   :  { %v2427_v59 = vadd.f32 %v2426_v24, %v2425_v1  ;;  %v2431_v33 = vmul.f32 %v5192_v58, %v5192_v58  ;;  %v2435_v54 = vsub.f32 %v5096_v39, %v5192_v58  ;;  %v2436_v36 = vsub.f32 %v5098_v40, %v5192_v58 }
 0x66a   :  { %v2439_v49 = vsub.f32 %v5138_v57, %v5192_v58  ;;  %v2440_v38 = vsub.f32 %v5140_v56, %v5192_v58  ;;  %v2470_v22 = vrot.slane %v2469_v6, 1  ;;  %v2437_v55 = vsub.f32 %v5124_v25, %v5192_v58 }
 0x66b   :  { %v2428_v19 = vrot.slane %v2427_v59, 1 }
 0x66c   :  { %v5198_v28 = vpop.permute.xlu0 %2540 }
 0x66d   :  { %v2429_v17 = vadd.f32 %v2428_v19, %v2427_v59 }
 0x66f   :  { %v2430_v26 = vmul.f32 0.00012207031, %v2429_v17  ;;  %v2493_v17 = vadd.f32 %v5190_v13, %v5188_v31 }
 0x670   :  { %v5200_v16 = vpop.permute.xlu0 %2566 }
 0x671   :  { %v2432_v12 = vsub.f32 %v2430_v26, %v2431_v33  ;;  %v2494_v35 = vadd.f32 %v2493_v17, %v2489_v50 }
 0x673   :  { %v2441_v48 = vadd.f32 1e-05, %v2432_v12 }
 0x674   :  { %v5224_v34 = vpop.permute.xlu0 %2576 }
 0x675   :  { %2945 = vrsqrt.f32 %v2441_v48 }
 0x67f   :  { %v5206_v51 = vpop.eup %2945 }
 0x680   :  { %v2445_v47 = vmul.f32 %v5206_v51, %v2435_v54  ;;  %v2446_v0 = vmul.f32 %v5206_v51, %v2436_v36  ;;  %v2449_v3 = vmul.f32 %v5206_v51, %v2439_v49  ;;  %v2450_v39 = vmul.f32 %v5206_v51, %v2440_v38 }
 0x681   :  { %v2433_v54 = vsub.f32 %v5084_v11, %v5192_v58  ;;  %v2434_v49 = vsub.f32 %v5086_v5, %v5192_v58 }
 0x682   :  { %v2547_v40 = vmul.f32 %v5214_v46, %v2445_v47  ;;  %v2548_v30 = vmul.f32 %v5214_v46, %v2446_v0  ;;  %v2555_v57 = vmul.f32 %v5198_v28, %v2449_v3  ;;  %v2556_v14 = vmul.f32 %v5198_v28, %v2450_v39 }
 0x683   :  { %v2443_v0 = vmul.f32 %v5206_v51, %v2433_v54  ;;  %v2444_v45 = vmul.f32 %v5206_v51, %v2434_v49 }
 0x684   :  { %v2583_v56 = vadd.f32 %v5200_v16, %v2547_v40  ;;  %v2584_v32 = vadd.f32 %v5200_v16, %v2548_v30  ;;  %v2591_v52 = vadd.f32 %v5224_v34, %v2555_v57  ;;  %v2592_v15 = vadd.f32 %v5224_v34, %v2556_v14 }
 0x685   :  { %v2471_v14 = vadd.f32 %v2470_v22, %v2469_v6  ;;  %v2985_v6 = vld [vmem:[%s5465_s1] sm:$0xff] }
 0x686   :  { %v5231_v62 = vadd.f32 %v2981_v61, %v2583_v56  ;;  %v5236_v7 = vadd.f32 %v2982_v4, %v2584_v32  ;;  %v5241_v63 = vadd.f32 %v2983_v60, %v2591_v52  ;;  %v5246_v9 = vadd.f32 %v2984_v41, %v2592_v15 }
 0x687   :  { %v2543_v56 = vmul.f32 %v5196_v18, %v2443_v0  ;;  %v2544_v32 = vmul.f32 %v5196_v18, %v2444_v45  ;;  %v2438_v61 = vsub.f32 %v5126_v42, %v5192_v58  ;;  %v5282_v4 = vmul.f32 0.00012207031, %v2471_v14  ;;  %v2986_v42 = vld [vmem:[%s5465_s1 + $0x8] sm:$0xff] }
 0x688   :  { %v2631_v23 = vmul.f32 0.044715, %v5231_v62  ;;  %v2632_v8 = vmul.f32 0.044715, %v5236_v7  ;;  %v2639_v1 = vmul.f32 0.044715, %v5241_v63 }
 0x689   :  { %v2640_v24 = vmul.f32 0.044715, %v5246_v9  ;;  %v2988_v0 = vld [vmem:[%s5465_s1 + $0x48] sm:$0xff]  ;;  %v2624_v14 = vmul.f32 0.5, %v5246_v9 }
 0x68a   :  { %v2647_v59 = vmul.f32 %v2631_v23, %v5231_v62  ;;  %v2648_v19 = vmul.f32 %v2632_v8, %v5236_v7  ;;  %v2655_v26 = vmul.f32 %v2639_v1, %v5241_v63  ;;  %v2447_v8 = vmul.f32 %v5206_v51, %v2437_v55 }
 0x68b   :  { %v2656_v33 = vmul.f32 %v2640_v24, %v5246_v9  ;;  %v2448_v1 = vmul.f32 %v5206_v51, %v2438_v61  ;;  %v2615_v51 = vmul.f32 0.5, %v5231_v62 }
 0x68c   :  { %v2663_v12 = vmul.f32 %v2647_v59, %v5231_v62  ;;  %v2664_v48 = vmul.f32 %v2648_v19, %v5236_v7  ;;  %v2671_v37 = vmul.f32 %v2655_v26, %v5241_v63  ;;  %v2503_v26 = vmul.f32 %v5282_v4, %v5282_v4 }
 0x68d   :  { %v2672_v53 = vmul.f32 %v2656_v33, %v5246_v9 }
 0x68e   :  { %v2679_v36 = vadd.f32 %v2663_v12, %v5231_v62  ;;  %v2680_v31 = vadd.f32 %v2664_v48, %v5236_v7  ;;  %v2687_v38 = vadd.f32 %v2671_v37, %v5241_v63 }
 0x68f   :  { %v2492_v13 = vpop.xlane.xlu1 %2491  ;;  %v2688_v50 = vadd.f32 %v2672_v53, %v5246_v9 }
 0x690   :  { %v2495_v47 = vadd.f32 %v2494_v35, %v2492_v13  ;;  %v2695_v3 = vmul.f32 0.7978846, %v2679_v36  ;;  %v2696_v39 = vmul.f32 0.7978846, %v2680_v31  ;;  %v2703_v11 = vmul.f32 0.7978846, %v2687_v38 }
 0x691   :  { %v2704_v40 = vmul.f32 0.7978846, %v2688_v50  ;;  %v2616_v35 = vmul.f32 0.5, %v5236_v7  ;;  %v2623_v31 = vmul.f32 0.5, %v5241_v63  ;;  %v2987_v7 = vld [vmem:[%s5465_s1 + $0x40] sm:$0xff] }
 0x692   :  { %v2496_v30 = vrot.slane %v2495_v47, 4  ;;  %2947 = vtanh.f32 %v2695_v3 }
 0x693   :  { %v5272_v57 = vpop.permute.xlu1 %2535  ;;  %2949 = vtanh.f32 %v2696_v39 }
 0x694   :  { %v2497_v5 = vadd.f32 %v2496_v30, %v2495_v47  ;;  %2951 = vtanh.f32 %v2703_v11  ;;  %v2551_v59 = vmul.f32 %v5272_v57, %v2447_v8  ;;  %v2552_v19 = vmul.f32 %v5272_v57, %v2448_v1 }
 0x695   :  { %2953 = vtanh.f32 %v2704_v40 }
 0x696   :  { %v2498_v52 = vrot.slane %v2497_v5, 2 }
 0x697   :  { %v5276_v15 = vpop.permute.xlu1 %2561 }
 0x698   :  { %v2499_v60 = vadd.f32 %v2498_v52, %v2497_v5  ;;  %v2579_v41 = vadd.f32 %v5276_v15, %v2543_v56  ;;  %v2580_v23 = vadd.f32 %v5276_v15, %v2544_v32 }
 0x69a   :  { %v2500_v24 = vrot.slane %v2499_v60, 1  ;;  %v5291_v25 = vadd.f32 %v2985_v6, %v2579_v41  ;;  %v5296_v58 = vadd.f32 %v2986_v42, %v2580_v23 }
 0x69b   :  { %v5300_v17 = vpop.permute.xlu1 %2571 }
 0x69c   :  { %v2501_v33 = vadd.f32 %v2500_v24, %v2499_v60  ;;  %v2627_v12 = vmul.f32 0.044715, %v5291_v25  ;;  %v2948_v48 = vpop.eup %2947  ;;  %v2628_v37 = vmul.f32 0.044715, %v5296_v58  ;;  %v2587_v53 = vadd.f32 %v5300_v17, %v2551_v59 }
 0x69d   :  { %v2588_v22 = vadd.f32 %v5300_v17, %v2552_v19  ;;  %v2950_v54 = vpop.eup %2949  ;;  %v2727_v36 = vadd.f32 1.0, %v2948_v48  ;;  %v2511_v48 = vsub.f32 %v5148_v10, %v5282_v4  ;;  %v2612_v10 = vmul.f32 0.5, %v5296_v58 }
 0x69e   :  { %v2502_v62 = vmul.f32 0.00012207031, %v2501_v33  ;;  %v2643_v13 = vmul.f32 %v2627_v12, %v5291_v25  ;;  %v2952_v49 = vpop.eup %2951  ;;  %v2728_v38 = vadd.f32 1.0, %v2950_v54  ;;  %v2644_v50 = vmul.f32 %v2628_v37, %v5296_v58 }
 0x69f   :  { %v5316_v47 = vadd.f32 %v2987_v7, %v2587_v53  ;;  %v5321_v3 = vadd.f32 %v2988_v0, %v2588_v22  ;;  %v2954_v63 = vpop.eup %2953  ;;  %v2743_v39 = vmul.f32 %v2727_v36, %v2615_v51  ;;  %v2735_v45 = vadd.f32 1.0, %v2952_v49 }
 0x6a0   :  { %v2504_v11 = vsub.f32 %v2502_v62, %v2503_v26  ;;  %v2659_v40 = vmul.f32 %v2643_v13, %v5291_v25  ;;  %v2744_v30 = vmul.f32 %v2728_v38, %v2616_v35  ;;  %v2736_v5 = vadd.f32 1.0, %v2954_v63 }
 0x6a1   :  { %v2660_v56 = vmul.f32 %v2644_v50, %v5296_v58  ;;  %2759 = vst [vmem:[#allocation7 + $0x20] sm:$0xff] %v2743_v39  ;;  %v2751_v32 = vmul.f32 %v2735_v45, %v2623_v31  ;;  %v2635_v41 = vmul.f32 0.044715, %v5316_v47  ;;  %v2636_v23 = vmul.f32 0.044715, %v5321_v3 }
 0x6a2   :  { %v2513_v52 = vadd.f32 1e-05, %v2504_v11  ;;  %v2675_v55 = vadd.f32 %v2659_v40, %v5291_v25  ;;  %2760 = vst [vmem:[#allocation7 + $0x28] sm:$0xff] %v2744_v30  ;;  %v2752_v61 = vmul.f32 %v2736_v5, %v2624_v14  ;;  %v2507_v33 = vsub.f32 %v5094_v2, %v5282_v4 }
 0x6a3   :  { %v2676_v60 = vadd.f32 %v2660_v56, %v5296_v58  ;;  %2767 = vst [vmem:[#allocation7 + $0x60] sm:$0xff] %v2751_v32  ;;  %v2651_v1 = vmul.f32 %v2635_v41, %v5316_v47  ;;  %v2652_v24 = vmul.f32 %v2636_v23, %v5321_v3  ;;  %v2508_v12 = vsub.f32 %v5100_v29, %v5282_v4 }
 0x6a4   :  { %2955 = vrsqrt.f32 %v2513_v52  ;;  %v2691_v8 = vmul.f32 0.7978846, %v2675_v55  ;;  %2768 = vst [vmem:[#allocation7 + $0x68] sm:$0xff] %v2752_v61  ;;  %v2505_v35 = vsub.f32 %v5090_v27, %v5282_v4  ;;  %v2506_v37 = vsub.f32 %v5092_v20, %v5282_v4 }
 0x6a5   :  { %v2692_v9 = vmul.f32 0.7978846, %v2676_v60  ;;  %v2667_v6 = vmul.f32 %v2651_v1, %v5316_v47  ;;  %v2668_v42 = vmul.f32 %v2652_v24, %v5321_v3  ;;  %v2509_v53 = vsub.f32 %v5128_v44, %v5282_v4 }
 0x6a6   :  { %2957 = vtanh.f32 %v2691_v8  ;;  %v2510_v22 = vsub.f32 %v5130_v21, %v5282_v4  ;;  %v2512_v29 = vsub.f32 %v5150_v43, %v5282_v4  ;;  %v2611_v54 = vmul.f32 0.5, %v5291_v25 }
 0x6a7   :  { %2959 = vtanh.f32 %v2692_v9  ;;  %v2683_v59 = vadd.f32 %v2667_v6, %v5316_v47  ;;  %v2684_v19 = vadd.f32 %v2668_v42, %v5321_v3  ;;  %v2619_v55 = vmul.f32 0.5, %v5316_v47 }
 0x6a8   :  { %v2620_v8 = vmul.f32 0.5, %v5321_v3 }
 0x6a9   :  { %v2699_v51 = vmul.f32 0.7978846, %v2683_v59  ;;  %v2700_v26 = vmul.f32 0.7978846, %v2684_v19 }
 0x6ab   :  { %2961 = vtanh.f32 %v2699_v51 }
 0x6ac   :  { %2963 = vtanh.f32 %v2700_v26 }
 0x6ae   :  { %v2956_v2 = vpop.eup %2955 }
 0x6af   :  { %v2515_v27 = vmul.f32 %v2956_v2, %v2505_v35  ;;  %v2516_v36 = vmul.f32 %v2956_v2, %v2506_v37  ;;  %v2519_v31 = vmul.f32 %v2956_v2, %v2509_v53  ;;  %v2520_v20 = vmul.f32 %v2956_v2, %v2510_v22 }
 0x6b0   :  { %v2958_v62 = vpop.eup %2957  ;;  %v2517_v13 = vmul.f32 %v2956_v2, %v2507_v33  ;;  %v2518_v44 = vmul.f32 %v2956_v2, %v2508_v12  ;;  %v2521_v49 = vmul.f32 %v2956_v2, %v2511_v48  ;;  %v2522_v38 = vmul.f32 %v2956_v2, %v2512_v29  ;;  %v2994_v2 = vld [vmem:[%s5465_s1 + $0x38] sm:$0xff] }
 0x6b1   :  { %v2960_v21 = vpop.eup %2959  ;;  %v2545_v50 = vmul.f32 %v5196_v18, %v2515_v27  ;;  %v2546_v7 = vmul.f32 %v5196_v18, %v2516_v36  ;;  %v2723_v43 = vadd.f32 1.0, %v2958_v62  ;;  %v2553_v4 = vmul.f32 %v5272_v57, %v2519_v31  ;;  %v2995_v27 = vld [vmem:[%s5465_s1 + $0x70] sm:$0xff]  ;;  %v2996_v31 = vld [vmem:[%s5465_s1 + $0x78] sm:$0xff] }
 0x6b2   :  { %v2724_v25 = vadd.f32 1.0, %v2960_v21  ;;  %v2554_v58 = vmul.f32 %v5272_v57, %v2520_v20  ;;  %v2549_v0 = vmul.f32 %v5214_v46, %v2517_v13  ;;  %v2550_v63 = vmul.f32 %v5214_v46, %v2518_v44  ;;  %v2989_v57 = vld [vmem:[%s5465_s1 + $0x10] sm:$0xff]  ;;  %v2990_v46 = vld [vmem:[%s5465_s1 + $0x18] sm:$0xff] }
 0x6b3   :  { %v2581_v39 = vadd.f32 %v5276_v15, %v2545_v50  ;;  %v2582_v45 = vadd.f32 %v5276_v15, %v2546_v7  ;;  %v2739_v11 = vmul.f32 %v2723_v43, %v2611_v54  ;;  %v2589_v40 = vadd.f32 %v5300_v17, %v2553_v4 }
 0x6b4   :  { %v2740_v30 = vmul.f32 %v2724_v25, %v2612_v10  ;;  %v2590_v18 = vadd.f32 %v5300_v17, %v2554_v58  ;;  %v2557_v14 = vmul.f32 %v5198_v28, %v2521_v49  ;;  %v2558_v5 = vmul.f32 %v5198_v28, %v2522_v38  ;;  %v2991_v17 = vld [vmem:[%s5465_s1 + $0x50] sm:$0xff]  ;;  %v2992_v28 = vld [vmem:[%s5465_s1 + $0x58] sm:$0xff] }
 0x6b5   :  { %v5369_v56 = vadd.f32 %v2989_v57, %v2581_v39  ;;  %v5374_v15 = vadd.f32 %v2990_v46, %v2582_v45  ;;  %2755 = vst [vmem:[#allocation7] sm:$0xff] %v2739_v11  ;;  %v5379_v32 = vadd.f32 %v2991_v17, %v2589_v40  ;;  %v2585_v61 = vadd.f32 %v5200_v16, %v2549_v0  ;;  %v2962_v60 = vpop.eup %2961 }
 0x6b6   :  { %2756 = vst [vmem:[#allocation7 + $0x8] sm:$0xff] %v2740_v30  ;;  %v5384_v52 = vadd.f32 %v2992_v28, %v2590_v18  ;;  %v2586_v9 = vadd.f32 %v5200_v16, %v2550_v63  ;;  %v2964_v1 = vpop.eup %2963  ;;  %v2593_v42 = vadd.f32 %v5224_v34, %v2557_v14  ;;  %v2594_v47 = vadd.f32 %v5224_v34, %v2558_v5  ;;  %v2993_v16 = vld [vmem:[%s5465_s1 + $0x30] sm:$0xff]  ;;  %s3084_s1 = smov [#allocation7]  }
 0x6b7   :  { %v2629_v41 = vmul.f32 0.044715, %v5369_v56  ;;  %v2630_v23 = vmul.f32 0.044715, %v5374_v15  ;;  %v2637_v24 = vmul.f32 0.044715, %v5379_v32  ;;  %v5403_v12 = vadd.f32 %v2993_v16, %v2585_v61 }
 0x6b8   :  { %v2638_v6 = vmul.f32 0.044715, %v5384_v52  ;;  %v2731_v51 = vadd.f32 1.0, %v2962_v60  ;;  %v2732_v26 = vadd.f32 1.0, %v2964_v1  ;;  %v5412_v29 = vadd.f32 %v2994_v2, %v2586_v9  ;;  %s2776_s19 = sshll.u32 %s3084_s1, 4  ;;  %s2777_s19 = int_to_ptr.vmem [resolvable:$true] %s2776_s19 }
 0x6b9   :  { %v2645_v59 = vmul.f32 %v2629_v41, %v5369_v56  ;;  %v2646_v19 = vmul.f32 %v2630_v23, %v5374_v15  ;;  %v2653_v33 = vmul.f32 %v2637_v24, %v5379_v32  ;;  %v5419_v36 = vadd.f32 %v2995_v27, %v2593_v42  ;;  %s3041_s20 = scalar_lea.vmem %s2777_s19, 2048  ;;  %p3046_p3 = scmp.lt.s32.totalorder %s2777_s19, %s2777_s19 }
 0x6ba   :  { %v2654_v3 = vmul.f32 %v2638_v6, %v5384_v52  ;;  %v2747_v35 = vmul.f32 %v2731_v51, %v2619_v55  ;;  %v2748_v37 = vmul.f32 %v2732_v26, %v2620_v8  ;;  %v5424_v20 = vadd.f32 %v2996_v31, %v2594_v47  ;;  %p3042_p2 = scmp.ne.s32.totalorder %s2777_s19, %s3041_s20  ;;  %p3047_p4 = scmp.lt.s32.totalorder %s3041_s20, %s3041_s20 }
 0x6bb   :  { %v2661_v48 = vmul.f32 %v2645_v59, %v5369_v56  ;;  %v2662_v34 = vmul.f32 %v2646_v19, %v5374_v15  ;;  %v2669_v53 = vmul.f32 %v2653_v33, %v5379_v32  ;;  %v2633_v38 = vmul.f32 0.044715, %v5403_v12 }
 0x6bc   :  { %v2670_v22 = vmul.f32 %v2654_v3, %v5384_v52  ;;  %2763 = vst [vmem:[#allocation7 + $0x40] sm:$0xff] %v2747_v35  ;;  %2764 = vst [vmem:[#allocation7 + $0x48] sm:$0xff] %v2748_v37  ;;  %v2634_v7 = vmul.f32 0.044715, %v5412_v29  ;;  %v2641_v43 = vmul.f32 0.044715, %v5419_v36  ;;  %p3048_p5 = por %p3047_p4, %p3046_p3 }
 0x6bd   :  { %v2677_v54 = vadd.f32 %v2661_v48, %v5369_v56  ;;  %v2678_v10 = vadd.f32 %v2662_v34, %v5374_v15  ;;  %v2685_v62 = vadd.f32 %v2669_v53, %v5379_v32  ;;  %v2642_v4 = vmul.f32 0.044715, %v5424_v20 }
 0x6be   :  { %v2686_v13 = vadd.f32 %v2670_v22, %v5384_v52  ;;  %v2649_v25 = vmul.f32 %v2633_v38, %v5403_v12  ;;  %v2650_v58 = vmul.f32 %v2634_v7, %v5412_v29  ;;  %v2657_v0 = vmul.f32 %v2641_v43, %v5419_v36  ;;  %p3049_p6 = pnand %p3048_p5, %p3042_p2 }
 0x6bf   :  { %v2693_v44 = vmul.f32 0.7978846, %v2677_v54  ;;  %v2694_v49 = vmul.f32 0.7978846, %v2678_v10  ;;  %v2701_v21 = vmul.f32 0.7978846, %v2685_v62  ;;  %v2658_v63 = vmul.f32 %v2642_v4, %v5424_v20 }
 0x6c0   :  { %v2702_v50 = vmul.f32 0.7978846, %v2686_v13  ;;  %v2665_v39 = vmul.f32 %v2649_v25, %v5403_v12  ;;  %v2666_v45 = vmul.f32 %v2650_v58, %v5412_v29  ;;  %v2673_v11 = vmul.f32 %v2657_v0, %v5419_v36 }
 0x6c1   :  { %2965 = vtanh.f32 %v2693_v44  ;;  %v2674_v40 = vmul.f32 %v2658_v63, %v5424_v20  ;;  %v2613_v60 = vmul.f32 0.5, %v5369_v56  ;;  %v2614_v8 = vmul.f32 0.5, %v5374_v15 }
 0x6c2   :  { %2967 = vtanh.f32 %v2694_v49  ;;  %v2681_v30 = vadd.f32 %v2665_v39, %v5403_v12  ;;  %v2682_v18 = vadd.f32 %v2666_v45, %v5412_v29  ;;  %v2689_v14 = vadd.f32 %v2673_v11, %v5419_v36 }
 0x6c3   :  { %2969 = vtanh.f32 %v2701_v21  ;;  %v2690_v5 = vadd.f32 %v2674_v40, %v5424_v20  ;;  %v2621_v6 = vmul.f32 0.5, %v5379_v32  ;;  %v2622_v59 = vmul.f32 0.5, %v5384_v52 }
 0x6c4   :  { %2971 = vtanh.f32 %v2702_v50  ;;  %v2697_v57 = vmul.f32 0.7978846, %v2681_v30  ;;  %v2698_v46 = vmul.f32 0.7978846, %v2682_v18  ;;  %v2705_v17 = vmul.f32 0.7978846, %v2689_v14 }
 0x6c5   :  { %v2706_v28 = vmul.f32 0.7978846, %v2690_v5  ;;  %v2617_v15 = vmul.f32 0.5, %v5403_v12  ;;  %v2618_v48 = vmul.f32 0.5, %v5412_v29  ;;  %v2625_v35 = vmul.f32 0.5, %v5419_v36 }
 0x6c6   :  { %2973 = vtanh.f32 %v2697_v57  ;;  %v2626_v53 = vmul.f32 0.5, %v5424_v20 }
 0x6c7   :  { %2975 = vtanh.f32 %v2698_v46 }
 0x6c8   :  { %2977 = vtanh.f32 %v2705_v17 }
 0x6c9   :  { %2979 = vtanh.f32 %v2706_v28 }
 0x6cb   :  { %v2966_v55 = vpop.eup %2965 }
 0x6cc   :  { %v2968_v61 = vpop.eup %2967  ;;  %v2725_v41 = vadd.f32 1.0, %v2966_v55 }
 0x6cd   :  { %v2970_v23 = vpop.eup %2969  ;;  %v2726_v9 = vadd.f32 1.0, %v2968_v61 }
 0x6ce   :  { %v2972_v1 = vpop.eup %2971  ;;  %v2741_v24 = vmul.f32 %v2725_v41, %v2613_v60  ;;  %v2733_v42 = vadd.f32 1.0, %v2970_v23 }
 0x6cf   :  { %v2742_v47 = vmul.f32 %v2726_v9, %v2614_v8  ;;  %v2734_v19 = vadd.f32 1.0, %v2972_v1 }
 0x6d0   :  { %2757 = vst [vmem:[#allocation7 + $0x10] sm:$0xff] %v2741_v24  ;;  %v2749_v51 = vmul.f32 %v2733_v42, %v2621_v6  ;;  %v2974_v56 = vpop.eup %2973 }
 0x6d1   :  { %2758 = vst [vmem:[#allocation7 + $0x18] sm:$0xff] %v2742_v47  ;;  %v2750_v26 = vmul.f32 %v2734_v19, %v2622_v59  ;;  %v2976_v33 = vpop.eup %2975  ;;  %v2729_v3 = vadd.f32 1.0, %v2974_v56 }
 0x6d2   :  { %2765 = vst [vmem:[#allocation7 + $0x50] sm:$0xff] %v2749_v51  ;;  %v2978_v16 = vpop.eup %2977  ;;  %v2730_v32 = vadd.f32 1.0, %v2976_v33 }
 0x6d3   :  { %2766 = vst [vmem:[#allocation7 + $0x58] sm:$0xff] %v2750_v26  ;;  %v2980_v34 = vpop.eup %2979  ;;  %v2737_v52 = vadd.f32 1.0, %v2978_v16  ;;  %v2745_v37 = vmul.f32 %v2729_v3, %v2617_v15 }
 0x6d4   :  { %v2738_v22 = vadd.f32 1.0, %v2980_v34  ;;  %v2746_v2 = vmul.f32 %v2730_v32, %v2618_v48 }
 0x6d5   :  { %v2753_v54 = vmul.f32 %v2737_v52, %v2625_v35  ;;  %2761 = vst [vmem:[#allocation7 + $0x30] sm:$0xff] %v2745_v37 }
 0x6d6   :  { %v2754_v10 = vmul.f32 %v2738_v22, %v2626_v53  ;;  %2762 = vst [vmem:[#allocation7 + $0x38] sm:$0xff] %v2746_v2 }
 0x6d7   :  { %2769 = vst [vmem:[#allocation7 + $0x70] sm:$0xff] %v2753_v54 }
 0x6d8   :  { %2770 = vst [vmem:[#allocation7 + $0x78] sm:$0xff] %v2754_v10 }
 0x6d9   :  { %3052 = shalt.err (!%p3049_p6)
}
 0x6da   :  { %s3053_s11 = scalar_lea.hbm %s5474_s10, 2048 }
 0x6db   :  { %p3054_p7 = scmp.ne.s32.totalorder %s5474_s10, %s3053_s11  ;;  %p3057_p8 = scmp.lt.u32.totalorder %s3053_s11, %s5474_s10 }
 0x6dd   :  { %p3059_p9 = pnand %p3057_p8, %p3054_p7 }
 0x6df   :  { %3062 = shalt.err (!%p3059_p9)
}
 0x6e0   :  { %s3085_s17 = smov 512   ;;  %s3086_s7 = smov 32  }
 0x6e1   :  { %2782 = dma.vmem_to_hbm [thread:$0]  %s2777_s19, 2048, %s5474_s10, [#allocation4], %s3085_s17, %s3085_s17, %s3086_s7  }
 0x6e2   :  { %3067 = dma.done.wait [#allocation4], 2048  }
 0x6e3   :  { %3068 = vsyncadd [#allocation4], 4294965248 }
 0x6e4   :  { %2786 = vsyncpa [#allocation3], 1 }
 0x6e5   :  { %2787 = vsyncpa [#allocation6], 1 }
 0x6e6   :  { %2788 = vsyncpa [#allocation4], 1 }

</bundles_post_ra>
